<compile_context>
chip_gen: v7x
topology: tpu7x:2x2x1
jax: 0.10.0
libtpu: 0.0.40
codegen_flags: <defaults>
</compile_context>

<pallas_src>
import functools

import jax
import jax.numpy as jnp
from jax.experimental import pallas as pl
from jax.experimental.pallas import tpu as pltpu


def _vmem_capacity_bytes():
  """Physical per-core VMEM; conservative v7x default if the query fails."""
  try:
    info = pltpu.get_tpu_info()
    cap = getattr(info, "vmem_capacity_bytes", None)
    if cap:
      return int(cap)
  except Exception:
    pass
  return 64 * 1024 * 1024


def _apply_gates(gates, c_prev, hidden_size):
  """Gate columns are pre-permuted to [i, f, o, g] (see wrapper)."""
  H = hidden_size
  sig = jax.nn.sigmoid(gates[:, :3 * H])   # i | f | o  -> one EUP pass
  g_g = jnp.tanh(gates[:, 3 * H:])         # g          -> one EUP pass
  i_g = sig[:, 0 * H:1 * H]
  f_g = sig[:, 1 * H:2 * H]
  o_g = sig[:, 2 * H:3 * H]
  c_new = f_g * c_prev + i_g * g_g
  h_new = o_g * jnp.tanh(c_new)
  return h_new, c_new


def _lstm_serial_kernel(x_ref, w_ih0_ref, w_hh0_ref, w_ihr_ref, w_hhr_ref,
                        b_ref, h_out_ref, c_out_ref, xw0_sc,
                        *, num_layers, hidden_size, t_block, t_total,
                        needs_mask, unroll):
  """One grid step == `t_block` time steps for one batch tile.

  Grid = (batch_tiles [parallel], time_blocks [arbitrary]).  (h, c) live in
  the resident output blocks (same block index across the time axis); within
  a block they are fori_loop carries.
  """
  L, H = num_layers, hidden_size
  tb = pl.program_id(1)
  w_dtype = w_hh0_ref.dtype
  tbk, bblk, isz = x_ref.shape

  # h_c is None in RNN_Serial.forward -> zero state at the first time block
  # (per batch tile; tb restarts at 0 for every batch tile).
  @pl.when(tb == 0)
  def _():
    h_out_ref[...] = jnp.zeros_like(h_out_ref)
    c_out_ref[...] = jnp.zeros_like(c_out_ref)

  # ---- time-parallel layer-0 input projection: one big MXU GEMM per block,
  #      with the layer-0 fused bias folded in ----
  x_blk = x_ref[...].reshape(tbk * bblk, isz).astype(w_dtype)
  xw0 = (jnp.dot(x_blk, w_ih0_ref[...], preferred_element_type=jnp.float32)
         + b_ref[0:1, :])
  xw0_sc[...] = xw0.reshape(tbk, bblk, 4 * H)

  # ---- hoist all loop-invariant reads / broadcasts out of the recurrence ----
  w_hh0 = w_hh0_ref[...]
  w_ihr = [w_ihr_ref[l] for l in range(L - 1)]
  w_hhr = [w_hhr_ref[l] for l in range(L - 1)]
  b_r = [jnp.broadcast_to(b_ref[l + 1:l + 2, :], (bblk, 4 * H))
         for l in range(L - 1)]

  hs0 = tuple(h_out_ref[l] for l in range(L))
  cs0 = tuple(c_out_ref[l] for l in range(L))

  def step(s, carry):
    hs, cs = carry
    new_hs, new_cs = [], []

    # ---- layer 0: x projection + bias precomputed into xw0_sc ----
    gates = xw0_sc[s] + jnp.dot(hs[0].astype(w_dtype), w_hh0,
                                preferred_element_type=jnp.float32)
    h_new, c_new = _apply_gates(gates, cs[0], H)
    new_hs.append(h_new)
    new_cs.append(c_new)
    inp = h_new

    # ---- layers 1..L-1: two accumulating dots (no per-step concat) ----
    for l in range(1, L):
      gates = (jnp.dot(inp.astype(w_dtype), w_ihr[l - 1],
                       preferred_element_type=jnp.float32)
               + jnp.dot(hs[l].astype(w_dtype), w_hhr[l - 1],
                         preferred_element_type=jnp.float32)
               + b_r[l - 1])
      h_new, c_new = _apply_gates(gates, cs[l], H)
      new_hs.append(h_new)
      new_cs.append(c_new)
      inp = h_new

    if needs_mask:
      # Last time block may be zero-padded; freeze the state on padded steps.
      valid = (tb * t_block + s) < t_total
      new_hs = [jnp.where(valid, n, o) for n, o in zip(new_hs, hs)]
      new_cs = [jnp.where(valid, n, o) for n, o in zip(new_cs, cs)]
    return tuple(new_hs), tuple(new_cs)

  hs, cs = jax.lax.fori_loop(0, t_block, step, (hs0, cs0), unroll=unroll)

  for l in range(L):
    h_out_ref[l] = hs[l]
    c_out_ref[l] = cs[l]


def rnn_serial_forward(x, w_ih, w_hh, b_ih, b_hh, *, num_layers, hidden_size,
                       dt=1.0, t_block=None, batch_block=None,
                       weight_dtype=jnp.float32):
  """Pallas equivalent of RNN_Serial.forward(x) with h_c=None.

  Args:
    x:     (batch, seq, input_size) float32
    w_ih:  (num_layers, 4*hidden, input_size)   (PyTorch LSTM weight_ih_l{k})
    w_hh:  (num_layers, 4*hidden, hidden)
    b_ih:  (num_layers, 4*hidden)
    b_hh:  (num_layers, 4*hidden)
    t_block:     time steps folded into one grid step.  Default is derived
                 from a per-generation VMEM budget (capped at min(T, 128)).
    batch_block: batch tile per grid step; must divide batch and be a
                 multiple of 8 (or equal batch).  >1 tiles get a "parallel"
                 grid axis (megacore / v7x second TensorCore).
    weight_dtype: MXU operand dtype.  jnp.bfloat16 is recommended on all
                 generations (v5e/v6e/v7x MXUs are bf16-native); gate math and
                 the (h, c) state stay float32.
  Returns:
    (h, c): each (num_layers, batch, hidden_size), float32
  """
  del dt  # forwarded to RNN_model but unused by the LSTM cell stack
  B, T, I = x.shape
  L, H = num_layers, hidden_size
  f32 = jnp.float32
  assert w_ih.shape == (L, 4 * H, I)
  assert w_hh.shape == (L, 4 * H, H)
  assert b_ih.shape == (L, 4 * H) and b_hh.shape == (L, 4 * H)
  if L > 1:
    # Stacked-weight API: layers >= 1 consume the previous layer's h (size H).
    assert I == H, "stacked layers require input_size == hidden_size"

  if batch_block is None:
    # TODO(synk): on v7x default to B // 2 (multiple of 8, >= 16) so the
    # "parallel" batch axis shards the work across the two TensorCores.
    batch_block = B
  assert B % batch_block == 0, "batch_block must divide batch"
  assert batch_block == B or batch_block % 8 == 0, \
      "batch_block must be a multiple of 8 (f32 sublane tiling) or equal batch"

  # Gate-column permutation: PyTorch order [i, f, g, o] -> [i, f, o, g] so the
  # kernel runs one sigmoid over 3H lanes and one tanh over the last H lanes.
  idx = jnp.arange(H)
  perm = jnp.concatenate([idx, idx + H, idx + 3 * H, idx + 2 * H])
  w_ih_p = w_ih[:, perm, :].astype(f32)
  w_hh_p = w_hh[:, perm, :].astype(f32)
  b_p = (b_ih + b_hh)[:, perm].astype(f32)                 # fused bias (L, 4H)

  w_ih0_t = jnp.transpose(w_ih_p[0]).astype(weight_dtype)  # (I, 4H)
  w_hh0_t = jnp.transpose(w_hh_p[0]).astype(weight_dtype)  # (H, 4H)
  if L > 1:
    w_ihr = jnp.transpose(w_ih_p[1:], (0, 2, 1)).astype(weight_dtype)
    w_hhr = jnp.transpose(w_hh_p[1:], (0, 2, 1)).astype(weight_dtype)
  else:
    # Dummy (never read) so block shapes stay non-empty when L == 1.
    w_ihr = jnp.zeros((1, H, 4 * H), weight_dtype)
    w_hhr = jnp.zeros((1, H, 4 * H), weight_dtype)
  Lr = w_ihr.shape[0]

  # ---- per-generation VMEM budgeting ----
  vmem_cap = _vmem_capacity_bytes()
  w_bytes = jnp.dtype(weight_dtype).itemsize
  weight_bytes = ((I + H) * 4 * H + 2 * Lr * H * 4 * H) * w_bytes + L * 4 * H * 4
  state_bytes = 2 * 2 * L * batch_block * H * 4       # double-buffered h/c outs
  per_t_bytes = batch_block * (2 * I + 4 * H) * 4     # x (x2 bufs) + xw0 scratch

  if t_block is None:
    budget = int(0.45 * vmem_cap)
    t_block = (budget - 2 * weight_bytes - state_bytes) // per_t_bytes
    t_block = int(min(T, 128, t_block))
  t_block = int(max(1, min(int(t_block), T)))

  num_tb = pl.cdiv(T, t_block)
  t_pad = num_tb * t_block
  num_bb = B // batch_block

  # Time-major x, padded so every grid block has exactly t_block steps
  # (padded steps are masked out inside the kernel).
  x_tm = jnp.transpose(x, (1, 0, 2)).astype(f32)       # (T, B, I)
  if t_pad != T:
    x_tm = jnp.pad(x_tm, ((0, t_pad - T), (0, 0), (0, 0)))

  # Partial unroll: full for tiny blocks, 4-wide otherwise (LLO overlap window
  # without the vreg blow-up of fully unrolling 128 steps).
  unroll = t_block if t_block <= 8 else 4

  kernel = functools.partial(
      _lstm_serial_kernel,
      num_layers=L, hidden_size=H, t_block=t_block, t_total=T,
      needs_mask=(t_pad != T), unroll=unroll)

  def build(single_buffer_weights):
    inv_kw = (dict(pipeline_mode=pl.Buffered(1))
              if single_buffer_weights else {})
    n_wbuf = 1 if single_buffer_weights else 2
    vmem_est = (2 * t_block * batch_block * I * 4       # x blocks (x2 buffers)
                + t_block * batch_block * 4 * H * 4     # xw0 scratch
                + n_wbuf * weight_bytes                 # weights + biases
                + state_bytes)                          # resident h/c outputs
    compiler_kwargs = dict(dimension_semantics=("parallel", "arbitrary"))
    # v5e's scoped-VMEM default is 16 MiB (smallest across generations); raise
    # the limit whenever the estimate exceeds it, capped below physical VMEM.
    if vmem_est > 15 * 1024 * 1024:
      compiler_kwargs["vmem_limit_bytes"] = int(
          min(max(int(1.25 * vmem_est), 16 * 1024 * 1024),
              vmem_cap - 4 * 1024 * 1024))
    return pl.pallas_call(
        kernel,
        out_shape=(jax.ShapeDtypeStruct((L, B, H), f32),
                   jax.ShapeDtypeStruct((L, B, H), f32)),
        grid_spec=pltpu.PrefetchScalarGridSpec(
            num_scalar_prefetch=0,
            grid=(num_bb, num_tb),
            in_specs=[
                pl.BlockSpec((t_block, batch_block, I),
                             lambda bb, tb: (tb, bb, 0)),            # x block
                pl.BlockSpec((I, 4 * H), lambda bb, tb: (0, 0),
                             **inv_kw),                              # W_ih0^T
                pl.BlockSpec((H, 4 * H), lambda bb, tb: (0, 0),
                             **inv_kw),                              # W_hh0^T
                pl.BlockSpec((Lr, H, 4 * H), lambda bb, tb: (0, 0, 0),
                             **inv_kw),                              # W_ih l>=1
                pl.BlockSpec((Lr, H, 4 * H), lambda bb, tb: (0, 0, 0),
                             **inv_kw),                              # W_hh l>=1
                pl.BlockSpec((L, 4 * H), lambda bb, tb: (0, 0),
                             **inv_kw),                              # fused bias
            ],
            out_specs=[
                # Same block index across the time axis -> resident state.
                pl.BlockSpec((L, batch_block, H), lambda bb, tb: (0, bb, 0)),
                pl.BlockSpec((L, batch_block, H), lambda bb, tb: (0, bb, 0)),
            ],
            scratch_shapes=[
                pltpu.VMEM((t_block, batch_block, 4 * H), f32),  # xw0 per block
            ],
        ),
        compiler_params=pltpu.CompilerParams(**compiler_kwargs),
    )

  args = (x_tm, w_ih0_t, w_hh0_t, w_ihr, w_hhr, b_p)
  try:
    h, c = build(True)(*args)
  except Exception:
    # pipeline_mode=pl.Buffered(1) unsupported on this JAX/Mosaic build ->
    # fall back to default double-buffered (loop-invariant) weight blocks.
    h, c = build(False)(*args)
  return h, c


def _rnn_serial_ref(x, w_ih, w_hh, b_ih, b_hh, num_layers, hidden_size):
  """Pure-JAX reference (mirrors nn.LSTM step-by-step semantics)."""
  B, T, _ = x.shape
  H = hidden_size
  h = jnp.zeros((num_layers, B, H), jnp.float32)
  c = jnp.zeros((num_layers, B, H), jnp.float32)
  for t in range(T):
    inp = x[:, t, :]
    h_new, c_new = [], []
    for l in range(num_layers):
      gates = inp @ w_ih[l].T + h[l] @ w_hh[l].T + b_ih[l] + b_hh[l]
      i_g = jax.nn.sigmoid(gates[:, 0 * H:1 * H])
      f_g = jax.nn.sigmoid(gates[:, 1 * H:2 * H])
      g_g = jnp.tanh(gates[:, 2 * H:3 * H])
      o_g = jax.nn.sigmoid(gates[:, 3 * H:4 * H])
      cl = f_g * c[l] + i_g * g_g
      hl = o_g * jnp.tanh(cl)
      h_new.append(hl)
      c_new.append(cl)
      inp = hl
    h = jnp.stack(h_new)
    c = jnp.stack(c_new)
  return h, c


if __name__ == "__main__":
  # Small shapes consistent with the module's forward:
  #   x: (batch, seq, input_size); state: (num_layers, batch, hidden_size)
  num_layers = 2
  batch = 8
  seq = 8
  hidden = 32
  input_size = hidden  # stacked-LSTM convention (layer-0 input == hidden here)

  key = jax.random.PRNGKey(0)
  k_x, k_wi, k_wh, k_bi, k_bh = jax.random.split(key, 5)
  scale = 1.0 / jnp.sqrt(hidden)  # PyTorch LSTM default init range
  x = jax.random.normal(k_x, (batch, seq, input_size), jnp.float32)
  w_ih = jax.random.uniform(k_wi, (num_layers, 4 * hidden, input_size),
                            jnp.float32, -scale, scale)
  w_hh = jax.random.uniform(k_wh, (num_layers, 4 * hidden, hidden),
                            jnp.float32, -scale, scale)
  b_ih = jax.random.uniform(k_bi, (num_layers, 4 * hidden),
                            jnp.float32, -scale, scale)
  b_hh = jax.random.uniform(k_bh, (num_layers, 4 * hidden),
                            jnp.float32, -scale, scale)

  h_ref, c_ref = _rnn_serial_ref(x, w_ih, w_hh, b_ih, b_hh, num_layers, hidden)

  # 1) Default path: whole sequence folded into a single grid step.
  h, c = rnn_serial_forward(x, w_ih, w_hh, b_ih, b_hh,
                            num_layers=num_layers, hidden_size=hidden, dt=1.0)
  jax.block_until_ready((h, c))
  assert h.shape == (num_layers, batch, hidden)
  assert c.shape == (num_layers, batch, hidden)
  assert jnp.allclose(h, h_ref, atol=1e-5, rtol=1e-5)
  assert jnp.allclose(c, c_ref, atol=1e-5, rtol=1e-5)

  # 2) Time-blocked path (T not divisible by t_block -> exercises the padded
  #    last block, its mask, and the output-block-resident state across tb).
  h2, c2 = rnn_serial_forward(x, w_ih, w_hh, b_ih, b_hh,
                              num_layers=num_layers, hidden_size=hidden,
                              dt=1.0, t_block=3)
  jax.block_until_ready((h2, c2))
  assert jnp.allclose(h2, h_ref, atol=1e-5, rtol=1e-5)
  assert jnp.allclose(c2, c_ref, atol=1e-5, rtol=1e-5)

  # 3) bf16 MXU-operand path (state / gate math stay f32); loose tolerance.
  h3, c3 = rnn_serial_forward(x, w_ih, w_hh, b_ih, b_hh,
                              num_layers=num_layers, hidden_size=hidden,
                              dt=1.0, weight_dtype=jnp.bfloat16)
  jax.block_until_ready((h3, c3))
  assert jnp.allclose(h3, h_ref, atol=5e-2, rtol=5e-2)
  assert jnp.allclose(c3, c_ref, atol=5e-2, rtol=5e-2)

  print("KERNEL_OK")
</pallas_src>

<mosaic_0001>
module attributes {stable_mosaic.version = 11 : i64} {
  func.func @_lstm_serial_kernel(%arg0: i32, %arg1: i32, %arg2: memref<8x8x32xf32, #tpu.memory_space<vmem>>, %arg3: memref<32x128xf32, #tpu.memory_space<vmem>>, %arg4: memref<32x128xf32, #tpu.memory_space<vmem>>, %arg5: memref<1x32x128xf32, #tpu.memory_space<vmem>>, %arg6: memref<1x32x128xf32, #tpu.memory_space<vmem>>, %arg7: memref<2x128xf32, #tpu.memory_space<vmem>>, %arg8: memref<2x8x32xf32, #tpu.memory_space<vmem>>, %arg9: memref<2x8x32xf32, #tpu.memory_space<vmem>>, %arg10: memref<8x8x128xf32, #tpu.memory_space<vmem>>) attributes {dimension_semantics = [#tpu.dimension_semantics<parallel>, #tpu.dimension_semantics<arbitrary>], iteration_bounds = array<i64: 1, 1>, scalar_prefetch = 0 : i64, scratch_operands = 1 : i64, tpu.core_type = #tpu.core_type<tc>, window_params = [{transform_indices = @transform_0, window_bounds = array<i64: 8, 8, 32>}, {pipeline_mode = #tpu.pipeline_mode<synchronous>, transform_indices = @transform_1, window_bounds = array<i64: 32, 128>}, {pipeline_mode = #tpu.pipeline_mode<synchronous>, transform_indices = @transform_2, window_bounds = array<i64: 32, 128>}, {pipeline_mode = #tpu.pipeline_mode<synchronous>, transform_indices = @transform_3, window_bounds = array<i64: 1, 32, 128>}, {pipeline_mode = #tpu.pipeline_mode<synchronous>, transform_indices = @transform_4, window_bounds = array<i64: 1, 32, 128>}, {pipeline_mode = #tpu.pipeline_mode<synchronous>, transform_indices = @transform_5, window_bounds = array<i64: 2, 128>}, {transform_indices = @transform_6, window_bounds = array<i64: 2, 8, 32>}, {transform_indices = @transform_7, window_bounds = array<i64: 2, 8, 32>}]} {
    %c0_i32 = arith.constant 0 : i32
    %0 = arith.cmpi eq, %arg1, %c0_i32 : i32
    %1 = arith.extui %0 : i1 to i32
    %c0_i32_0 = arith.constant 0 : i32
    %2 = arith.cmpi ne, %1, %c0_i32_0 : i32
    scf.if %2 {
      %cst_100 = arith.constant 0.000000e+00 : f32
      %368 = vector.broadcast %cst_100 : f32 to vector<2x8x32xf32>
      %c0_101 = arith.constant 0 : index
      %c0_102 = arith.constant 0 : index
      %c0_103 = arith.constant 0 : index
      %369 = vector.load %arg8[%c0_101, %c0_102, %c0_103] : memref<2x8x32xf32, #tpu.memory_space<vmem>>, vector<2x8x32xf32>
      tpu.vector_store %arg8[%c0_101, %c0_102, %c0_103], %368 {strides = array<i32>} : memref<2x8x32xf32, #tpu.memory_space<vmem>>, vector<2x8x32xf32>,
      %cst_104 = arith.constant 0.000000e+00 : f32
      %370 = vector.broadcast %cst_104 : f32 to vector<2x8x32xf32>
      %c0_105 = arith.constant 0 : index
      %c0_106 = arith.constant 0 : index
      %c0_107 = arith.constant 0 : index
      %371 = vector.load %arg9[%c0_105, %c0_106, %c0_107] : memref<2x8x32xf32, #tpu.memory_space<vmem>>, vector<2x8x32xf32>
      tpu.vector_store %arg9[%c0_105, %c0_106, %c0_107], %370 {strides = array<i32>} : memref<2x8x32xf32, #tpu.memory_space<vmem>>, vector<2x8x32xf32>,
    } else {
    }
    %c0 = arith.constant 0 : index
    %c0_1 = arith.constant 0 : index
    %c0_2 = arith.constant 0 : index
    %3 = vector.load %arg2[%c0, %c0_1, %c0_2] : memref<8x8x32xf32, #tpu.memory_space<vmem>>, vector<8x8x32xf32>
    %4 = vector.shape_cast %3 : vector<8x8x32xf32> to vector<64x32xf32>
    %c0_3 = arith.constant 0 : index
    %c0_4 = arith.constant 0 : index
    %5 = vector.load %arg3[%c0_3, %c0_4] : memref<32x128xf32, #tpu.memory_space<vmem>>, vector<32x128xf32>
    %cst = arith.constant dense<0.000000e+00> : vector<64x128xf32>
    %6 = tpu.matmul %4, %5, %cst {dimension_numbers = #tpu.dot_dimension_numbers<[1], [0], [0], [1], [0, 0, 1, 1], [], []>} : vector<64x32xf32>, vector<32x128xf32>, vector<64x128xf32> -> vector<64x128xf32>
    %c0_5 = arith.constant 0 : index
    %c0_6 = arith.constant 0 : index
    %7 = vector.load %arg7[%c0_5, %c0_6] : memref<2x128xf32, #tpu.memory_space<vmem>>, vector<1x128xf32>
    %8 = vector.broadcast %7 : vector<1x128xf32> to vector<64x128xf32>
    %9 = arith.addf %6, %8 : vector<64x128xf32>
    %10 = vector.shape_cast %9 : vector<64x128xf32> to vector<8x8x128xf32>
    %c0_7 = arith.constant 0 : index
    %c0_8 = arith.constant 0 : index
    %c0_9 = arith.constant 0 : index
    %11 = vector.load %arg10[%c0_7, %c0_8, %c0_9] : memref<8x8x128xf32, #tpu.memory_space<vmem>>, vector<8x8x128xf32>
    tpu.vector_store %arg10[%c0_7, %c0_8, %c0_9], %10 {strides = array<i32>} : memref<8x8x128xf32, #tpu.memory_space<vmem>>, vector<8x8x128xf32>,
    %c0_10 = arith.constant 0 : index
    %c0_11 = arith.constant 0 : index
    %12 = vector.load %arg4[%c0_10, %c0_11] : memref<32x128xf32, #tpu.memory_space<vmem>>, vector<32x128xf32>
    %c0_12 = arith.constant 0 : index
    %c0_13 = arith.constant 0 : index
    %c0_14 = arith.constant 0 : index
    %13 = vector.load %arg5[%c0_12, %c0_13, %c0_14] : memref<1x32x128xf32, #tpu.memory_space<vmem>>, vector<1x32x128xf32>
    %14 = vector.shape_cast %13 : vector<1x32x128xf32> to vector<32x128xf32>
    %c0_15 = arith.constant 0 : index
    %c0_16 = arith.constant 0 : index
    %c0_17 = arith.constant 0 : index
    %15 = vector.load %arg6[%c0_15, %c0_16, %c0_17] : memref<1x32x128xf32, #tpu.memory_space<vmem>>, vector<1x32x128xf32>
    %16 = vector.shape_cast %15 : vector<1x32x128xf32> to vector<32x128xf32>
    %c1 = arith.constant 1 : index
    %c0_18 = arith.constant 0 : index
    %17 = vector.load %arg7[%c1, %c0_18] : memref<2x128xf32, #tpu.memory_space<vmem>>, vector<1x128xf32>
    %18 = vector.shape_cast %17 : vector<1x128xf32> to vector<1x128xf32>
    %19 = vector.broadcast %18 : vector<1x128xf32> to vector<8x128xf32>
    %c0_19 = arith.constant 0 : index
    %c0_20 = arith.constant 0 : index
    %c0_21 = arith.constant 0 : index
    %20 = vector.load %arg8[%c0_19, %c0_20, %c0_21] : memref<2x8x32xf32, #tpu.memory_space<vmem>>, vector<1x8x32xf32>
    %21 = vector.shape_cast %20 : vector<1x8x32xf32> to vector<8x32xf32>
    %c1_22 = arith.constant 1 : index
    %c0_23 = arith.constant 0 : index
    %c0_24 = arith.constant 0 : index
    %22 = vector.load %arg8[%c1_22, %c0_23, %c0_24] : memref<2x8x32xf32, #tpu.memory_space<vmem>>, vector<1x8x32xf32>
    %23 = vector.shape_cast %22 : vector<1x8x32xf32> to vector<8x32xf32>
    %c0_25 = arith.constant 0 : index
    %c0_26 = arith.constant 0 : index
    %c0_27 = arith.constant 0 : index
    %24 = vector.load %arg9[%c0_25, %c0_26, %c0_27] : memref<2x8x32xf32, #tpu.memory_space<vmem>>, vector<1x8x32xf32>
    %25 = vector.shape_cast %24 : vector<1x8x32xf32> to vector<8x32xf32>
    %c1_28 = arith.constant 1 : index
    %c0_29 = arith.constant 0 : index
    %c0_30 = arith.constant 0 : index
    %26 = vector.load %arg9[%c1_28, %c0_29, %c0_30] : memref<2x8x32xf32, #tpu.memory_space<vmem>>, vector<1x8x32xf32>
    %27 = vector.shape_cast %26 : vector<1x8x32xf32> to vector<8x32xf32>
    %c0_i32_31 = arith.constant 0 : i32
    %28 = arith.index_cast %c0_i32_31 : i32 to index
    %c0_32 = arith.constant 0 : index
    %c0_33 = arith.constant 0 : index
    %29 = vector.load %arg10[%28, %c0_32, %c0_33] : memref<8x8x128xf32, #tpu.memory_space<vmem>>, vector<1x8x128xf32>
    %30 = vector.shape_cast %29 : vector<1x8x128xf32> to vector<8x128xf32>
    %cst_34 = arith.constant dense<0.000000e+00> : vector<8x128xf32>
    %31 = tpu.matmul %21, %12, %cst_34 {dimension_numbers = #tpu.dot_dimension_numbers<[1], [0], [0], [1], [0, 0, 1, 1], [], []>} : vector<8x32xf32>, vector<32x128xf32>, vector<8x128xf32> -> vector<8x128xf32>
    %32 = arith.addf %30, %31 : vector<8x128xf32>
    %33 = vector.extract_strided_slice %32 {offsets = [0, 0], sizes = [8, 96], strides = [1, 1]} : vector<8x128xf32> to vector<8x96xf32>
    %34 = arith.negf %33 : vector<8x96xf32>
    %35 = math.exp %34 : vector<8x96xf32>
    %cst_35 = arith.constant 1.000000e+00 : f32
    %36 = vector.broadcast %cst_35 : f32 to vector<8x96xf32>
    %37 = arith.addf %36, %35 : vector<8x96xf32>
    %38 = arith.divf %36, %37 : vector<8x96xf32>
    %39 = vector.extract_strided_slice %32 {offsets = [0, 96], sizes = [8, 32], strides = [1, 1]} : vector<8x128xf32> to vector<8x32xf32>
    %40 = math.tanh %39 : vector<8x32xf32>
    %41 = vector.extract_strided_slice %38 {offsets = [0, 0], sizes = [8, 32], strides = [1, 1]} : vector<8x96xf32> to vector<8x32xf32>
    %42 = vector.extract_strided_slice %38 {offsets = [0, 32], sizes = [8, 32], strides = [1, 1]} : vector<8x96xf32> to vector<8x32xf32>
    %43 = vector.extract_strided_slice %38 {offsets = [0, 64], sizes = [8, 32], strides = [1, 1]} : vector<8x96xf32> to vector<8x32xf32>
    %44 = arith.mulf %42, %25 : vector<8x32xf32>
    %45 = arith.mulf %41, %40 : vector<8x32xf32>
    %46 = arith.addf %44, %45 : vector<8x32xf32>
    %47 = math.tanh %46 : vector<8x32xf32>
    %48 = arith.mulf %43, %47 : vector<8x32xf32>
    %cst_36 = arith.constant dense<0.000000e+00> : vector<8x128xf32>
    %49 = tpu.matmul %48, %14, %cst_36 {dimension_numbers = #tpu.dot_dimension_numbers<[1], [0], [0], [1], [0, 0, 1, 1], [], []>} : vector<8x32xf32>, vector<32x128xf32>, vector<8x128xf32> -> vector<8x128xf32>
    %cst_37 = arith.constant dense<0.000000e+00> : vector<8x128xf32>
    %50 = tpu.matmul %23, %16, %cst_37 {dimension_numbers = #tpu.dot_dimension_numbers<[1], [0], [0], [1], [0, 0, 1, 1], [], []>} : vector<8x32xf32>, vector<32x128xf32>, vector<8x128xf32> -> vector<8x128xf32>
    %51 = arith.addf %49, %50 : vector<8x128xf32>
    %52 = arith.addf %51, %19 : vector<8x128xf32>
    %53 = vector.extract_strided_slice %52 {offsets = [0, 0], sizes = [8, 96], strides = [1, 1]} : vector<8x128xf32> to vector<8x96xf32>
    %54 = arith.negf %53 : vector<8x96xf32>
    %55 = math.exp %54 : vector<8x96xf32>
    %cst_38 = arith.constant 1.000000e+00 : f32
    %56 = vector.broadcast %cst_38 : f32 to vector<8x96xf32>
    %57 = arith.addf %56, %55 : vector<8x96xf32>
    %58 = arith.divf %56, %57 : vector<8x96xf32>
    %59 = vector.extract_strided_slice %52 {offsets = [0, 96], sizes = [8, 32], strides = [1, 1]} : vector<8x128xf32> to vector<8x32xf32>
    %60 = math.tanh %59 : vector<8x32xf32>
    %61 = vector.extract_strided_slice %58 {offsets = [0, 0], sizes = [8, 32], strides = [1, 1]} : vector<8x96xf32> to vector<8x32xf32>
    %62 = vector.extract_strided_slice %58 {offsets = [0, 32], sizes = [8, 32], strides = [1, 1]} : vector<8x96xf32> to vector<8x32xf32>
    %63 = vector.extract_strided_slice %58 {offsets = [0, 64], sizes = [8, 32], strides = [1, 1]} : vector<8x96xf32> to vector<8x32xf32>
    %64 = arith.mulf %62, %27 : vector<8x32xf32>
    %65 = arith.mulf %61, %60 : vector<8x32xf32>
    %66 = arith.addf %64, %65 : vector<8x32xf32>
    %67 = math.tanh %66 : vector<8x32xf32>
    %68 = arith.mulf %63, %67 : vector<8x32xf32>
    %c1_i32 = arith.constant 1 : i32
    %69 = arith.index_cast %c1_i32 : i32 to index
    %c0_39 = arith.constant 0 : index
    %c0_40 = arith.constant 0 : index
    %70 = vector.load %arg10[%69, %c0_39, %c0_40] : memref<8x8x128xf32, #tpu.memory_space<vmem>>, vector<1x8x128xf32>
    %71 = vector.shape_cast %70 : vector<1x8x128xf32> to vector<8x128xf32>
    %cst_41 = arith.constant dense<0.000000e+00> : vector<8x128xf32>
    %72 = tpu.matmul %48, %12, %cst_41 {dimension_numbers = #tpu.dot_dimension_numbers<[1], [0], [0], [1], [0, 0, 1, 1], [], []>} : vector<8x32xf32>, vector<32x128xf32>, vector<8x128xf32> -> vector<8x128xf32>
    %73 = arith.addf %71, %72 : vector<8x128xf32>
    %74 = vector.extract_strided_slice %73 {offsets = [0, 0], sizes = [8, 96], strides = [1, 1]} : vector<8x128xf32> to vector<8x96xf32>
    %75 = arith.negf %74 : vector<8x96xf32>
    %76 = math.exp %75 : vector<8x96xf32>
    %cst_42 = arith.constant 1.000000e+00 : f32
    %77 = vector.broadcast %cst_42 : f32 to vector<8x96xf32>
    %78 = arith.addf %77, %76 : vector<8x96xf32>
    %79 = arith.divf %77, %78 : vector<8x96xf32>
    %80 = vector.extract_strided_slice %73 {offsets = [0, 96], sizes = [8, 32], strides = [1, 1]} : vector<8x128xf32> to vector<8x32xf32>
    %81 = math.tanh %80 : vector<8x32xf32>
    %82 = vector.extract_strided_slice %79 {offsets = [0, 0], sizes = [8, 32], strides = [1, 1]} : vector<8x96xf32> to vector<8x32xf32>
    %83 = vector.extract_strided_slice %79 {offsets = [0, 32], sizes = [8, 32], strides = [1, 1]} : vector<8x96xf32> to vector<8x32xf32>
    %84 = vector.extract_strided_slice %79 {offsets = [0, 64], sizes = [8, 32], strides = [1, 1]} : vector<8x96xf32> to vector<8x32xf32>
    %85 = arith.mulf %83, %46 : vector<8x32xf32>
    %86 = arith.mulf %82, %81 : vector<8x32xf32>
    %87 = arith.addf %85, %86 : vector<8x32xf32>
    %88 = math.tanh %87 : vector<8x32xf32>
    %89 = arith.mulf %84, %88 : vector<8x32xf32>
    %cst_43 = arith.constant dense<0.000000e+00> : vector<8x128xf32>
    %90 = tpu.matmul %89, %14, %cst_43 {dimension_numbers = #tpu.dot_dimension_numbers<[1], [0], [0], [1], [0, 0, 1, 1], [], []>} : vector<8x32xf32>, vector<32x128xf32>, vector<8x128xf32> -> vector<8x128xf32>
    %cst_44 = arith.constant dense<0.000000e+00> : vector<8x128xf32>
    %91 = tpu.matmul %68, %16, %cst_44 {dimension_numbers = #tpu.dot_dimension_numbers<[1], [0], [0], [1], [0, 0, 1, 1], [], []>} : vector<8x32xf32>, vector<32x128xf32>, vector<8x128xf32> -> vector<8x128xf32>
    %92 = arith.addf %90, %91 : vector<8x128xf32>
    %93 = arith.addf %92, %19 : vector<8x128xf32>
    %94 = vector.extract_strided_slice %93 {offsets = [0, 0], sizes = [8, 96], strides = [1, 1]} : vector<8x128xf32> to vector<8x96xf32>
    %95 = arith.negf %94 : vector<8x96xf32>
    %96 = math.exp %95 : vector<8x96xf32>
    %cst_45 = arith.constant 1.000000e+00 : f32
    %97 = vector.broadcast %cst_45 : f32 to vector<8x96xf32>
    %98 = arith.addf %97, %96 : vector<8x96xf32>
    %99 = arith.divf %97, %98 : vector<8x96xf32>
    %100 = vector.extract_strided_slice %93 {offsets = [0, 96], sizes = [8, 32], strides = [1, 1]} : vector<8x128xf32> to vector<8x32xf32>
    %101 = math.tanh %100 : vector<8x32xf32>
    %102 = vector.extract_strided_slice %99 {offsets = [0, 0], sizes = [8, 32], strides = [1, 1]} : vector<8x96xf32> to vector<8x32xf32>
    %103 = vector.extract_strided_slice %99 {offsets = [0, 32], sizes = [8, 32], strides = [1, 1]} : vector<8x96xf32> to vector<8x32xf32>
    %104 = vector.extract_strided_slice %99 {offsets = [0, 64], sizes = [8, 32], strides = [1, 1]} : vector<8x96xf32> to vector<8x32xf32>
    %105 = arith.mulf %103, %66 : vector<8x32xf32>
    %106 = arith.mulf %102, %101 : vector<8x32xf32>
    %107 = arith.addf %105, %106 : vector<8x32xf32>
    %108 = math.tanh %107 : vector<8x32xf32>
    %109 = arith.mulf %104, %108 : vector<8x32xf32>
    %c2_i32 = arith.constant 2 : i32
    %110 = arith.index_cast %c2_i32 : i32 to index
    %c0_46 = arith.constant 0 : index
    %c0_47 = arith.constant 0 : index
    %111 = vector.load %arg10[%110, %c0_46, %c0_47] : memref<8x8x128xf32, #tpu.memory_space<vmem>>, vector<1x8x128xf32>
    %112 = vector.shape_cast %111 : vector<1x8x128xf32> to vector<8x128xf32>
    %cst_48 = arith.constant dense<0.000000e+00> : vector<8x128xf32>
    %113 = tpu.matmul %89, %12, %cst_48 {dimension_numbers = #tpu.dot_dimension_numbers<[1], [0], [0], [1], [0, 0, 1, 1], [], []>} : vector<8x32xf32>, vector<32x128xf32>, vector<8x128xf32> -> vector<8x128xf32>
    %114 = arith.addf %112, %113 : vector<8x128xf32>
    %115 = vector.extract_strided_slice %114 {offsets = [0, 0], sizes = [8, 96], strides = [1, 1]} : vector<8x128xf32> to vector<8x96xf32>
    %116 = arith.negf %115 : vector<8x96xf32>
    %117 = math.exp %116 : vector<8x96xf32>
    %cst_49 = arith.constant 1.000000e+00 : f32
    %118 = vector.broadcast %cst_49 : f32 to vector<8x96xf32>
    %119 = arith.addf %118, %117 : vector<8x96xf32>
    %120 = arith.divf %118, %119 : vector<8x96xf32>
    %121 = vector.extract_strided_slice %114 {offsets = [0, 96], sizes = [8, 32], strides = [1, 1]} : vector<8x128xf32> to vector<8x32xf32>
    %122 = math.tanh %121 : vector<8x32xf32>
    %123 = vector.extract_strided_slice %120 {offsets = [0, 0], sizes = [8, 32], strides = [1, 1]} : vector<8x96xf32> to vector<8x32xf32>
    %124 = vector.extract_strided_slice %120 {offsets = [0, 32], sizes = [8, 32], strides = [1, 1]} : vector<8x96xf32> to vector<8x32xf32>
    %125 = vector.extract_strided_slice %120 {offsets = [0, 64], sizes = [8, 32], strides = [1, 1]} : vector<8x96xf32> to vector<8x32xf32>
    %126 = arith.mulf %124, %87 : vector<8x32xf32>
    %127 = arith.mulf %123, %122 : vector<8x32xf32>
    %128 = arith.addf %126, %127 : vector<8x32xf32>
    %129 = math.tanh %128 : vector<8x32xf32>
    %130 = arith.mulf %125, %129 : vector<8x32xf32>
    %cst_50 = arith.constant dense<0.000000e+00> : vector<8x128xf32>
    %131 = tpu.matmul %130, %14, %cst_50 {dimension_numbers = #tpu.dot_dimension_numbers<[1], [0], [0], [1], [0, 0, 1, 1], [], []>} : vector<8x32xf32>, vector<32x128xf32>, vector<8x128xf32> -> vector<8x128xf32>
    %cst_51 = arith.constant dense<0.000000e+00> : vector<8x128xf32>
    %132 = tpu.matmul %109, %16, %cst_51 {dimension_numbers = #tpu.dot_dimension_numbers<[1], [0], [0], [1], [0, 0, 1, 1], [], []>} : vector<8x32xf32>, vector<32x128xf32>, vector<8x128xf32> -> vector<8x128xf32>
    %133 = arith.addf %131, %132 : vector<8x128xf32>
    %134 = arith.addf %133, %19 : vector<8x128xf32>
    %135 = vector.extract_strided_slice %134 {offsets = [0, 0], sizes = [8, 96], strides = [1, 1]} : vector<8x128xf32> to vector<8x96xf32>
    %136 = arith.negf %135 : vector<8x96xf32>
    %137 = math.exp %136 : vector<8x96xf32>
    %cst_52 = arith.constant 1.000000e+00 : f32
    %138 = vector.broadcast %cst_52 : f32 to vector<8x96xf32>
    %139 = arith.addf %138, %137 : vector<8x96xf32>
    %140 = arith.divf %138, %139 : vector<8x96xf32>
    %141 = vector.extract_strided_slice %134 {offsets = [0, 96], sizes = [8, 32], strides = [1, 1]} : vector<8x128xf32> to vector<8x32xf32>
    %142 = math.tanh %141 : vector<8x32xf32>
    %143 = vector.extract_strided_slice %140 {offsets = [0, 0], sizes = [8, 32], strides = [1, 1]} : vector<8x96xf32> to vector<8x32xf32>
    %144 = vector.extract_strided_slice %140 {offsets = [0, 32], sizes = [8, 32], strides = [1, 1]} : vector<8x96xf32> to vector<8x32xf32>
    %145 = vector.extract_strided_slice %140 {offsets = [0, 64], sizes = [8, 32], strides = [1, 1]} : vector<8x96xf32> to vector<8x32xf32>
    %146 = arith.mulf %144, %107 : vector<8x32xf32>
    %147 = arith.mulf %143, %142 : vector<8x32xf32>
    %148 = arith.addf %146, %147 : vector<8x32xf32>
    %149 = math.tanh %148 : vector<8x32xf32>
    %150 = arith.mulf %145, %149 : vector<8x32xf32>
    %c3_i32 = arith.constant 3 : i32
    %151 = arith.index_cast %c3_i32 : i32 to index
    %c0_53 = arith.constant 0 : index
    %c0_54 = arith.constant 0 : index
    %152 = vector.load %arg10[%151, %c0_53, %c0_54] : memref<8x8x128xf32, #tpu.memory_space<vmem>>, vector<1x8x128xf32>
    %153 = vector.shape_cast %152 : vector<1x8x128xf32> to vector<8x128xf32>
    %cst_55 = arith.constant dense<0.000000e+00> : vector<8x128xf32>
    %154 = tpu.matmul %130, %12, %cst_55 {dimension_numbers = #tpu.dot_dimension_numbers<[1], [0], [0], [1], [0, 0, 1, 1], [], []>} : vector<8x32xf32>, vector<32x128xf32>, vector<8x128xf32> -> vector<8x128xf32>
    %155 = arith.addf %153, %154 : vector<8x128xf32>
    %156 = vector.extract_strided_slice %155 {offsets = [0, 0], sizes = [8, 96], strides = [1, 1]} : vector<8x128xf32> to vector<8x96xf32>
    %157 = arith.negf %156 : vector<8x96xf32>
    %158 = math.exp %157 : vector<8x96xf32>
    %cst_56 = arith.constant 1.000000e+00 : f32
    %159 = vector.broadcast %cst_56 : f32 to vector<8x96xf32>
    %160 = arith.addf %159, %158 : vector<8x96xf32>
    %161 = arith.divf %159, %160 : vector<8x96xf32>
    %162 = vector.extract_strided_slice %155 {offsets = [0, 96], sizes = [8, 32], strides = [1, 1]} : vector<8x128xf32> to vector<8x32xf32>
    %163 = math.tanh %162 : vector<8x32xf32>
    %164 = vector.extract_strided_slice %161 {offsets = [0, 0], sizes = [8, 32], strides = [1, 1]} : vector<8x96xf32> to vector<8x32xf32>
    %165 = vector.extract_strided_slice %161 {offsets = [0, 32], sizes = [8, 32], strides = [1, 1]} : vector<8x96xf32> to vector<8x32xf32>
    %166 = vector.extract_strided_slice %161 {offsets = [0, 64], sizes = [8, 32], strides = [1, 1]} : vector<8x96xf32> to vector<8x32xf32>
    %167 = arith.mulf %165, %128 : vector<8x32xf32>
    %168 = arith.mulf %164, %163 : vector<8x32xf32>
    %169 = arith.addf %167, %168 : vector<8x32xf32>
    %170 = math.tanh %169 : vector<8x32xf32>
    %171 = arith.mulf %166, %170 : vector<8x32xf32>
    %cst_57 = arith.constant dense<0.000000e+00> : vector<8x128xf32>
    %172 = tpu.matmul %171, %14, %cst_57 {dimension_numbers = #tpu.dot_dimension_numbers<[1], [0], [0], [1], [0, 0, 1, 1], [], []>} : vector<8x32xf32>, vector<32x128xf32>, vector<8x128xf32> -> vector<8x128xf32>
    %cst_58 = arith.constant dense<0.000000e+00> : vector<8x128xf32>
    %173 = tpu.matmul %150, %16, %cst_58 {dimension_numbers = #tpu.dot_dimension_numbers<[1], [0], [0], [1], [0, 0, 1, 1], [], []>} : vector<8x32xf32>, vector<32x128xf32>, vector<8x128xf32> -> vector<8x128xf32>
    %174 = arith.addf %172, %173 : vector<8x128xf32>
    %175 = arith.addf %174, %19 : vector<8x128xf32>
    %176 = vector.extract_strided_slice %175 {offsets = [0, 0], sizes = [8, 96], strides = [1, 1]} : vector<8x128xf32> to vector<8x96xf32>
    %177 = arith.negf %176 : vector<8x96xf32>
    %178 = math.exp %177 : vector<8x96xf32>
    %cst_59 = arith.constant 1.000000e+00 : f32
    %179 = vector.broadcast %cst_59 : f32 to vector<8x96xf32>
    %180 = arith.addf %179, %178 : vector<8x96xf32>
    %181 = arith.divf %179, %180 : vector<8x96xf32>
    %182 = vector.extract_strided_slice %175 {offsets = [0, 96], sizes = [8, 32], strides = [1, 1]} : vector<8x128xf32> to vector<8x32xf32>
    %183 = math.tanh %182 : vector<8x32xf32>
    %184 = vector.extract_strided_slice %181 {offsets = [0, 0], sizes = [8, 32], strides = [1, 1]} : vector<8x96xf32> to vector<8x32xf32>
    %185 = vector.extract_strided_slice %181 {offsets = [0, 32], sizes = [8, 32], strides = [1, 1]} : vector<8x96xf32> to vector<8x32xf32>
    %186 = vector.extract_strided_slice %181 {offsets = [0, 64], sizes = [8, 32], strides = [1, 1]} : vector<8x96xf32> to vector<8x32xf32>
    %187 = arith.mulf %185, %148 : vector<8x32xf32>
    %188 = arith.mulf %184, %183 : vector<8x32xf32>
    %189 = arith.addf %187, %188 : vector<8x32xf32>
    %190 = math.tanh %189 : vector<8x32xf32>
    %191 = arith.mulf %186, %190 : vector<8x32xf32>
    %c4_i32 = arith.constant 4 : i32
    %192 = arith.index_cast %c4_i32 : i32 to index
    %c0_60 = arith.constant 0 : index
    %c0_61 = arith.constant 0 : index
    %193 = vector.load %arg10[%192, %c0_60, %c0_61] : memref<8x8x128xf32, #tpu.memory_space<vmem>>, vector<1x8x128xf32>
    %194 = vector.shape_cast %193 : vector<1x8x128xf32> to vector<8x128xf32>
    %cst_62 = arith.constant dense<0.000000e+00> : vector<8x128xf32>
    %195 = tpu.matmul %171, %12, %cst_62 {dimension_numbers = #tpu.dot_dimension_numbers<[1], [0], [0], [1], [0, 0, 1, 1], [], []>} : vector<8x32xf32>, vector<32x128xf32>, vector<8x128xf32> -> vector<8x128xf32>
    %196 = arith.addf %194, %195 : vector<8x128xf32>
    %197 = vector.extract_strided_slice %196 {offsets = [0, 0], sizes = [8, 96], strides = [1, 1]} : vector<8x128xf32> to vector<8x96xf32>
    %198 = arith.negf %197 : vector<8x96xf32>
    %199 = math.exp %198 : vector<8x96xf32>
    %cst_63 = arith.constant 1.000000e+00 : f32
    %200 = vector.broadcast %cst_63 : f32 to vector<8x96xf32>
    %201 = arith.addf %200, %199 : vector<8x96xf32>
    %202 = arith.divf %200, %201 : vector<8x96xf32>
    %203 = vector.extract_strided_slice %196 {offsets = [0, 96], sizes = [8, 32], strides = [1, 1]} : vector<8x128xf32> to vector<8x32xf32>
    %204 = math.tanh %203 : vector<8x32xf32>
    %205 = vector.extract_strided_slice %202 {offsets = [0, 0], sizes = [8, 32], strides = [1, 1]} : vector<8x96xf32> to vector<8x32xf32>
    %206 = vector.extract_strided_slice %202 {offsets = [0, 32], sizes = [8, 32], strides = [1, 1]} : vector<8x96xf32> to vector<8x32xf32>
    %207 = vector.extract_strided_slice %202 {offsets = [0, 64], sizes = [8, 32], strides = [1, 1]} : vector<8x96xf32> to vector<8x32xf32>
    %208 = arith.mulf %206, %169 : vector<8x32xf32>
    %209 = arith.mulf %205, %204 : vector<8x32xf32>
    %210 = arith.addf %208, %209 : vector<8x32xf32>
    %211 = math.tanh %210 : vector<8x32xf32>
    %212 = arith.mulf %207, %211 : vector<8x32xf32>
    %cst_64 = arith.constant dense<0.000000e+00> : vector<8x128xf32>
    %213 = tpu.matmul %212, %14, %cst_64 {dimension_numbers = #tpu.dot_dimension_numbers<[1], [0], [0], [1], [0, 0, 1, 1], [], []>} : vector<8x32xf32>, vector<32x128xf32>, vector<8x128xf32> -> vector<8x128xf32>
    %cst_65 = arith.constant dense<0.000000e+00> : vector<8x128xf32>
    %214 = tpu.matmul %191, %16, %cst_65 {dimension_numbers = #tpu.dot_dimension_numbers<[1], [0], [0], [1], [0, 0, 1, 1], [], []>} : vector<8x32xf32>, vector<32x128xf32>, vector<8x128xf32> -> vector<8x128xf32>
    %215 = arith.addf %213, %214 : vector<8x128xf32>
    %216 = arith.addf %215, %19 : vector<8x128xf32>
    %217 = vector.extract_strided_slice %216 {offsets = [0, 0], sizes = [8, 96], strides = [1, 1]} : vector<8x128xf32> to vector<8x96xf32>
    %218 = arith.negf %217 : vector<8x96xf32>
    %219 = math.exp %218 : vector<8x96xf32>
    %cst_66 = arith.constant 1.000000e+00 : f32
    %220 = vector.broadcast %cst_66 : f32 to vector<8x96xf32>
    %221 = arith.addf %220, %219 : vector<8x96xf32>
    %222 = arith.divf %220, %221 : vector<8x96xf32>
    %223 = vector.extract_strided_slice %216 {offsets = [0, 96], sizes = [8, 32], strides = [1, 1]} : vector<8x128xf32> to vector<8x32xf32>
    %224 = math.tanh %223 : vector<8x32xf32>
    %225 = vector.extract_strided_slice %222 {offsets = [0, 0], sizes = [8, 32], strides = [1, 1]} : vector<8x96xf32> to vector<8x32xf32>
    %226 = vector.extract_strided_slice %222 {offsets = [0, 32], sizes = [8, 32], strides = [1, 1]} : vector<8x96xf32> to vector<8x32xf32>
    %227 = vector.extract_strided_slice %222 {offsets = [0, 64], sizes = [8, 32], strides = [1, 1]} : vector<8x96xf32> to vector<8x32xf32>
    %228 = arith.mulf %226, %189 : vector<8x32xf32>
    %229 = arith.mulf %225, %224 : vector<8x32xf32>
    %230 = arith.addf %228, %229 : vector<8x32xf32>
    %231 = math.tanh %230 : vector<8x32xf32>
    %232 = arith.mulf %227, %231 : vector<8x32xf32>
    %c5_i32 = arith.constant 5 : i32
    %233 = arith.index_cast %c5_i32 : i32 to index
    %c0_67 = arith.constant 0 : index
    %c0_68 = arith.constant 0 : index
    %234 = vector.load %arg10[%233, %c0_67, %c0_68] : memref<8x8x128xf32, #tpu.memory_space<vmem>>, vector<1x8x128xf32>
    %235 = vector.shape_cast %234 : vector<1x8x128xf32> to vector<8x128xf32>
    %cst_69 = arith.constant dense<0.000000e+00> : vector<8x128xf32>
    %236 = tpu.matmul %212, %12, %cst_69 {dimension_numbers = #tpu.dot_dimension_numbers<[1], [0], [0], [1], [0, 0, 1, 1], [], []>} : vector<8x32xf32>, vector<32x128xf32>, vector<8x128xf32> -> vector<8x128xf32>
    %237 = arith.addf %235, %236 : vector<8x128xf32>
    %238 = vector.extract_strided_slice %237 {offsets = [0, 0], sizes = [8, 96], strides = [1, 1]} : vector<8x128xf32> to vector<8x96xf32>
    %239 = arith.negf %238 : vector<8x96xf32>
    %240 = math.exp %239 : vector<8x96xf32>
    %cst_70 = arith.constant 1.000000e+00 : f32
    %241 = vector.broadcast %cst_70 : f32 to vector<8x96xf32>
    %242 = arith.addf %241, %240 : vector<8x96xf32>
    %243 = arith.divf %241, %242 : vector<8x96xf32>
    %244 = vector.extract_strided_slice %237 {offsets = [0, 96], sizes = [8, 32], strides = [1, 1]} : vector<8x128xf32> to vector<8x32xf32>
    %245 = math.tanh %244 : vector<8x32xf32>
    %246 = vector.extract_strided_slice %243 {offsets = [0, 0], sizes = [8, 32], strides = [1, 1]} : vector<8x96xf32> to vector<8x32xf32>
    %247 = vector.extract_strided_slice %243 {offsets = [0, 32], sizes = [8, 32], strides = [1, 1]} : vector<8x96xf32> to vector<8x32xf32>
    %248 = vector.extract_strided_slice %243 {offsets = [0, 64], sizes = [8, 32], strides = [1, 1]} : vector<8x96xf32> to vector<8x32xf32>
    %249 = arith.mulf %247, %210 : vector<8x32xf32>
    %250 = arith.mulf %246, %245 : vector<8x32xf32>
    %251 = arith.addf %249, %250 : vector<8x32xf32>
    %252 = math.tanh %251 : vector<8x32xf32>
    %253 = arith.mulf %248, %252 : vector<8x32xf32>
    %cst_71 = arith.constant dense<0.000000e+00> : vector<8x128xf32>
    %254 = tpu.matmul %253, %14, %cst_71 {dimension_numbers = #tpu.dot_dimension_numbers<[1], [0], [0], [1], [0, 0, 1, 1], [], []>} : vector<8x32xf32>, vector<32x128xf32>, vector<8x128xf32> -> vector<8x128xf32>
    %cst_72 = arith.constant dense<0.000000e+00> : vector<8x128xf32>
    %255 = tpu.matmul %232, %16, %cst_72 {dimension_numbers = #tpu.dot_dimension_numbers<[1], [0], [0], [1], [0, 0, 1, 1], [], []>} : vector<8x32xf32>, vector<32x128xf32>, vector<8x128xf32> -> vector<8x128xf32>
    %256 = arith.addf %254, %255 : vector<8x128xf32>
    %257 = arith.addf %256, %19 : vector<8x128xf32>
    %258 = vector.extract_strided_slice %257 {offsets = [0, 0], sizes = [8, 96], strides = [1, 1]} : vector<8x128xf32> to vector<8x96xf32>
    %259 = arith.negf %258 : vector<8x96xf32>
    %260 = math.exp %259 : vector<8x96xf32>
    %cst_73 = arith.constant 1.000000e+00 : f32
    %261 = vector.broadcast %cst_73 : f32 to vector<8x96xf32>
    %262 = arith.addf %261, %260 : vector<8x96xf32>
    %263 = arith.divf %261, %262 : vector<8x96xf32>
    %264 = vector.extract_strided_slice %257 {offsets = [0, 96], sizes = [8, 32], strides = [1, 1]} : vector<8x128xf32> to vector<8x32xf32>
    %265 = math.tanh %264 : vector<8x32xf32>
    %266 = vector.extract_strided_slice %263 {offsets = [0, 0], sizes = [8, 32], strides = [1, 1]} : vector<8x96xf32> to vector<8x32xf32>
    %267 = vector.extract_strided_slice %263 {offsets = [0, 32], sizes = [8, 32], strides = [1, 1]} : vector<8x96xf32> to vector<8x32xf32>
    %268 = vector.extract_strided_slice %263 {offsets = [0, 64], sizes = [8, 32], strides = [1, 1]} : vector<8x96xf32> to vector<8x32xf32>
    %269 = arith.mulf %267, %230 : vector<8x32xf32>
    %270 = arith.mulf %266, %265 : vector<8x32xf32>
    %271 = arith.addf %269, %270 : vector<8x32xf32>
    %272 = math.tanh %271 : vector<8x32xf32>
    %273 = arith.mulf %268, %272 : vector<8x32xf32>
    %c6_i32 = arith.constant 6 : i32
    %274 = arith.index_cast %c6_i32 : i32 to index
    %c0_74 = arith.constant 0 : index
    %c0_75 = arith.constant 0 : index
    %275 = vector.load %arg10[%274, %c0_74, %c0_75] : memref<8x8x128xf32, #tpu.memory_space<vmem>>, vector<1x8x128xf32>
    %276 = vector.shape_cast %275 : vector<1x8x128xf32> to vector<8x128xf32>
    %cst_76 = arith.constant dense<0.000000e+00> : vector<8x128xf32>
    %277 = tpu.matmul %253, %12, %cst_76 {dimension_numbers = #tpu.dot_dimension_numbers<[1], [0], [0], [1], [0, 0, 1, 1], [], []>} : vector<8x32xf32>, vector<32x128xf32>, vector<8x128xf32> -> vector<8x128xf32>
    %278 = arith.addf %276, %277 : vector<8x128xf32>
    %279 = vector.extract_strided_slice %278 {offsets = [0, 0], sizes = [8, 96], strides = [1, 1]} : vector<8x128xf32> to vector<8x96xf32>
    %280 = arith.negf %279 : vector<8x96xf32>
    %281 = math.exp %280 : vector<8x96xf32>
    %cst_77 = arith.constant 1.000000e+00 : f32
    %282 = vector.broadcast %cst_77 : f32 to vector<8x96xf32>
    %283 = arith.addf %282, %281 : vector<8x96xf32>
    %284 = arith.divf %282, %283 : vector<8x96xf32>
    %285 = vector.extract_strided_slice %278 {offsets = [0, 96], sizes = [8, 32], strides = [1, 1]} : vector<8x128xf32> to vector<8x32xf32>
    %286 = math.tanh %285 : vector<8x32xf32>
    %287 = vector.extract_strided_slice %284 {offsets = [0, 0], sizes = [8, 32], strides = [1, 1]} : vector<8x96xf32> to vector<8x32xf32>
    %288 = vector.extract_strided_slice %284 {offsets = [0, 32], sizes = [8, 32], strides = [1, 1]} : vector<8x96xf32> to vector<8x32xf32>
    %289 = vector.extract_strided_slice %284 {offsets = [0, 64], sizes = [8, 32], strides = [1, 1]} : vector<8x96xf32> to vector<8x32xf32>
    %290 = arith.mulf %288, %251 : vector<8x32xf32>
    %291 = arith.mulf %287, %286 : vector<8x32xf32>
    %292 = arith.addf %290, %291 : vector<8x32xf32>
    %293 = math.tanh %292 : vector<8x32xf32>
    %294 = arith.mulf %289, %293 : vector<8x32xf32>
    %cst_78 = arith.constant dense<0.000000e+00> : vector<8x128xf32>
    %295 = tpu.matmul %294, %14, %cst_78 {dimension_numbers = #tpu.dot_dimension_numbers<[1], [0], [0], [1], [0, 0, 1, 1], [], []>} : vector<8x32xf32>, vector<32x128xf32>, vector<8x128xf32> -> vector<8x128xf32>
    %cst_79 = arith.constant dense<0.000000e+00> : vector<8x128xf32>
    %296 = tpu.matmul %273, %16, %cst_79 {dimension_numbers = #tpu.dot_dimension_numbers<[1], [0], [0], [1], [0, 0, 1, 1], [], []>} : vector<8x32xf32>, vector<32x128xf32>, vector<8x128xf32> -> vector<8x128xf32>
    %297 = arith.addf %295, %296 : vector<8x128xf32>
    %298 = arith.addf %297, %19 : vector<8x128xf32>
    %299 = vector.extract_strided_slice %298 {offsets = [0, 0], sizes = [8, 96], strides = [1, 1]} : vector<8x128xf32> to vector<8x96xf32>
    %300 = arith.negf %299 : vector<8x96xf32>
    %301 = math.exp %300 : vector<8x96xf32>
    %cst_80 = arith.constant 1.000000e+00 : f32
    %302 = vector.broadcast %cst_80 : f32 to vector<8x96xf32>
    %303 = arith.addf %302, %301 : vector<8x96xf32>
    %304 = arith.divf %302, %303 : vector<8x96xf32>
    %305 = vector.extract_strided_slice %298 {offsets = [0, 96], sizes = [8, 32], strides = [1, 1]} : vector<8x128xf32> to vector<8x32xf32>
    %306 = math.tanh %305 : vector<8x32xf32>
    %307 = vector.extract_strided_slice %304 {offsets = [0, 0], sizes = [8, 32], strides = [1, 1]} : vector<8x96xf32> to vector<8x32xf32>
    %308 = vector.extract_strided_slice %304 {offsets = [0, 32], sizes = [8, 32], strides = [1, 1]} : vector<8x96xf32> to vector<8x32xf32>
    %309 = vector.extract_strided_slice %304 {offsets = [0, 64], sizes = [8, 32], strides = [1, 1]} : vector<8x96xf32> to vector<8x32xf32>
    %310 = arith.mulf %308, %271 : vector<8x32xf32>
    %311 = arith.mulf %307, %306 : vector<8x32xf32>
    %312 = arith.addf %310, %311 : vector<8x32xf32>
    %313 = math.tanh %312 : vector<8x32xf32>
    %314 = arith.mulf %309, %313 : vector<8x32xf32>
    %c7_i32 = arith.constant 7 : i32
    %315 = arith.index_cast %c7_i32 : i32 to index
    %c0_81 = arith.constant 0 : index
    %c0_82 = arith.constant 0 : index
    %316 = vector.load %arg10[%315, %c0_81, %c0_82] : memref<8x8x128xf32, #tpu.memory_space<vmem>>, vector<1x8x128xf32>
    %317 = vector.shape_cast %316 : vector<1x8x128xf32> to vector<8x128xf32>
    %cst_83 = arith.constant dense<0.000000e+00> : vector<8x128xf32>
    %318 = tpu.matmul %294, %12, %cst_83 {dimension_numbers = #tpu.dot_dimension_numbers<[1], [0], [0], [1], [0, 0, 1, 1], [], []>} : vector<8x32xf32>, vector<32x128xf32>, vector<8x128xf32> -> vector<8x128xf32>
    %319 = arith.addf %317, %318 : vector<8x128xf32>
    %320 = vector.extract_strided_slice %319 {offsets = [0, 0], sizes = [8, 96], strides = [1, 1]} : vector<8x128xf32> to vector<8x96xf32>
    %321 = arith.negf %320 : vector<8x96xf32>
    %322 = math.exp %321 : vector<8x96xf32>
    %cst_84 = arith.constant 1.000000e+00 : f32
    %323 = vector.broadcast %cst_84 : f32 to vector<8x96xf32>
    %324 = arith.addf %323, %322 : vector<8x96xf32>
    %325 = arith.divf %323, %324 : vector<8x96xf32>
    %326 = vector.extract_strided_slice %319 {offsets = [0, 96], sizes = [8, 32], strides = [1, 1]} : vector<8x128xf32> to vector<8x32xf32>
    %327 = math.tanh %326 : vector<8x32xf32>
    %328 = vector.extract_strided_slice %325 {offsets = [0, 0], sizes = [8, 32], strides = [1, 1]} : vector<8x96xf32> to vector<8x32xf32>
    %329 = vector.extract_strided_slice %325 {offsets = [0, 32], sizes = [8, 32], strides = [1, 1]} : vector<8x96xf32> to vector<8x32xf32>
    %330 = vector.extract_strided_slice %325 {offsets = [0, 64], sizes = [8, 32], strides = [1, 1]} : vector<8x96xf32> to vector<8x32xf32>
    %331 = arith.mulf %329, %292 : vector<8x32xf32>
    %332 = arith.mulf %328, %327 : vector<8x32xf32>
    %333 = arith.addf %331, %332 : vector<8x32xf32>
    %334 = math.tanh %333 : vector<8x32xf32>
    %335 = arith.mulf %330, %334 : vector<8x32xf32>
    %cst_85 = arith.constant dense<0.000000e+00> : vector<8x128xf32>
    %336 = tpu.matmul %335, %14, %cst_85 {dimension_numbers = #tpu.dot_dimension_numbers<[1], [0], [0], [1], [0, 0, 1, 1], [], []>} : vector<8x32xf32>, vector<32x128xf32>, vector<8x128xf32> -> vector<8x128xf32>
    %cst_86 = arith.constant dense<0.000000e+00> : vector<8x128xf32>
    %337 = tpu.matmul %314, %16, %cst_86 {dimension_numbers = #tpu.dot_dimension_numbers<[1], [0], [0], [1], [0, 0, 1, 1], [], []>} : vector<8x32xf32>, vector<32x128xf32>, vector<8x128xf32> -> vector<8x128xf32>
    %338 = arith.addf %336, %337 : vector<8x128xf32>
    %339 = arith.addf %338, %19 : vector<8x128xf32>
    %340 = vector.extract_strided_slice %339 {offsets = [0, 0], sizes = [8, 96], strides = [1, 1]} : vector<8x128xf32> to vector<8x96xf32>
    %341 = arith.negf %340 : vector<8x96xf32>
    %342 = math.exp %341 : vector<8x96xf32>
    %cst_87 = arith.constant 1.000000e+00 : f32
    %343 = vector.broadcast %cst_87 : f32 to vector<8x96xf32>
    %344 = arith.addf %343, %342 : vector<8x96xf32>
    %345 = arith.divf %343, %344 : vector<8x96xf32>
    %346 = vector.extract_strided_slice %339 {offsets = [0, 96], sizes = [8, 32], strides = [1, 1]} : vector<8x128xf32> to vector<8x32xf32>
    %347 = math.tanh %346 : vector<8x32xf32>
    %348 = vector.extract_strided_slice %345 {offsets = [0, 0], sizes = [8, 32], strides = [1, 1]} : vector<8x96xf32> to vector<8x32xf32>
    %349 = vector.extract_strided_slice %345 {offsets = [0, 32], sizes = [8, 32], strides = [1, 1]} : vector<8x96xf32> to vector<8x32xf32>
    %350 = vector.extract_strided_slice %345 {offsets = [0, 64], sizes = [8, 32], strides = [1, 1]} : vector<8x96xf32> to vector<8x32xf32>
    %351 = arith.mulf %349, %312 : vector<8x32xf32>
    %352 = arith.mulf %348, %347 : vector<8x32xf32>
    %353 = arith.addf %351, %352 : vector<8x32xf32>
    %354 = math.tanh %353 : vector<8x32xf32>
    %355 = arith.mulf %350, %354 : vector<8x32xf32>
    %c8_i32 = arith.constant 8 : i32
    %c0_88 = arith.constant 0 : index
    %c0_89 = arith.constant 0 : index
    %c0_90 = arith.constant 0 : index
    %356 = vector.load %arg8[%c0_88, %c0_89, %c0_90] : memref<2x8x32xf32, #tpu.memory_space<vmem>>, vector<1x8x32xf32>
    %357 = vector.shape_cast %356 : vector<1x8x32xf32> to vector<8x32xf32>
    %358 = vector.shape_cast %335 : vector<8x32xf32> to vector<1x8x32xf32>
    tpu.vector_store %arg8[%c0_88, %c0_89, %c0_90], %358 {strides = array<i32>} : memref<2x8x32xf32, #tpu.memory_space<vmem>>, vector<1x8x32xf32>,
    %c0_91 = arith.constant 0 : index
    %c0_92 = arith.constant 0 : index
    %c0_93 = arith.constant 0 : index
    %359 = vector.load %arg9[%c0_91, %c0_92, %c0_93] : memref<2x8x32xf32, #tpu.memory_space<vmem>>, vector<1x8x32xf32>
    %360 = vector.shape_cast %359 : vector<1x8x32xf32> to vector<8x32xf32>
    %361 = vector.shape_cast %333 : vector<8x32xf32> to vector<1x8x32xf32>
    tpu.vector_store %arg9[%c0_91, %c0_92, %c0_93], %361 {strides = array<i32>} : memref<2x8x32xf32, #tpu.memory_space<vmem>>, vector<1x8x32xf32>,
    %c1_94 = arith.constant 1 : index
    %c0_95 = arith.constant 0 : index
    %c0_96 = arith.constant 0 : index
    %362 = vector.load %arg8[%c1_94, %c0_95, %c0_96] : memref<2x8x32xf32, #tpu.memory_space<vmem>>, vector<1x8x32xf32>
    %363 = vector.shape_cast %362 : vector<1x8x32xf32> to vector<8x32xf32>
    %364 = vector.shape_cast %355 : vector<8x32xf32> to vector<1x8x32xf32>
    tpu.vector_store %arg8[%c1_94, %c0_95, %c0_96], %364 {strides = array<i32>} : memref<2x8x32xf32, #tpu.memory_space<vmem>>, vector<1x8x32xf32>,
    %c1_97 = arith.constant 1 : index
    %c0_98 = arith.constant 0 : index
    %c0_99 = arith.constant 0 : index
    %365 = vector.load %arg9[%c1_97, %c0_98, %c0_99] : memref<2x8x32xf32, #tpu.memory_space<vmem>>, vector<1x8x32xf32>
    %366 = vector.shape_cast %365 : vector<1x8x32xf32> to vector<8x32xf32>
    %367 = vector.shape_cast %353 : vector<8x32xf32> to vector<1x8x32xf32>
    tpu.vector_store %arg9[%c1_97, %c0_98, %c0_99], %367 {strides = array<i32>} : memref<2x8x32xf32, #tpu.memory_space<vmem>>, vector<1x8x32xf32>,
    return
  }
  func.func @transform_0(%arg0: i32, %arg1: i32) -> (i32, i32, i32) {
    %c0_i32 = arith.constant 0 : i32
    %c0_i32_0 = arith.constant 0 : i32
    return %arg1, %arg0, %c0_i32 : i32, i32, i32
  }
  func.func @transform_1(%arg0: i32, %arg1: i32) -> (i32, i32) {
    %c0_i32 = arith.constant 0 : i32
    %c0_i32_0 = arith.constant 0 : i32
    %c0_i32_1 = arith.constant 0 : i32
    return %c0_i32, %c0_i32_0 : i32, i32
  }
  func.func @transform_2(%arg0: i32, %arg1: i32) -> (i32, i32) {
    %c0_i32 = arith.constant 0 : i32
    %c0_i32_0 = arith.constant 0 : i32
    %c0_i32_1 = arith.constant 0 : i32
    return %c0_i32, %c0_i32_0 : i32, i32
  }
  func.func @transform_3(%arg0: i32, %arg1: i32) -> (i32, i32, i32) {
    %c0_i32 = arith.constant 0 : i32
    %c0_i32_0 = arith.constant 0 : i32
    %c0_i32_1 = arith.constant 0 : i32
    %c0_i32_2 = arith.constant 0 : i32
    return %c0_i32, %c0_i32_0, %c0_i32_1 : i32, i32, i32
  }
  func.func @transform_4(%arg0: i32, %arg1: i32) -> (i32, i32, i32) {
    %c0_i32 = arith.constant 0 : i32
    %c0_i32_0 = arith.constant 0 : i32
    %c0_i32_1 = arith.constant 0 : i32
    %c0_i32_2 = arith.constant 0 : i32
    return %c0_i32, %c0_i32_0, %c0_i32_1 : i32, i32, i32
  }
  func.func @transform_5(%arg0: i32, %arg1: i32) -> (i32, i32) {
    %c0_i32 = arith.constant 0 : i32
    %c0_i32_0 = arith.constant 0 : i32
    %c0_i32_1 = arith.constant 0 : i32
    return %c0_i32, %c0_i32_0 : i32, i32
  }
  func.func @transform_6(%arg0: i32, %arg1: i32) -> (i32, i32, i32) {
    %c0_i32 = arith.constant 0 : i32
    %c0_i32_0 = arith.constant 0 : i32
    %c0_i32_1 = arith.constant 0 : i32
    return %c0_i32, %arg0, %c0_i32_0 : i32, i32, i32
  }
  func.func @transform_7(%arg0: i32, %arg1: i32) -> (i32, i32, i32) {
    %c0_i32 = arith.constant 0 : i32
    %c0_i32_0 = arith.constant 0 : i32
    %c0_i32_1 = arith.constant 0 : i32
    return %c0_i32, %arg0, %c0_i32_0 : i32, i32, i32
  }
}

module attributes {stable_mosaic.version = 11 : i64} {
  func.func @_lstm_serial_kernel(%arg0: i32, %arg1: i32, %arg2: memref<8x8x32xf32, #tpu.memory_space<vmem>>, %arg3: memref<32x128xf32, #tpu.memory_space<vmem>>, %arg4: memref<32x128xf32, #tpu.memory_space<vmem>>, %arg5: memref<1x32x128xf32, #tpu.memory_space<vmem>>, %arg6: memref<1x32x128xf32, #tpu.memory_space<vmem>>, %arg7: memref<2x128xf32, #tpu.memory_space<vmem>>, %arg8: memref<2x8x32xf32, #tpu.memory_space<vmem>>, %arg9: memref<2x8x32xf32, #tpu.memory_space<vmem>>, %arg10: memref<8x8x128xf32, #tpu.memory_space<vmem>>) attributes {dimension_semantics = [#tpu.dimension_semantics<parallel>, #tpu.dimension_semantics<arbitrary>], iteration_bounds = array<i64: 1, 1>, scalar_prefetch = 0 : i64, scratch_operands = 1 : i64, tpu.core_type = #tpu.core_type<tc>, window_params = [{transform_indices = @transform_0, window_bounds = array<i64: 8, 8, 32>}, {pipeline_mode = #tpu.pipeline_mode<synchronous>, transform_indices = @transform_1, window_bounds = array<i64: 32, 128>}, {pipeline_mode = #tpu.pipeline_mode<synchronous>, transform_indices = @transform_2, window_bounds = array<i64: 32, 128>}, {pipeline_mode = #tpu.pipeline_mode<synchronous>, transform_indices = @transform_3, window_bounds = array<i64: 1, 32, 128>}, {pipeline_mode = #tpu.pipeline_mode<synchronous>, transform_indices = @transform_4, window_bounds = array<i64: 1, 32, 128>}, {pipeline_mode = #tpu.pipeline_mode<synchronous>, transform_indices = @transform_5, window_bounds = array<i64: 2, 128>}, {transform_indices = @transform_6, window_bounds = array<i64: 2, 8, 32>}, {transform_indices = @transform_7, window_bounds = array<i64: 2, 8, 32>}]} {
    %c0_i32 = arith.constant 0 : i32
    %0 = arith.cmpi eq, %arg1, %c0_i32 : i32
    %1 = arith.extui %0 : i1 to i32
    %c0_i32_0 = arith.constant 0 : i32
    %2 = arith.cmpi ne, %1, %c0_i32_0 : i32
    scf.if %2 {
      %cst_100 = arith.constant 0.000000e+00 : f32
      %368 = vector.broadcast %cst_100 : f32 to vector<2x8x32xf32>
      %c0_101 = arith.constant 0 : index
      %c0_102 = arith.constant 0 : index
      %c0_103 = arith.constant 0 : index
      %369 = vector.load %arg8[%c0_101, %c0_102, %c0_103] : memref<2x8x32xf32, #tpu.memory_space<vmem>>, vector<2x8x32xf32>
      tpu.vector_store %arg8[%c0_101, %c0_102, %c0_103], %368 {strides = array<i32>} : memref<2x8x32xf32, #tpu.memory_space<vmem>>, vector<2x8x32xf32>,
      %cst_104 = arith.constant 0.000000e+00 : f32
      %370 = vector.broadcast %cst_104 : f32 to vector<2x8x32xf32>
      %c0_105 = arith.constant 0 : index
      %c0_106 = arith.constant 0 : index
      %c0_107 = arith.constant 0 : index
      %371 = vector.load %arg9[%c0_105, %c0_106, %c0_107] : memref<2x8x32xf32, #tpu.memory_space<vmem>>, vector<2x8x32xf32>
      tpu.vector_store %arg9[%c0_105, %c0_106, %c0_107], %370 {strides = array<i32>} : memref<2x8x32xf32, #tpu.memory_space<vmem>>, vector<2x8x32xf32>,
    } else {
    }
    %c0 = arith.constant 0 : index
    %c0_1 = arith.constant 0 : index
    %c0_2 = arith.constant 0 : index
    %3 = vector.load %arg2[%c0, %c0_1, %c0_2] : memref<8x8x32xf32, #tpu.memory_space<vmem>>, vector<8x8x32xf32>
    %4 = vector.shape_cast %3 : vector<8x8x32xf32> to vector<64x32xf32>
    %c0_3 = arith.constant 0 : index
    %c0_4 = arith.constant 0 : index
    %5 = vector.load %arg3[%c0_3, %c0_4] : memref<32x128xf32, #tpu.memory_space<vmem>>, vector<32x128xf32>
    %cst = arith.constant dense<0.000000e+00> : vector<64x128xf32>
    %6 = tpu.matmul %4, %5, %cst {dimension_numbers = #tpu.dot_dimension_numbers<[1], [0], [0], [1], [0, 0, 1, 1], [], []>} : vector<64x32xf32>, vector<32x128xf32>, vector<64x128xf32> -> vector<64x128xf32>
    %c0_5 = arith.constant 0 : index
    %c0_6 = arith.constant 0 : index
    %7 = vector.load %arg7[%c0_5, %c0_6] : memref<2x128xf32, #tpu.memory_space<vmem>>, vector<1x128xf32>
    %8 = vector.broadcast %7 : vector<1x128xf32> to vector<64x128xf32>
    %9 = arith.addf %6, %8 : vector<64x128xf32>
    %10 = vector.shape_cast %9 : vector<64x128xf32> to vector<8x8x128xf32>
    %c0_7 = arith.constant 0 : index
    %c0_8 = arith.constant 0 : index
    %c0_9 = arith.constant 0 : index
    %11 = vector.load %arg10[%c0_7, %c0_8, %c0_9] : memref<8x8x128xf32, #tpu.memory_space<vmem>>, vector<8x8x128xf32>
    tpu.vector_store %arg10[%c0_7, %c0_8, %c0_9], %10 {strides = array<i32>} : memref<8x8x128xf32, #tpu.memory_space<vmem>>, vector<8x8x128xf32>,
    %c0_10 = arith.constant 0 : index
    %c0_11 = arith.constant 0 : index
    %12 = vector.load %arg4[%c0_10, %c0_11] : memref<32x128xf32, #tpu.memory_space<vmem>>, vector<32x128xf32>
    %c0_12 = arith.constant 0 : index
    %c0_13 = arith.constant 0 : index
    %c0_14 = arith.constant 0 : index
    %13 = vector.load %arg5[%c0_12, %c0_13, %c0_14] : memref<1x32x128xf32, #tpu.memory_space<vmem>>, vector<1x32x128xf32>
    %14 = vector.shape_cast %13 : vector<1x32x128xf32> to vector<32x128xf32>
    %c0_15 = arith.constant 0 : index
    %c0_16 = arith.constant 0 : index
    %c0_17 = arith.constant 0 : index
    %15 = vector.load %arg6[%c0_15, %c0_16, %c0_17] : memref<1x32x128xf32, #tpu.memory_space<vmem>>, vector<1x32x128xf32>
    %16 = vector.shape_cast %15 : vector<1x32x128xf32> to vector<32x128xf32>
    %c1 = arith.constant 1 : index
    %c0_18 = arith.constant 0 : index
    %17 = vector.load %arg7[%c1, %c0_18] : memref<2x128xf32, #tpu.memory_space<vmem>>, vector<1x128xf32>
    %18 = vector.shape_cast %17 : vector<1x128xf32> to vector<1x128xf32>
    %19 = vector.broadcast %18 : vector<1x128xf32> to vector<8x128xf32>
    %c0_19 = arith.constant 0 : index
    %c0_20 = arith.constant 0 : index
    %c0_21 = arith.constant 0 : index
    %20 = vector.load %arg8[%c0_19, %c0_20, %c0_21] : memref<2x8x32xf32, #tpu.memory_space<vmem>>, vector<1x8x32xf32>
    %21 = vector.shape_cast %20 : vector<1x8x32xf32> to vector<8x32xf32>
    %c1_22 = arith.constant 1 : index
    %c0_23 = arith.constant 0 : index
    %c0_24 = arith.constant 0 : index
    %22 = vector.load %arg8[%c1_22, %c0_23, %c0_24] : memref<2x8x32xf32, #tpu.memory_space<vmem>>, vector<1x8x32xf32>
    %23 = vector.shape_cast %22 : vector<1x8x32xf32> to vector<8x32xf32>
    %c0_25 = arith.constant 0 : index
    %c0_26 = arith.constant 0 : index
    %c0_27 = arith.constant 0 : index
    %24 = vector.load %arg9[%c0_25, %c0_26, %c0_27] : memref<2x8x32xf32, #tpu.memory_space<vmem>>, vector<1x8x32xf32>
    %25 = vector.shape_cast %24 : vector<1x8x32xf32> to vector<8x32xf32>
    %c1_28 = arith.constant 1 : index
    %c0_29 = arith.constant 0 : index
    %c0_30 = arith.constant 0 : index
    %26 = vector.load %arg9[%c1_28, %c0_29, %c0_30] : memref<2x8x32xf32, #tpu.memory_space<vmem>>, vector<1x8x32xf32>
    %27 = vector.shape_cast %26 : vector<1x8x32xf32> to vector<8x32xf32>
    %c0_i32_31 = arith.constant 0 : i32
    %28 = arith.index_cast %c0_i32_31 : i32 to index
    %c0_32 = arith.constant 0 : index
    %c0_33 = arith.constant 0 : index
    %29 = vector.load %arg10[%28, %c0_32, %c0_33] : memref<8x8x128xf32, #tpu.memory_space<vmem>>, vector<1x8x128xf32>
    %30 = vector.shape_cast %29 : vector<1x8x128xf32> to vector<8x128xf32>
    %cst_34 = arith.constant dense<0.000000e+00> : vector<8x128xf32>
    %31 = tpu.matmul %21, %12, %cst_34 {dimension_numbers = #tpu.dot_dimension_numbers<[1], [0], [0], [1], [0, 0, 1, 1], [], []>} : vector<8x32xf32>, vector<32x128xf32>, vector<8x128xf32> -> vector<8x128xf32>
    %32 = arith.addf %30, %31 : vector<8x128xf32>
    %33 = vector.extract_strided_slice %32 {offsets = [0, 0], sizes = [8, 96], strides = [1, 1]} : vector<8x128xf32> to vector<8x96xf32>
    %34 = arith.negf %33 : vector<8x96xf32>
    %35 = math.exp %34 : vector<8x96xf32>
    %cst_35 = arith.constant 1.000000e+00 : f32
    %36 = vector.broadcast %cst_35 : f32 to vector<8x96xf32>
    %37 = arith.addf %36, %35 : vector<8x96xf32>
    %38 = arith.divf %36, %37 : vector<8x96xf32>
    %39 = vector.extract_strided_slice %32 {offsets = [0, 96], sizes = [8, 32], strides = [1, 1]} : vector<8x128xf32> to vector<8x32xf32>
    %40 = math.tanh %39 : vector<8x32xf32>
    %41 = vector.extract_strided_slice %38 {offsets = [0, 0], sizes = [8, 32], strides = [1, 1]} : vector<8x96xf32> to vector<8x32xf32>
    %42 = vector.extract_strided_slice %38 {offsets = [0, 32], sizes = [8, 32], strides = [1, 1]} : vector<8x96xf32> to vector<8x32xf32>
    %43 = vector.extract_strided_slice %38 {offsets = [0, 64], sizes = [8, 32], strides = [1, 1]} : vector<8x96xf32> to vector<8x32xf32>
    %44 = arith.mulf %42, %25 : vector<8x32xf32>
    %45 = arith.mulf %41, %40 : vector<8x32xf32>
    %46 = arith.addf %44, %45 : vector<8x32xf32>
    %47 = math.tanh %46 : vector<8x32xf32>
    %48 = arith.mulf %43, %47 : vector<8x32xf32>
    %cst_36 = arith.constant dense<0.000000e+00> : vector<8x128xf32>
    %49 = tpu.matmul %48, %14, %cst_36 {dimension_numbers = #tpu.dot_dimension_numbers<[1], [0], [0], [1], [0, 0, 1, 1], [], []>} : vector<8x32xf32>, vector<32x128xf32>, vector<8x128xf32> -> vector<8x128xf32>
    %cst_37 = arith.constant dense<0.000000e+00> : vector<8x128xf32>
    %50 = tpu.matmul %23, %16, %cst_37 {dimension_numbers = #tpu.dot_dimension_numbers<[1], [0], [0], [1], [0, 0, 1, 1], [], []>} : vector<8x32xf32>, vector<32x128xf32>, vector<8x128xf32> -> vector<8x128xf32>
    %51 = arith.addf %49, %50 : vector<8x128xf32>
    %52 = arith.addf %51, %19 : vector<8x128xf32>
    %53 = vector.extract_strided_slice %52 {offsets = [0, 0], sizes = [8, 96], strides = [1, 1]} : vector<8x128xf32> to vector<8x96xf32>
    %54 = arith.negf %53 : vector<8x96xf32>
    %55 = math.exp %54 : vector<8x96xf32>
    %cst_38 = arith.constant 1.000000e+00 : f32
    %56 = vector.broadcast %cst_38 : f32 to vector<8x96xf32>
    %57 = arith.addf %56, %55 : vector<8x96xf32>
    %58 = arith.divf %56, %57 : vector<8x96xf32>
    %59 = vector.extract_strided_slice %52 {offsets = [0, 96], sizes = [8, 32], strides = [1, 1]} : vector<8x128xf32> to vector<8x32xf32>
    %60 = math.tanh %59 : vector<8x32xf32>
    %61 = vector.extract_strided_slice %58 {offsets = [0, 0], sizes = [8, 32], strides = [1, 1]} : vector<8x96xf32> to vector<8x32xf32>
    %62 = vector.extract_strided_slice %58 {offsets = [0, 32], sizes = [8, 32], strides = [1, 1]} : vector<8x96xf32> to vector<8x32xf32>
    %63 = vector.extract_strided_slice %58 {offsets = [0, 64], sizes = [8, 32], strides = [1, 1]} : vector<8x96xf32> to vector<8x32xf32>
    %64 = arith.mulf %62, %27 : vector<8x32xf32>
    %65 = arith.mulf %61, %60 : vector<8x32xf32>
    %66 = arith.addf %64, %65 : vector<8x32xf32>
    %67 = math.tanh %66 : vector<8x32xf32>
    %68 = arith.mulf %63, %67 : vector<8x32xf32>
    %c1_i32 = arith.constant 1 : i32
    %69 = arith.index_cast %c1_i32 : i32 to index
    %c0_39 = arith.constant 0 : index
    %c0_40 = arith.constant 0 : index
    %70 = vector.load %arg10[%69, %c0_39, %c0_40] : memref<8x8x128xf32, #tpu.memory_space<vmem>>, vector<1x8x128xf32>
    %71 = vector.shape_cast %70 : vector<1x8x128xf32> to vector<8x128xf32>
    %cst_41 = arith.constant dense<0.000000e+00> : vector<8x128xf32>
    %72 = tpu.matmul %48, %12, %cst_41 {dimension_numbers = #tpu.dot_dimension_numbers<[1], [0], [0], [1], [0, 0, 1, 1], [], []>} : vector<8x32xf32>, vector<32x128xf32>, vector<8x128xf32> -> vector<8x128xf32>
    %73 = arith.addf %71, %72 : vector<8x128xf32>
    %74 = vector.extract_strided_slice %73 {offsets = [0, 0], sizes = [8, 96], strides = [1, 1]} : vector<8x128xf32> to vector<8x96xf32>
    %75 = arith.negf %74 : vector<8x96xf32>
    %76 = math.exp %75 : vector<8x96xf32>
    %cst_42 = arith.constant 1.000000e+00 : f32
    %77 = vector.broadcast %cst_42 : f32 to vector<8x96xf32>
    %78 = arith.addf %77, %76 : vector<8x96xf32>
    %79 = arith.divf %77, %78 : vector<8x96xf32>
    %80 = vector.extract_strided_slice %73 {offsets = [0, 96], sizes = [8, 32], strides = [1, 1]} : vector<8x128xf32> to vector<8x32xf32>
    %81 = math.tanh %80 : vector<8x32xf32>
    %82 = vector.extract_strided_slice %79 {offsets = [0, 0], sizes = [8, 32], strides = [1, 1]} : vector<8x96xf32> to vector<8x32xf32>
    %83 = vector.extract_strided_slice %79 {offsets = [0, 32], sizes = [8, 32], strides = [1, 1]} : vector<8x96xf32> to vector<8x32xf32>
    %84 = vector.extract_strided_slice %79 {offsets = [0, 64], sizes = [8, 32], strides = [1, 1]} : vector<8x96xf32> to vector<8x32xf32>
    %85 = arith.mulf %83, %46 : vector<8x32xf32>
    %86 = arith.mulf %82, %81 : vector<8x32xf32>
    %87 = arith.addf %85, %86 : vector<8x32xf32>
    %88 = math.tanh %87 : vector<8x32xf32>
    %89 = arith.mulf %84, %88 : vector<8x32xf32>
    %cst_43 = arith.constant dense<0.000000e+00> : vector<8x128xf32>
    %90 = tpu.matmul %89, %14, %cst_43 {dimension_numbers = #tpu.dot_dimension_numbers<[1], [0], [0], [1], [0, 0, 1, 1], [], []>} : vector<8x32xf32>, vector<32x128xf32>, vector<8x128xf32> -> vector<8x128xf32>
    %cst_44 = arith.constant dense<0.000000e+00> : vector<8x128xf32>
    %91 = tpu.matmul %68, %16, %cst_44 {dimension_numbers = #tpu.dot_dimension_numbers<[1], [0], [0], [1], [0, 0, 1, 1], [], []>} : vector<8x32xf32>, vector<32x128xf32>, vector<8x128xf32> -> vector<8x128xf32>
    %92 = arith.addf %90, %91 : vector<8x128xf32>
    %93 = arith.addf %92, %19 : vector<8x128xf32>
    %94 = vector.extract_strided_slice %93 {offsets = [0, 0], sizes = [8, 96], strides = [1, 1]} : vector<8x128xf32> to vector<8x96xf32>
    %95 = arith.negf %94 : vector<8x96xf32>
    %96 = math.exp %95 : vector<8x96xf32>
    %cst_45 = arith.constant 1.000000e+00 : f32
    %97 = vector.broadcast %cst_45 : f32 to vector<8x96xf32>
    %98 = arith.addf %97, %96 : vector<8x96xf32>
    %99 = arith.divf %97, %98 : vector<8x96xf32>
    %100 = vector.extract_strided_slice %93 {offsets = [0, 96], sizes = [8, 32], strides = [1, 1]} : vector<8x128xf32> to vector<8x32xf32>
    %101 = math.tanh %100 : vector<8x32xf32>
    %102 = vector.extract_strided_slice %99 {offsets = [0, 0], sizes = [8, 32], strides = [1, 1]} : vector<8x96xf32> to vector<8x32xf32>
    %103 = vector.extract_strided_slice %99 {offsets = [0, 32], sizes = [8, 32], strides = [1, 1]} : vector<8x96xf32> to vector<8x32xf32>
    %104 = vector.extract_strided_slice %99 {offsets = [0, 64], sizes = [8, 32], strides = [1, 1]} : vector<8x96xf32> to vector<8x32xf32>
    %105 = arith.mulf %103, %66 : vector<8x32xf32>
    %106 = arith.mulf %102, %101 : vector<8x32xf32>
    %107 = arith.addf %105, %106 : vector<8x32xf32>
    %108 = math.tanh %107 : vector<8x32xf32>
    %109 = arith.mulf %104, %108 : vector<8x32xf32>
    %c2_i32 = arith.constant 2 : i32
    %110 = arith.index_cast %c2_i32 : i32 to index
    %c0_46 = arith.constant 0 : index
    %c0_47 = arith.constant 0 : index
    %111 = vector.load %arg10[%110, %c0_46, %c0_47] : memref<8x8x128xf32, #tpu.memory_space<vmem>>, vector<1x8x128xf32>
    %112 = vector.shape_cast %111 : vector<1x8x128xf32> to vector<8x128xf32>
    %cst_48 = arith.constant dense<0.000000e+00> : vector<8x128xf32>
    %113 = tpu.matmul %89, %12, %cst_48 {dimension_numbers = #tpu.dot_dimension_numbers<[1], [0], [0], [1], [0, 0, 1, 1], [], []>} : vector<8x32xf32>, vector<32x128xf32>, vector<8x128xf32> -> vector<8x128xf32>
    %114 = arith.addf %112, %113 : vector<8x128xf32>
    %115 = vector.extract_strided_slice %114 {offsets = [0, 0], sizes = [8, 96], strides = [1, 1]} : vector<8x128xf32> to vector<8x96xf32>
    %116 = arith.negf %115 : vector<8x96xf32>
    %117 = math.exp %116 : vector<8x96xf32>
    %cst_49 = arith.constant 1.000000e+00 : f32
    %118 = vector.broadcast %cst_49 : f32 to vector<8x96xf32>
    %119 = arith.addf %118, %117 : vector<8x96xf32>
    %120 = arith.divf %118, %119 : vector<8x96xf32>
    %121 = vector.extract_strided_slice %114 {offsets = [0, 96], sizes = [8, 32], strides = [1, 1]} : vector<8x128xf32> to vector<8x32xf32>
    %122 = math.tanh %121 : vector<8x32xf32>
    %123 = vector.extract_strided_slice %120 {offsets = [0, 0], sizes = [8, 32], strides = [1, 1]} : vector<8x96xf32> to vector<8x32xf32>
    %124 = vector.extract_strided_slice %120 {offsets = [0, 32], sizes = [8, 32], strides = [1, 1]} : vector<8x96xf32> to vector<8x32xf32>
    %125 = vector.extract_strided_slice %120 {offsets = [0, 64], sizes = [8, 32], strides = [1, 1]} : vector<8x96xf32> to vector<8x32xf32>
    %126 = arith.mulf %124, %87 : vector<8x32xf32>
    %127 = arith.mulf %123, %122 : vector<8x32xf32>
    %128 = arith.addf %126, %127 : vector<8x32xf32>
    %129 = math.tanh %128 : vector<8x32xf32>
    %130 = arith.mulf %125, %129 : vector<8x32xf32>
    %cst_50 = arith.constant dense<0.000000e+00> : vector<8x128xf32>
    %131 = tpu.matmul %130, %14, %cst_50 {dimension_numbers = #tpu.dot_dimension_numbers<[1], [0], [0], [1], [0, 0, 1, 1], [], []>} : vector<8x32xf32>, vector<32x128xf32>, vector<8x128xf32> -> vector<8x128xf32>
    %cst_51 = arith.constant dense<0.000000e+00> : vector<8x128xf32>
    %132 = tpu.matmul %109, %16, %cst_51 {dimension_numbers = #tpu.dot_dimension_numbers<[1], [0], [0], [1], [0, 0, 1, 1], [], []>} : vector<8x32xf32>, vector<32x128xf32>, vector<8x128xf32> -> vector<8x128xf32>
    %133 = arith.addf %131, %132 : vector<8x128xf32>
    %134 = arith.addf %133, %19 : vector<8x128xf32>
    %135 = vector.extract_strided_slice %134 {offsets = [0, 0], sizes = [8, 96], strides = [1, 1]} : vector<8x128xf32> to vector<8x96xf32>
    %136 = arith.negf %135 : vector<8x96xf32>
    %137 = math.exp %136 : vector<8x96xf32>
    %cst_52 = arith.constant 1.000000e+00 : f32
    %138 = vector.broadcast %cst_52 : f32 to vector<8x96xf32>
    %139 = arith.addf %138, %137 : vector<8x96xf32>
    %140 = arith.divf %138, %139 : vector<8x96xf32>
    %141 = vector.extract_strided_slice %134 {offsets = [0, 96], sizes = [8, 32], strides = [1, 1]} : vector<8x128xf32> to vector<8x32xf32>
    %142 = math.tanh %141 : vector<8x32xf32>
    %143 = vector.extract_strided_slice %140 {offsets = [0, 0], sizes = [8, 32], strides = [1, 1]} : vector<8x96xf32> to vector<8x32xf32>
    %144 = vector.extract_strided_slice %140 {offsets = [0, 32], sizes = [8, 32], strides = [1, 1]} : vector<8x96xf32> to vector<8x32xf32>
    %145 = vector.extract_strided_slice %140 {offsets = [0, 64], sizes = [8, 32], strides = [1, 1]} : vector<8x96xf32> to vector<8x32xf32>
    %146 = arith.mulf %144, %107 : vector<8x32xf32>
    %147 = arith.mulf %143, %142 : vector<8x32xf32>
    %148 = arith.addf %146, %147 : vector<8x32xf32>
    %149 = math.tanh %148 : vector<8x32xf32>
    %150 = arith.mulf %145, %149 : vector<8x32xf32>
    %c3_i32 = arith.constant 3 : i32
    %151 = arith.index_cast %c3_i32 : i32 to index
    %c0_53 = arith.constant 0 : index
    %c0_54 = arith.constant 0 : index
    %152 = vector.load %arg10[%151, %c0_53, %c0_54] : memref<8x8x128xf32, #tpu.memory_space<vmem>>, vector<1x8x128xf32>
    %153 = vector.shape_cast %152 : vector<1x8x128xf32> to vector<8x128xf32>
    %cst_55 = arith.constant dense<0.000000e+00> : vector<8x128xf32>
    %154 = tpu.matmul %130, %12, %cst_55 {dimension_numbers = #tpu.dot_dimension_numbers<[1], [0], [0], [1], [0, 0, 1, 1], [], []>} : vector<8x32xf32>, vector<32x128xf32>, vector<8x128xf32> -> vector<8x128xf32>
    %155 = arith.addf %153, %154 : vector<8x128xf32>
    %156 = vector.extract_strided_slice %155 {offsets = [0, 0], sizes = [8, 96], strides = [1, 1]} : vector<8x128xf32> to vector<8x96xf32>
    %157 = arith.negf %156 : vector<8x96xf32>
    %158 = math.exp %157 : vector<8x96xf32>
    %cst_56 = arith.constant 1.000000e+00 : f32
    %159 = vector.broadcast %cst_56 : f32 to vector<8x96xf32>
    %160 = arith.addf %159, %158 : vector<8x96xf32>
    %161 = arith.divf %159, %160 : vector<8x96xf32>
    %162 = vector.extract_strided_slice %155 {offsets = [0, 96], sizes = [8, 32], strides = [1, 1]} : vector<8x128xf32> to vector<8x32xf32>
    %163 = math.tanh %162 : vector<8x32xf32>
    %164 = vector.extract_strided_slice %161 {offsets = [0, 0], sizes = [8, 32], strides = [1, 1]} : vector<8x96xf32> to vector<8x32xf32>
    %165 = vector.extract_strided_slice %161 {offsets = [0, 32], sizes = [8, 32], strides = [1, 1]} : vector<8x96xf32> to vector<8x32xf32>
    %166 = vector.extract_strided_slice %161 {offsets = [0, 64], sizes = [8, 32], strides = [1, 1]} : vector<8x96xf32> to vector<8x32xf32>
    %167 = arith.mulf %165, %128 : vector<8x32xf32>
    %168 = arith.mulf %164, %163 : vector<8x32xf32>
    %169 = arith.addf %167, %168 : vector<8x32xf32>
    %170 = math.tanh %169 : vector<8x32xf32>
    %171 = arith.mulf %166, %170 : vector<8x32xf32>
    %cst_57 = arith.constant dense<0.000000e+00> : vector<8x128xf32>
    %172 = tpu.matmul %171, %14, %cst_57 {dimension_numbers = #tpu.dot_dimension_numbers<[1], [0], [0], [1], [0, 0, 1, 1], [], []>} : vector<8x32xf32>, vector<32x128xf32>, vector<8x128xf32> -> vector<8x128xf32>
    %cst_58 = arith.constant dense<0.000000e+00> : vector<8x128xf32>
    %173 = tpu.matmul %150, %16, %cst_58 {dimension_numbers = #tpu.dot_dimension_numbers<[1], [0], [0], [1], [0, 0, 1, 1], [], []>} : vector<8x32xf32>, vector<32x128xf32>, vector<8x128xf32> -> vector<8x128xf32>
    %174 = arith.addf %172, %173 : vector<8x128xf32>
    %175 = arith.addf %174, %19 : vector<8x128xf32>
    %176 = vector.extract_strided_slice %175 {offsets = [0, 0], sizes = [8, 96], strides = [1, 1]} : vector<8x128xf32> to vector<8x96xf32>
    %177 = arith.negf %176 : vector<8x96xf32>
    %178 = math.exp %177 : vector<8x96xf32>
    %cst_59 = arith.constant 1.000000e+00 : f32
    %179 = vector.broadcast %cst_59 : f32 to vector<8x96xf32>
    %180 = arith.addf %179, %178 : vector<8x96xf32>
    %181 = arith.divf %179, %180 : vector<8x96xf32>
    %182 = vector.extract_strided_slice %175 {offsets = [0, 96], sizes = [8, 32], strides = [1, 1]} : vector<8x128xf32> to vector<8x32xf32>
    %183 = math.tanh %182 : vector<8x32xf32>
    %184 = vector.extract_strided_slice %181 {offsets = [0, 0], sizes = [8, 32], strides = [1, 1]} : vector<8x96xf32> to vector<8x32xf32>
    %185 = vector.extract_strided_slice %181 {offsets = [0, 32], sizes = [8, 32], strides = [1, 1]} : vector<8x96xf32> to vector<8x32xf32>
    %186 = vector.extract_strided_slice %181 {offsets = [0, 64], sizes = [8, 32], strides = [1, 1]} : vector<8x96xf32> to vector<8x32xf32>
    %187 = arith.mulf %185, %148 : vector<8x32xf32>
    %188 = arith.mulf %184, %183 : vector<8x32xf32>
    %189 = arith.addf %187, %188 : vector<8x32xf32>
    %190 = math.tanh %189 : vector<8x32xf32>
    %191 = arith.mulf %186, %190 : vector<8x32xf32>
    %c4_i32 = arith.constant 4 : i32
    %192 = arith.index_cast %c4_i32 : i32 to index
    %c0_60 = arith.constant 0 : index
    %c0_61 = arith.constant 0 : index
    %193 = vector.load %arg10[%192, %c0_60, %c0_61] : memref<8x8x128xf32, #tpu.memory_space<vmem>>, vector<1x8x128xf32>
    %194 = vector.shape_cast %193 : vector<1x8x128xf32> to vector<8x128xf32>
    %cst_62 = arith.constant dense<0.000000e+00> : vector<8x128xf32>
    %195 = tpu.matmul %171, %12, %cst_62 {dimension_numbers = #tpu.dot_dimension_numbers<[1], [0], [0], [1], [0, 0, 1, 1], [], []>} : vector<8x32xf32>, vector<32x128xf32>, vector<8x128xf32> -> vector<8x128xf32>
    %196 = arith.addf %194, %195 : vector<8x128xf32>
    %197 = vector.extract_strided_slice %196 {offsets = [0, 0], sizes = [8, 96], strides = [1, 1]} : vector<8x128xf32> to vector<8x96xf32>
    %198 = arith.negf %197 : vector<8x96xf32>
    %199 = math.exp %198 : vector<8x96xf32>
    %cst_63 = arith.constant 1.000000e+00 : f32
    %200 = vector.broadcast %cst_63 : f32 to vector<8x96xf32>
    %201 = arith.addf %200, %199 : vector<8x96xf32>
    %202 = arith.divf %200, %201 : vector<8x96xf32>
    %203 = vector.extract_strided_slice %196 {offsets = [0, 96], sizes = [8, 32], strides = [1, 1]} : vector<8x128xf32> to vector<8x32xf32>
    %204 = math.tanh %203 : vector<8x32xf32>
    %205 = vector.extract_strided_slice %202 {offsets = [0, 0], sizes = [8, 32], strides = [1, 1]} : vector<8x96xf32> to vector<8x32xf32>
    %206 = vector.extract_strided_slice %202 {offsets = [0, 32], sizes = [8, 32], strides = [1, 1]} : vector<8x96xf32> to vector<8x32xf32>
    %207 = vector.extract_strided_slice %202 {offsets = [0, 64], sizes = [8, 32], strides = [1, 1]} : vector<8x96xf32> to vector<8x32xf32>
    %208 = arith.mulf %206, %169 : vector<8x32xf32>
    %209 = arith.mulf %205, %204 : vector<8x32xf32>
    %210 = arith.addf %208, %209 : vector<8x32xf32>
    %211 = math.tanh %210 : vector<8x32xf32>
    %212 = arith.mulf %207, %211 : vector<8x32xf32>
    %cst_64 = arith.constant dense<0.000000e+00> : vector<8x128xf32>
    %213 = tpu.matmul %212, %14, %cst_64 {dimension_numbers = #tpu.dot_dimension_numbers<[1], [0], [0], [1], [0, 0, 1, 1], [], []>} : vector<8x32xf32>, vector<32x128xf32>, vector<8x128xf32> -> vector<8x128xf32>
    %cst_65 = arith.constant dense<0.000000e+00> : vector<8x128xf32>
    %214 = tpu.matmul %191, %16, %cst_65 {dimension_numbers = #tpu.dot_dimension_numbers<[1], [0], [0], [1], [0, 0, 1, 1], [], []>} : vector<8x32xf32>, vector<32x128xf32>, vector<8x128xf32> -> vector<8x128xf32>
    %215 = arith.addf %213, %214 : vector<8x128xf32>
    %216 = arith.addf %215, %19 : vector<8x128xf32>
    %217 = vector.extract_strided_slice %216 {offsets = [0, 0], sizes = [8, 96], strides = [1, 1]} : vector<8x128xf32> to vector<8x96xf32>
    %218 = arith.negf %217 : vector<8x96xf32>
    %219 = math.exp %218 : vector<8x96xf32>
    %cst_66 = arith.constant 1.000000e+00 : f32
    %220 = vector.broadcast %cst_66 : f32 to vector<8x96xf32>
    %221 = arith.addf %220, %219 : vector<8x96xf32>
    %222 = arith.divf %220, %221 : vector<8x96xf32>
    %223 = vector.extract_strided_slice %216 {offsets = [0, 96], sizes = [8, 32], strides = [1, 1]} : vector<8x128xf32> to vector<8x32xf32>
    %224 = math.tanh %223 : vector<8x32xf32>
    %225 = vector.extract_strided_slice %222 {offsets = [0, 0], sizes = [8, 32], strides = [1, 1]} : vector<8x96xf32> to vector<8x32xf32>
    %226 = vector.extract_strided_slice %222 {offsets = [0, 32], sizes = [8, 32], strides = [1, 1]} : vector<8x96xf32> to vector<8x32xf32>
    %227 = vector.extract_strided_slice %222 {offsets = [0, 64], sizes = [8, 32], strides = [1, 1]} : vector<8x96xf32> to vector<8x32xf32>
    %228 = arith.mulf %226, %189 : vector<8x32xf32>
    %229 = arith.mulf %225, %224 : vector<8x32xf32>
    %230 = arith.addf %228, %229 : vector<8x32xf32>
    %231 = math.tanh %230 : vector<8x32xf32>
    %232 = arith.mulf %227, %231 : vector<8x32xf32>
    %c5_i32 = arith.constant 5 : i32
    %233 = arith.index_cast %c5_i32 : i32 to index
    %c0_67 = arith.constant 0 : index
    %c0_68 = arith.constant 0 : index
    %234 = vector.load %arg10[%233, %c0_67, %c0_68] : memref<8x8x128xf32, #tpu.memory_space<vmem>>, vector<1x8x128xf32>
    %235 = vector.shape_cast %234 : vector<1x8x128xf32> to vector<8x128xf32>
    %cst_69 = arith.constant dense<0.000000e+00> : vector<8x128xf32>
    %236 = tpu.matmul %212, %12, %cst_69 {dimension_numbers = #tpu.dot_dimension_numbers<[1], [0], [0], [1], [0, 0, 1, 1], [], []>} : vector<8x32xf32>, vector<32x128xf32>, vector<8x128xf32> -> vector<8x128xf32>
    %237 = arith.addf %235, %236 : vector<8x128xf32>
    %238 = vector.extract_strided_slice %237 {offsets = [0, 0], sizes = [8, 96], strides = [1, 1]} : vector<8x128xf32> to vector<8x96xf32>
    %239 = arith.negf %238 : vector<8x96xf32>
    %240 = math.exp %239 : vector<8x96xf32>
    %cst_70 = arith.constant 1.000000e+00 : f32
    %241 = vector.broadcast %cst_70 : f32 to vector<8x96xf32>
    %242 = arith.addf %241, %240 : vector<8x96xf32>
    %243 = arith.divf %241, %242 : vector<8x96xf32>
    %244 = vector.extract_strided_slice %237 {offsets = [0, 96], sizes = [8, 32], strides = [1, 1]} : vector<8x128xf32> to vector<8x32xf32>
    %245 = math.tanh %244 : vector<8x32xf32>
    %246 = vector.extract_strided_slice %243 {offsets = [0, 0], sizes = [8, 32], strides = [1, 1]} : vector<8x96xf32> to vector<8x32xf32>
    %247 = vector.extract_strided_slice %243 {offsets = [0, 32], sizes = [8, 32], strides = [1, 1]} : vector<8x96xf32> to vector<8x32xf32>
    %248 = vector.extract_strided_slice %243 {offsets = [0, 64], sizes = [8, 32], strides = [1, 1]} : vector<8x96xf32> to vector<8x32xf32>
    %249 = arith.mulf %247, %210 : vector<8x32xf32>
    %250 = arith.mulf %246, %245 : vector<8x32xf32>
    %251 = arith.addf %249, %250 : vector<8x32xf32>
    %252 = math.tanh %251 : vector<8x32xf32>
    %253 = arith.mulf %248, %252 : vector<8x32xf32>
    %cst_71 = arith.constant dense<0.000000e+00> : vector<8x128xf32>
    %254 = tpu.matmul %253, %14, %cst_71 {dimension_numbers = #tpu.dot_dimension_numbers<[1], [0], [0], [1], [0, 0, 1, 1], [], []>} : vector<8x32xf32>, vector<32x128xf32>, vector<8x128xf32> -> vector<8x128xf32>
    %cst_72 = arith.constant dense<0.000000e+00> : vector<8x128xf32>
    %255 = tpu.matmul %232, %16, %cst_72 {dimension_numbers = #tpu.dot_dimension_numbers<[1], [0], [0], [1], [0, 0, 1, 1], [], []>} : vector<8x32xf32>, vector<32x128xf32>, vector<8x128xf32> -> vector<8x128xf32>
    %256 = arith.addf %254, %255 : vector<8x128xf32>
    %257 = arith.addf %256, %19 : vector<8x128xf32>
    %258 = vector.extract_strided_slice %257 {offsets = [0, 0], sizes = [8, 96], strides = [1, 1]} : vector<8x128xf32> to vector<8x96xf32>
    %259 = arith.negf %258 : vector<8x96xf32>
    %260 = math.exp %259 : vector<8x96xf32>
    %cst_73 = arith.constant 1.000000e+00 : f32
    %261 = vector.broadcast %cst_73 : f32 to vector<8x96xf32>
    %262 = arith.addf %261, %260 : vector<8x96xf32>
    %263 = arith.divf %261, %262 : vector<8x96xf32>
    %264 = vector.extract_strided_slice %257 {offsets = [0, 96], sizes = [8, 32], strides = [1, 1]} : vector<8x128xf32> to vector<8x32xf32>
    %265 = math.tanh %264 : vector<8x32xf32>
    %266 = vector.extract_strided_slice %263 {offsets = [0, 0], sizes = [8, 32], strides = [1, 1]} : vector<8x96xf32> to vector<8x32xf32>
    %267 = vector.extract_strided_slice %263 {offsets = [0, 32], sizes = [8, 32], strides = [1, 1]} : vector<8x96xf32> to vector<8x32xf32>
    %268 = vector.extract_strided_slice %263 {offsets = [0, 64], sizes = [8, 32], strides = [1, 1]} : vector<8x96xf32> to vector<8x32xf32>
    %269 = arith.mulf %267, %230 : vector<8x32xf32>
    %270 = arith.mulf %266, %265 : vector<8x32xf32>
    %271 = arith.addf %269, %270 : vector<8x32xf32>
    %272 = math.tanh %271 : vector<8x32xf32>
    %273 = arith.mulf %268, %272 : vector<8x32xf32>
    %c6_i32 = arith.constant 6 : i32
    %274 = arith.index_cast %c6_i32 : i32 to index
    %c0_74 = arith.constant 0 : index
    %c0_75 = arith.constant 0 : index
    %275 = vector.load %arg10[%274, %c0_74, %c0_75] : memref<8x8x128xf32, #tpu.memory_space<vmem>>, vector<1x8x128xf32>
    %276 = vector.shape_cast %275 : vector<1x8x128xf32> to vector<8x128xf32>
    %cst_76 = arith.constant dense<0.000000e+00> : vector<8x128xf32>
    %277 = tpu.matmul %253, %12, %cst_76 {dimension_numbers = #tpu.dot_dimension_numbers<[1], [0], [0], [1], [0, 0, 1, 1], [], []>} : vector<8x32xf32>, vector<32x128xf32>, vector<8x128xf32> -> vector<8x128xf32>
    %278 = arith.addf %276, %277 : vector<8x128xf32>
    %279 = vector.extract_strided_slice %278 {offsets = [0, 0], sizes = [8, 96], strides = [1, 1]} : vector<8x128xf32> to vector<8x96xf32>
    %280 = arith.negf %279 : vector<8x96xf32>
    %281 = math.exp %280 : vector<8x96xf32>
    %cst_77 = arith.constant 1.000000e+00 : f32
    %282 = vector.broadcast %cst_77 : f32 to vector<8x96xf32>
    %283 = arith.addf %282, %281 : vector<8x96xf32>
    %284 = arith.divf %282, %283 : vector<8x96xf32>
    %285 = vector.extract_strided_slice %278 {offsets = [0, 96], sizes = [8, 32], strides = [1, 1]} : vector<8x128xf32> to vector<8x32xf32>
    %286 = math.tanh %285 : vector<8x32xf32>
    %287 = vector.extract_strided_slice %284 {offsets = [0, 0], sizes = [8, 32], strides = [1, 1]} : vector<8x96xf32> to vector<8x32xf32>
    %288 = vector.extract_strided_slice %284 {offsets = [0, 32], sizes = [8, 32], strides = [1, 1]} : vector<8x96xf32> to vector<8x32xf32>
    %289 = vector.extract_strided_slice %284 {offsets = [0, 64], sizes = [8, 32], strides = [1, 1]} : vector<8x96xf32> to vector<8x32xf32>
    %290 = arith.mulf %288, %251 : vector<8x32xf32>
    %291 = arith.mulf %287, %286 : vector<8x32xf32>
    %292 = arith.addf %290, %291 : vector<8x32xf32>
    %293 = math.tanh %292 : vector<8x32xf32>
    %294 = arith.mulf %289, %293 : vector<8x32xf32>
    %cst_78 = arith.constant dense<0.000000e+00> : vector<8x128xf32>
    %295 = tpu.matmul %294, %14, %cst_78 {dimension_numbers = #tpu.dot_dimension_numbers<[1], [0], [0], [1], [0, 0, 1, 1], [], []>} : vector<8x32xf32>, vector<32x128xf32>, vector<8x128xf32> -> vector<8x128xf32>
    %cst_79 = arith.constant dense<0.000000e+00> : vector<8x128xf32>
    %296 = tpu.matmul %273, %16, %cst_79 {dimension_numbers = #tpu.dot_dimension_numbers<[1], [0], [0], [1], [0, 0, 1, 1], [], []>} : vector<8x32xf32>, vector<32x128xf32>, vector<8x128xf32> -> vector<8x128xf32>
    %297 = arith.addf %295, %296 : vector<8x128xf32>
    %298 = arith.addf %297, %19 : vector<8x128xf32>
    %299 = vector.extract_strided_slice %298 {offsets = [0, 0], sizes = [8, 96], strides = [1, 1]} : vector<8x128xf32> to vector<8x96xf32>
    %300 = arith.negf %299 : vector<8x96xf32>
    %301 = math.exp %300 : vector<8x96xf32>
    %cst_80 = arith.constant 1.000000e+00 : f32
    %302 = vector.broadcast %cst_80 : f32 to vector<8x96xf32>
    %303 = arith.addf %302, %301 : vector<8x96xf32>
    %304 = arith.divf %302, %303 : vector<8x96xf32>
    %305 = vector.extract_strided_slice %298 {offsets = [0, 96], sizes = [8, 32], strides = [1, 1]} : vector<8x128xf32> to vector<8x32xf32>
    %306 = math.tanh %305 : vector<8x32xf32>
    %307 = vector.extract_strided_slice %304 {offsets = [0, 0], sizes = [8, 32], strides = [1, 1]} : vector<8x96xf32> to vector<8x32xf32>
    %308 = vector.extract_strided_slice %304 {offsets = [0, 32], sizes = [8, 32], strides = [1, 1]} : vector<8x96xf32> to vector<8x32xf32>
    %309 = vector.extract_strided_slice %304 {offsets = [0, 64], sizes = [8, 32], strides = [1, 1]} : vector<8x96xf32> to vector<8x32xf32>
    %310 = arith.mulf %308, %271 : vector<8x32xf32>
    %311 = arith.mulf %307, %306 : vector<8x32xf32>
    %312 = arith.addf %310, %311 : vector<8x32xf32>
    %313 = math.tanh %312 : vector<8x32xf32>
    %314 = arith.mulf %309, %313 : vector<8x32xf32>
    %c7_i32 = arith.constant 7 : i32
    %315 = arith.index_cast %c7_i32 : i32 to index
    %c0_81 = arith.constant 0 : index
    %c0_82 = arith.constant 0 : index
    %316 = vector.load %arg10[%315, %c0_81, %c0_82] : memref<8x8x128xf32, #tpu.memory_space<vmem>>, vector<1x8x128xf32>
    %317 = vector.shape_cast %316 : vector<1x8x128xf32> to vector<8x128xf32>
    %cst_83 = arith.constant dense<0.000000e+00> : vector<8x128xf32>
    %318 = tpu.matmul %294, %12, %cst_83 {dimension_numbers = #tpu.dot_dimension_numbers<[1], [0], [0], [1], [0, 0, 1, 1], [], []>} : vector<8x32xf32>, vector<32x128xf32>, vector<8x128xf32> -> vector<8x128xf32>
    %319 = arith.addf %317, %318 : vector<8x128xf32>
    %320 = vector.extract_strided_slice %319 {offsets = [0, 0], sizes = [8, 96], strides = [1, 1]} : vector<8x128xf32> to vector<8x96xf32>
    %321 = arith.negf %320 : vector<8x96xf32>
    %322 = math.exp %321 : vector<8x96xf32>
    %cst_84 = arith.constant 1.000000e+00 : f32
    %323 = vector.broadcast %cst_84 : f32 to vector<8x96xf32>
    %324 = arith.addf %323, %322 : vector<8x96xf32>
    %325 = arith.divf %323, %324 : vector<8x96xf32>
    %326 = vector.extract_strided_slice %319 {offsets = [0, 96], sizes = [8, 32], strides = [1, 1]} : vector<8x128xf32> to vector<8x32xf32>
    %327 = math.tanh %326 : vector<8x32xf32>
    %328 = vector.extract_strided_slice %325 {offsets = [0, 0], sizes = [8, 32], strides = [1, 1]} : vector<8x96xf32> to vector<8x32xf32>
    %329 = vector.extract_strided_slice %325 {offsets = [0, 32], sizes = [8, 32], strides = [1, 1]} : vector<8x96xf32> to vector<8x32xf32>
    %330 = vector.extract_strided_slice %325 {offsets = [0, 64], sizes = [8, 32], strides = [1, 1]} : vector<8x96xf32> to vector<8x32xf32>
    %331 = arith.mulf %329, %292 : vector<8x32xf32>
    %332 = arith.mulf %328, %327 : vector<8x32xf32>
    %333 = arith.addf %331, %332 : vector<8x32xf32>
    %334 = math.tanh %333 : vector<8x32xf32>
    %335 = arith.mulf %330, %334 : vector<8x32xf32>
    %cst_85 = arith.constant dense<0.000000e+00> : vector<8x128xf32>
    %336 = tpu.matmul %335, %14, %cst_85 {dimension_numbers = #tpu.dot_dimension_numbers<[1], [0], [0], [1], [0, 0, 1, 1], [], []>} : vector<8x32xf32>, vector<32x128xf32>, vector<8x128xf32> -> vector<8x128xf32>
    %cst_86 = arith.constant dense<0.000000e+00> : vector<8x128xf32>
    %337 = tpu.matmul %314, %16, %cst_86 {dimension_numbers = #tpu.dot_dimension_numbers<[1], [0], [0], [1], [0, 0, 1, 1], [], []>} : vector<8x32xf32>, vector<32x128xf32>, vector<8x128xf32> -> vector<8x128xf32>
    %338 = arith.addf %336, %337 : vector<8x128xf32>
    %339 = arith.addf %338, %19 : vector<8x128xf32>
    %340 = vector.extract_strided_slice %339 {offsets = [0, 0], sizes = [8, 96], strides = [1, 1]} : vector<8x128xf32> to vector<8x96xf32>
    %341 = arith.negf %340 : vector<8x96xf32>
    %342 = math.exp %341 : vector<8x96xf32>
    %cst_87 = arith.constant 1.000000e+00 : f32
    %343 = vector.broadcast %cst_87 : f32 to vector<8x96xf32>
    %344 = arith.addf %343, %342 : vector<8x96xf32>
    %345 = arith.divf %343, %344 : vector<8x96xf32>
    %346 = vector.extract_strided_slice %339 {offsets = [0, 96], sizes = [8, 32], strides = [1, 1]} : vector<8x128xf32> to vector<8x32xf32>
    %347 = math.tanh %346 : vector<8x32xf32>
    %348 = vector.extract_strided_slice %345 {offsets = [0, 0], sizes = [8, 32], strides = [1, 1]} : vector<8x96xf32> to vector<8x32xf32>
    %349 = vector.extract_strided_slice %345 {offsets = [0, 32], sizes = [8, 32], strides = [1, 1]} : vector<8x96xf32> to vector<8x32xf32>
    %350 = vector.extract_strided_slice %345 {offsets = [0, 64], sizes = [8, 32], strides = [1, 1]} : vector<8x96xf32> to vector<8x32xf32>
    %351 = arith.mulf %349, %312 : vector<8x32xf32>
    %352 = arith.mulf %348, %347 : vector<8x32xf32>
    %353 = arith.addf %351, %352 : vector<8x32xf32>
    %354 = math.tanh %353 : vector<8x32xf32>
    %355 = arith.mulf %350, %354 : vector<8x32xf32>
    %c8_i32 = arith.constant 8 : i32
    %c0_88 = arith.constant 0 : index
    %c0_89 = arith.constant 0 : index
    %c0_90 = arith.constant 0 : index
    %356 = vector.load %arg8[%c0_88, %c0_89, %c0_90] : memref<2x8x32xf32, #tpu.memory_space<vmem>>, vector<1x8x32xf32>
    %357 = vector.shape_cast %356 : vector<1x8x32xf32> to vector<8x32xf32>
    %358 = vector.shape_cast %335 : vector<8x32xf32> to vector<1x8x32xf32>
    tpu.vector_store %arg8[%c0_88, %c0_89, %c0_90], %358 {strides = array<i32>} : memref<2x8x32xf32, #tpu.memory_space<vmem>>, vector<1x8x32xf32>,
    %c0_91 = arith.constant 0 : index
    %c0_92 = arith.constant 0 : index
    %c0_93 = arith.constant 0 : index
    %359 = vector.load %arg9[%c0_91, %c0_92, %c0_93] : memref<2x8x32xf32, #tpu.memory_space<vmem>>, vector<1x8x32xf32>
    %360 = vector.shape_cast %359 : vector<1x8x32xf32> to vector<8x32xf32>
    %361 = vector.shape_cast %333 : vector<8x32xf32> to vector<1x8x32xf32>
    tpu.vector_store %arg9[%c0_91, %c0_92, %c0_93], %361 {strides = array<i32>} : memref<2x8x32xf32, #tpu.memory_space<vmem>>, vector<1x8x32xf32>,
    %c1_94 = arith.constant 1 : index
    %c0_95 = arith.constant 0 : index
    %c0_96 = arith.constant 0 : index
    %362 = vector.load %arg8[%c1_94, %c0_95, %c0_96] : memref<2x8x32xf32, #tpu.memory_space<vmem>>, vector<1x8x32xf32>
    %363 = vector.shape_cast %362 : vector<1x8x32xf32> to vector<8x32xf32>
    %364 = vector.shape_cast %355 : vector<8x32xf32> to vector<1x8x32xf32>
    tpu.vector_store %arg8[%c1_94, %c0_95, %c0_96], %364 {strides = array<i32>} : memref<2x8x32xf32, #tpu.memory_space<vmem>>, vector<1x8x32xf32>,
    %c1_97 = arith.constant 1 : index
    %c0_98 = arith.constant 0 : index
    %c0_99 = arith.constant 0 : index
    %365 = vector.load %arg9[%c1_97, %c0_98, %c0_99] : memref<2x8x32xf32, #tpu.memory_space<vmem>>, vector<1x8x32xf32>
    %366 = vector.shape_cast %365 : vector<1x8x32xf32> to vector<8x32xf32>
    %367 = vector.shape_cast %353 : vector<8x32xf32> to vector<1x8x32xf32>
    tpu.vector_store %arg9[%c1_97, %c0_98, %c0_99], %367 {strides = array<i32>} : memref<2x8x32xf32, #tpu.memory_space<vmem>>, vector<1x8x32xf32>,
    return
  }
  func.func @transform_0(%arg0: i32, %arg1: i32) -> (i32, i32, i32) {
    %c0_i32 = arith.constant 0 : i32
    %c0_i32_0 = arith.constant 0 : i32
    return %arg1, %arg0, %c0_i32 : i32, i32, i32
  }
  func.func @transform_1(%arg0: i32, %arg1: i32) -> (i32, i32) {
    %c0_i32 = arith.constant 0 : i32
    %c0_i32_0 = arith.constant 0 : i32
    %c0_i32_1 = arith.constant 0 : i32
    return %c0_i32, %c0_i32_0 : i32, i32
  }
  func.func @transform_2(%arg0: i32, %arg1: i32) -> (i32, i32) {
    %c0_i32 = arith.constant 0 : i32
    %c0_i32_0 = arith.constant 0 : i32
    %c0_i32_1 = arith.constant 0 : i32
    return %c0_i32, %c0_i32_0 : i32, i32
  }
  func.func @transform_3(%arg0: i32, %arg1: i32) -> (i32, i32, i32) {
    %c0_i32 = arith.constant 0 : i32
    %c0_i32_0 = arith.constant 0 : i32
    %c0_i32_1 = arith.constant 0 : i32
    %c0_i32_2 = arith.constant 0 : i32
    return %c0_i32, %c0_i32_0, %c0_i32_1 : i32, i32, i32
  }
  func.func @transform_4(%arg0: i32, %arg1: i32) -> (i32, i32, i32) {
    %c0_i32 = arith.constant 0 : i32
    %c0_i32_0 = arith.constant 0 : i32
    %c0_i32_1 = arith.constant 0 : i32
    %c0_i32_2 = arith.constant 0 : i32
    return %c0_i32, %c0_i32_0, %c0_i32_1 : i32, i32, i32
  }
  func.func @transform_5(%arg0: i32, %arg1: i32) -> (i32, i32) {
    %c0_i32 = arith.constant 0 : i32
    %c0_i32_0 = arith.constant 0 : i32
    %c0_i32_1 = arith.constant 0 : i32
    return %c0_i32, %c0_i32_0 : i32, i32
  }
  func.func @transform_6(%arg0: i32, %arg1: i32) -> (i32, i32, i32) {
    %c0_i32 = arith.constant 0 : i32
    %c0_i32_0 = arith.constant 0 : i32
    %c0_i32_1 = arith.constant 0 : i32
    return %c0_i32, %arg0, %c0_i32_0 : i32, i32, i32
  }
  func.func @transform_7(%arg0: i32, %arg1: i32) -> (i32, i32, i32) {
    %c0_i32 = arith.constant 0 : i32
    %c0_i32_0 = arith.constant 0 : i32
    %c0_i32_1 = arith.constant 0 : i32
    return %c0_i32, %arg0, %c0_i32_0 : i32, i32, i32
  }
}

</mosaic_0001>

<bundles_post_ra>
// kernel: tpu_custom_call.1
= control target key start
LH: loop header
LB: loop body
LE: loop exit
PB: predicated region body
PF: predicated region fallthrough
CT: control target
= control target key end

     0   :  { %13 = vsyncpa [#allocation4], 0  ;;  %s3985_s0 = inlined_call_operand.hbm [shape: f32[8,8,32], index: 0, kind: input, shape index: {}]   ;;  %s3986_s1 = inlined_call_operand.hbm [shape: f32[32,128], index: 1, kind: input, shape index: {}]   ;;  %s3987_s2 = inlined_call_operand.hbm [shape: f32[32,128], index: 2, kind: input, shape index: {}]   ;;  %s3988_s3 = inlined_call_operand.hbm [shape: f32[1,32,128], index: 3, kind: input, shape index: {}]   ;;  %s3989_s4 = inlined_call_operand.hbm [shape: f32[1,32,128], index: 4, kind: input, shape index: {}]   ;;  %s3990_s5 = inlined_call_operand.vmem [shape: f32[2,128], index: 5, kind: input, shape index: {}]   ;;  %s3991_s6 = inlined_call_operand.hbm [shape: f32[2,8,32], index: 6, kind: output, shape index: {0}]   ;;  %s3992_s7 = inlined_call_operand.hbm [shape: f32[2,8,32], index: 7, kind: output, shape index: {1}]  }
   0x1   :  { %14 = vsyncpa [#allocation7], 0 }
   0x2   :  { %15 = vsyncpa [#allocation10], 0 }
   0x3   :  { %16 = vsyncpa [#allocation5], 0 }
   0x4   :  { %17 = vsyncpa [#allocation14], 0  ;;  %s3444_s24 = smov [#allocation6]   ;;  %s3445_s26 = smov [#allocation9]  }
   0x5   :  { %s35_s25 = sshll.u32 %s3444_s24, 4  ;;  %s59_s27 = sshll.u32 %s3445_s26, 4  ;;  %s36_s25 = int_to_ptr.vmem [resolvable:$true] %s35_s25  ;;  %s3499_s27 = int_to_ptr.vmem [resolvable:$true] %s59_s27 }
   0x6   :  { %s3280_s30 = scalar_lea.hbm %s3986_s1, 512 }
   0x7   :  { %p3281_p0 = scmp.ne.s32.totalorder %s3986_s1, %s3280_s30  ;;  %p3284_p1 = scmp.lt.u32.totalorder %s3280_s30, %s3986_s1 }
   0x9   :  { %p3286_p2 = pnand %p3284_p1, %p3281_p0 }
   0xb   :  { %3289 = shalt.err (!%p3286_p2)
}
   0xc   :  { %s3290_s12 = scalar_lea.vmem %s36_s25, 512  ;;  %p3295_p4 = scmp.lt.s32.totalorder %s36_s25, %s36_s25 }
   0xd   :  { %p3291_p3 = scmp.ne.s32.totalorder %s36_s25, %s3290_s12  ;;  %p3296_p5 = scmp.lt.s32.totalorder %s3290_s12, %s3290_s12 }
   0xf   :  { %p3297_p6 = por %p3296_p5, %p3295_p4 }
  0x11   :  { %p3298_p7 = pnand %p3297_p6, %p3291_p3 }
  0x13   :  { %3301 = shalt.err (!%p3298_p7)
}
  0x14   :  { %s3446_s13 = smov 128   ;;  %s3447_s14 = smov 8  }
  0x15   :  { %41 = dma.hbm_to_vmem [thread:$0]  %s3986_s1, 512, %s36_s25, [#allocation7], %s3446_s13, %s3446_s13, %s3447_s14  }
  0x16   :  { %s3302_s19 = scalar_lea.hbm %s3988_s3, 512 }
  0x17   :  { %p3303_p8 = scmp.ne.s32.totalorder %s3988_s3, %s3302_s19  ;;  %p3306_p9 = scmp.lt.u32.totalorder %s3302_s19, %s3988_s3 }
  0x19   :  { %p3308_p10 = pnand %p3306_p9, %p3303_p8 }
  0x1b   :  { %3311 = shalt.err (!%p3308_p10)
}
  0x1c   :  { %s3312_s24 = scalar_lea.vmem %s3499_s27, 512  ;;  %p3317_p12 = scmp.lt.s32.totalorder %s3499_s27, %s3499_s27 }
  0x1d   :  { %p3313_p11 = scmp.ne.s32.totalorder %s3499_s27, %s3312_s24  ;;  %p3318_p13 = scmp.lt.s32.totalorder %s3312_s24, %s3312_s24 }
  0x1f   :  { %p3319_p0 = por %p3318_p13, %p3317_p12 }
  0x21   :  { %p3320_p1 = pnand %p3319_p0, %p3313_p11 }
  0x23   :  { %3323 = shalt.err (!%p3320_p1)
}
  0x24   :  { %65 = dma.hbm_to_vmem [thread:$0]  %s3988_s3, 512, %s3499_s27, [#allocation10], %s3446_s13, %s3446_s13, %s3447_s14  }
  0x25   :  { %s3448_s26 = smov [#allocation3]   ;;  %s3449_s29 = smov [#allocation8]  }
  0x26   :  { %s23_s28 = sshll.u32 %s3448_s26, 4  ;;  %s47_s30 = sshll.u32 %s3449_s29, 4  ;;  %s24_s28 = int_to_ptr.vmem [resolvable:$true] %s23_s28  ;;  %s3536_s30 = int_to_ptr.vmem [resolvable:$true] %s47_s30 }
  0x27   :  { %s3324_s10 = scalar_lea.hbm %s3985_s0, 1024 }
  0x28   :  { %p3325_p2 = scmp.ne.s32.totalorder %s3985_s0, %s3324_s10  ;;  %p3328_p3 = scmp.lt.u32.totalorder %s3324_s10, %s3985_s0 }
  0x2a   :  { %p3330_p4 = pnand %p3328_p3, %p3325_p2 }
  0x2c   :  { %3333 = shalt.err (!%p3330_p4)
}
  0x2d   :  { %s3334_s3 = scalar_lea.vmem %s24_s28, 1024  ;;  %p3339_p6 = scmp.lt.s32.totalorder %s24_s28, %s24_s28 }
  0x2e   :  { %p3335_p5 = scmp.ne.s32.totalorder %s24_s28, %s3334_s3  ;;  %p3340_p7 = scmp.lt.s32.totalorder %s3334_s3, %s3334_s3 }
  0x30   :  { %p3341_p8 = por %p3340_p7, %p3339_p6 }
  0x32   :  { %p3342_p9 = pnand %p3341_p8, %p3335_p5 }
  0x34   :  { %3345 = shalt.err (!%p3342_p9)
}
  0x35   :  { %29 = dma.hbm_to_vmem [thread:$0]  %s3985_s0, 1024, %s24_s28, [#allocation4], %s3446_s13, %s3446_s13, %s3447_s14  }
  0x36   :  { %s3346_s20 = scalar_lea.hbm %s3987_s2, 512 }
  0x37   :  { %p3347_p10 = scmp.ne.s32.totalorder %s3987_s2, %s3346_s20  ;;  %p3350_p11 = scmp.lt.u32.totalorder %s3346_s20, %s3987_s2 }
  0x39   :  { %p3352_p12 = pnand %p3350_p11, %p3347_p10 }
  0x3b   :  { %3355 = shalt.err (!%p3352_p12)
}
  0x3c   :  { %s3356_s1 = scalar_lea.vmem %s3536_s30, 512  ;;  %p3361_p0 = scmp.lt.s32.totalorder %s3536_s30, %s3536_s30 }
  0x3d   :  { %p3357_p13 = scmp.ne.s32.totalorder %s3536_s30, %s3356_s1  ;;  %p3362_p1 = scmp.lt.s32.totalorder %s3356_s1, %s3356_s1 }
  0x3f   :  { %p3363_p2 = por %p3362_p1, %p3361_p0 }
  0x41   :  { %p3364_p3 = pnand %p3363_p2, %p3357_p13 }
  0x43   :  { %3367 = shalt.err (!%p3364_p3)
}
  0x44   :  { %53 = dma.hbm_to_vmem [thread:$0]  %s3987_s2, 512, %s3536_s30, [#allocation7], %s3446_s13, %s3446_s13, %s3447_s14  }
  0x45   :  { %s3450_s26 = smov [#allocation11]   ;;  %s3368_s9 = scalar_lea.hbm %s3989_s4, 512 }
  0x46   :  { %s71_s28 = sshll.u32 %s3450_s26, 4  ;;  %p3369_p4 = scmp.ne.s32.totalorder %s3989_s4, %s3368_s9  ;;  %s72_s28 = int_to_ptr.vmem [resolvable:$true] %s71_s28 }
  0x47   :  { %p3372_p5 = scmp.lt.u32.totalorder %s3368_s9, %s3989_s4 }
  0x49   :  { %p3374_p6 = pnand %p3372_p5, %p3369_p4 }
  0x4b   :  { %3377 = shalt.err (!%p3374_p6)
}
  0x4c   :  { %s3378_s16 = scalar_lea.vmem %s72_s28, 512  ;;  %p3383_p8 = scmp.lt.s32.totalorder %s72_s28, %s72_s28 }
  0x4d   :  { %p3379_p7 = scmp.ne.s32.totalorder %s72_s28, %s3378_s16  ;;  %p3384_p9 = scmp.lt.s32.totalorder %s3378_s16, %s3378_s16 }
  0x4f   :  { %p3385_p10 = por %p3384_p9, %p3383_p8 }
  0x51   :  { %p3386_p11 = pnand %p3385_p10, %p3379_p7 }
  0x53   :  { %3389 = shalt.err (!%p3386_p11)
}
  0x54   :  { %77 = dma.hbm_to_vmem [thread:$0]  %s3989_s4, 512, %s72_s28, [#allocation10], %s3446_s13, %s3446_s13, %s3447_s14  }
  0x55   :  { %3434 = dma.done.wait [#allocation4], 1024  }
  0x56   :  { %3435 = vsyncadd [#allocation4], 4294966272 }
  0x57   :  { %3436 = dma.done.wait [#allocation7], 1024  }
  0x58   :  { %3437 = vsyncadd [#allocation7], 4294966272 }
  0x59   :  { %3438 = dma.done.wait [#allocation10], 1024  }
  0x5a   :  { %3439 = vsyncadd [#allocation10], 4294966272  ;;  %vm99_vm0 = vcmask 261120   ;;  %v3451_v0 = vmov 0.0|0.0   ;;  %vm3452_vm1 = vmmov 0   ;;  %v3453_v1 = vmov 0.0  }
  0x5b   :  { %2992 = vmatprep.subr.bf16.mxu1 %v3451_v0  ;;  %2728 = vmatprep.mubr.msk.f32.mxu1 %vm3452_vm1, %v3453_v1  ;;  %100 = vst.msk [vmem:[#allocation12] sm:$0xff] %vm99_vm0, %v3453_v1  ;;  %101 = vst.msk [vmem:[#allocation12 + $0x8] sm:$0xff] %vm99_vm0, %v3453_v1  ;;  %v112_v2 = vld [vmem:[#allocation6] sm:$0xff]  ;;  %v113_v3 = vld [vmem:[#allocation6 + $0x8] sm:$0xff]  ;;  %s3454_s27 = smov 32   ;;  %s3455_s17 = smov 64  }
  0x5c   :  { %102 = vst.msk [vmem:[#allocation13] sm:$0xff] %vm99_vm0, %v3453_v1  ;;  %103 = vst.msk [vmem:[#allocation13 + $0x8] sm:$0xff] %vm99_vm0, %v3453_v1  ;;  %v259_v4 = vld [vmem:[#allocation8] sm:$0xff]  ;;  %v2984_v5 = vpack.c.bf16 %v113_v3, %v112_v2  ;;  %v260_v6 = vld [vmem:[#allocation8 + $0x8] sm:$0xff]  ;;  %s3457_s22 = smov [#allocation13]  }
  0x5d   :  { %v114_v7 = vld [vmem:[#allocation6 + $0x10] sm:$0xff]  ;;  %v115_v8 = vld [vmem:[#allocation6 + $0x18] sm:$0xff]  ;;  %v3599_v9 = vpack.c.bf16 %v260_v6, %v259_v4  ;;  %v104_v11 = vld [vmem:[#allocation3] sm:$0xff]  ;;  %s2500_s23 = sshll.u32 %s3457_s22, 4  ;;  %s2501_s23 = int_to_ptr.vmem [resolvable:$true] %s2500_s23 }
  0x5e   :  { %v2988_v10 = vpack.c.bf16 %v115_v8, %v114_v7  ;;  %v261_v12 = vld [vmem:[#allocation8 + $0x10] sm:$0xff]  ;;  %v262_v13 = vld [vmem:[#allocation8 + $0x18] sm:$0xff]  ;;  %2985 = vmatprep.subr.bf16.mxu0 %v2984_v5  ;;  %2708 = vmatprep.mubr.msk.f32.mxu0 %vm99_vm0, %v104_v11  ;;  %v105_v15 = vld [vmem:[#allocation3 + $0x8] sm:$0xff]  ;;  %s3390_s24 = scalar_lea.vmem %s2501_s23, 256  ;;  %p3395_p13 = scmp.lt.s32.totalorder %s2501_s23, %s2501_s23 }
  0x5f   :  { %2987 = vmatpush3.bf16.msra.mxu0 %v2984_v5  ;;  %2994 = vmatpush3.bf16.msra.mxu1 %v3599_v9  ;;  %v3603_v14 = vpack.c.bf16 %v262_v13, %v261_v12  ;;  %v3616_v17 = vld [vmem:[%s3990_s5] ss:$0 sm:$0xff]  ;;  %v264_v37 = vld [vmem:[#allocation9 + $0x8] sm:$0xff]  ;;  %v106_v41 = vld [vmem:[#allocation3 + $0x10] sm:$0xff]  ;;  %p3391_p12 = scmp.ne.s32.totalorder %s2501_s23, %s3390_s24  ;;  %p3396_p0 = scmp.lt.s32.totalorder %s3390_s24, %s3390_s24 }
  0x60   :  { %2989 = vmatprep.subr.bf16.mxu0 %v2988_v10  ;;  %2995 = vmatprep.subr.bf16.mxu1 %v3451_v0  ;;  %v263_v36 = vld [vmem:[#allocation9] sm:$0xff]  ;;  %v268_v40 = vld [vmem:[#allocation11 + $0x8] sm:$0xff]  ;;  %v107_v42 = vld [vmem:[#allocation3 + $0x18] sm:$0xff] }
  0x61   :  { %v267_v38 = vld [vmem:[#allocation11] sm:$0xff]  ;;  %v3627_v39 = vpack.c.bf16 %v264_v37, %v263_v36  ;;  %v269_v44 = vld [vmem:[#allocation11 + $0x10] sm:$0xff]  ;;  %v270_v45 = vld [vmem:[#allocation11 + $0x18] sm:$0xff]  ;;  %p3397_p1 = por %p3396_p0, %p3395_p13 }
  0x62   :  { %v276_v16 = vld [vmem:[#allocation12] sm:$0xff]  ;;  %v3629_v43 = vpack.c.bf16 %v268_v40, %v267_v38  ;;  %v265_v47 = vld [vmem:[#allocation9 + $0x10] sm:$0xff]  ;;  %v266_v48 = vld [vmem:[#allocation9 + $0x18] sm:$0xff]  ;;  %v3635_v49 = vpack.c.bf16 %v270_v45, %v269_v44 }
  0x63   :  { %2991 = vmatpush3.bf16.msra.mxu0 %v2988_v10  ;;  %2997 = vmatpush3.bf16.msra.mxu1 %v3603_v14  ;;  %v279_v25 = vld [vmem:[#allocation13] sm:$0xff]  ;;  %v108_v46 = vld [vmem:[#allocation3 + $0x20] sm:$0xff]  ;;  %v3637_v50 = vpack.c.bf16 %v266_v48, %v265_v47  ;;  %v109_v51 = vld [vmem:[#allocation3 + $0x28] sm:$0xff]  ;;  %p3398_p2 = pnand %p3397_p1, %p3391_p12 }
  0x64   :  { %3004 = vmatprep.subr.bf16.mxu0 %v3451_v0  ;;  %2998 = vmatprep.subr.bf16.mxu1 %v3451_v0  ;;  %v110_v52 = vld [vmem:[#allocation3 + $0x30] sm:$0xff]  ;;  %v278_v53 = vld [vmem:[#allocation12 + $0x8] sm:$0xff]  ;;  %v111_v54 = vld [vmem:[#allocation3 + $0x38] sm:$0xff] }
  0x65   :  { %v3691_v6 = vld [vmem:[%s3990_s5 + $0x1] ss:$0 sm:$0xff] }
  0x66   :  { %2709 = vmatmul.mubr.msk.f32.vlgmr.msra.gmra.mrb[0].mxu0 %vm99_vm0, %v105_v15  ;;  %2729 = vmatmul.mubr.msk.f32.vlgmr.msra.gmra.mrb[0].mxu1 %vm99_vm0, %v276_v16 }
  0x67   :  { %2739 = vmatprep.mubr.msk.f32.mxu1 %vm3452_vm1, %v3453_v1  ;;  %2711 = vmatprep.mubr.msk.f32.mxu0 %vm99_vm0, %v106_v41 }
  0x68   :  { %3006 = vmatpush3.bf16.msra.mxu0 %v3627_v39  ;;  %3000 = vmatpush3.bf16.msra.mxu1 %v3629_v43 }
  0x69   :  { %3001 = vmatprep.subr.bf16.mxu1 %v3451_v0  ;;  %3007 = vmatprep.subr.bf16.mxu0 %v3451_v0 }
  0x6a   :  { %2712 = vmatmul.mubr.msk.f32.gmra.mrb[2].mxu0 %vm99_vm0, %v107_v42 }
  0x6b   :  { %2714 = vmatprep.mubr.msk.f32.mxu0 %vm99_vm0, %v108_v46 }
  0x6c   :  { %3009 = vmatpush3.bf16.msra.mxu0 %v3637_v50  ;;  %3003 = vmatpush3.bf16.msra.mxu1 %v3635_v49 }
  0x6d   :  { %3010 = vmatprep.subr.bf16.mxu1 %v3451_v0  ;;  %3016 = vmatprep.subr.bf16.mxu0 %v3451_v0 }
  0x6e   :  { %2715 = vmatmul.mubr.msk.f32.gmra.mrb[4].mxu0 %vm99_vm0, %v109_v51 }
  0x6f   :  { %2717 = vmatprep.mubr.msk.f32.mxu0 %vm99_vm0, %v110_v52  ;;  %2740 = vmatmul.mubr.msk.f32.vlgmr.msra.gmra.mrb[2].mxu1 %vm99_vm0, %v278_v53 }
  0x70   :  { %3012 = vmatpush3.bf16.msra.mxu1 %v3599_v9  ;;  %2761 = vmatprep.mubr.msk.f32.mxu1 %vm3452_vm1, %v3453_v1 }
  0x71   :  { %3013 = vmatprep.subr.bf16.mxu1 %v3451_v0 }
  0x72   :  { %2718 = vmatmul.mubr.msk.f32.gmra.mrb[6].mxu0 %vm99_vm0, %v111_v54 }
  0x73   :  { %2750 = vmatprep.mubr.msk.f32.mxu0 %vm3452_vm1, %v3453_v1 }
  0x74   :  { %3015 = vmatpush3.bf16.msra.mxu1 %v3603_v14 }
  0x75   :  { %3022 = vmatprep.subr.bf16.mxu1 %v3451_v0 }
 0x139   :  { %v3618_v18 = vpop.f32.mrb[0].mxu0  ;;  %v352_v19 = vpop.f32.mrb[0].mxu1 }
 0x13a   :  { %v212_v20 = vpop.f32.mrb[1].mxu0  ;;  %v2730_v21 = vpop.f32.mrb[1].mxu1  ;;  %v218_v5 = vadd.f32 %v3618_v18, %v3616_v17  ;;  %v281_v18 = vld [vmem:[#allocation13 + $0x8] sm:$0xff] }
 0x13b   :  { %v213_v22 = vadd.f32 %v3616_v17, %v212_v20 }
 0x13d   :  { %v356_v23 = vadd.f32 %v352_v19, %v213_v22  ;;  %v3660_v58 = vpop.f32.mrb[2].mxu0 }
 0x13e   :  { %v3662_v59 = vpop.f32.mrb[3].mxu0 }
 0x13f   :  { %3151 = vtanh.f32 %v356_v23  ;;  %v2529_v26 = vmul.f32 -1.442695, %v356_v23 }
 0x141   :  { %3153 = vpow2.f32 %v2529_v26  ;;  %v3664_v60 = vpop.f32.mrb[4].mxu0 }
 0x142   :  { %v3666_v61 = vpop.f32.mrb[5].mxu0  ;;  %v454_v62 = vpop.f32.mrb[2].mxu1 }
 0x143   :  { %v2741_v2 = vpop.f32.mrb[3].mxu1 }
 0x145   :  { %v3668_v63 = vpop.f32.mrb[6].mxu0 }
 0x146   :  { %v3670_v3 = vpop.f32.mrb[7].mxu0 }
 0x149   :  { %v3152_v24 = vpop.eup %3151 }
 0x14a   :  { %370 = vrot.lane.b32.xlu0 %v3152_v24, %s3454_s27 }
 0x14b   :  { %v3154_v27 = vpop.eup %3153 }
 0x14c   :  { %v360_v28 = vadd.f32 1.0, %v3154_v27 }
 0x14e   :  { %365 = vrot.lane.b32.xlu0 %v279_v25, %s3454_s27  ;;  %3155 = vrcp.f32 %v360_v28 }
 0x158   :  { %v3156_v29 = vpop.eup %3155 }
 0x1bc   :  { %v371_v30 = vpop.permute.xlu0 %370 }
 0x1bd   :  { %v373_v31 = vmul.f32 %v3156_v29, %v371_v30 }
 0x1bf   :  { %375 = vrot.lane.b32.xlu1 %v373_v31, %s3454_s27 }
 0x1c0   :  { %v366_v32 = vpop.permute.xlu0 %365 }
 0x1c1   :  { %v368_v33 = vmul.f32 %v3156_v29, %v366_v32 }
 0x231   :  { %v376_v34 = vpop.permute.xlu1 %375 }
 0x232   :  { %v3624_v35 = vadd.f32 %v376_v34, %v368_v33 }
 0x234   :  { %3157 = vtanh.f32 %v3624_v35 }
 0x23e   :  { %v3158_v55 = vpop.eup %3157 }
 0x23f   :  { %381 = vrot.lane.b32.xlu1 %v3158_v55, %s3454_s27 }
 0x2b1   :  { %v382_v56 = vpop.permute.xlu1 %381 }
 0x2b2   :  { %v384_v57 = vmul.f32 %v3156_v29, %v382_v56 }
 0x2b4   :  { %459 = vrot.lane.b32.xlu0 %v384_v57, %s3455_s17  ;;  %v223_v57 = vadd.f32 %v3616_v17, %v3662_v59 }
 0x326   :  { %v460_v4 = vpop.permute.xlu0 %459 }
 0x327   :  { %2751 = vmatmul.mubr.msk.f32.vlgmr.msra.gmra.mrb[8].mxu0 %vm99_vm0, %v460_v4  ;;  %2762 = vmatmul.mubr.msk.f32.vlgmr.msra.gmra.mrb[4].mxu1 %vm99_vm0, %v460_v4 }
 0x328   :  { %3024 = vmatpush3.bf16.msra.mxu1 %v3627_v39  ;;  %3018 = vmatpush3.bf16.msra.mxu0 %v3629_v43 }
 0x329   :  { %3025 = vmatprep.subr.bf16.mxu1 %v3451_v0  ;;  %3019 = vmatprep.subr.bf16.mxu0 %v3451_v0 }
 0x32a   :  { %2783 = vmatprep.mubr.msk.f32.mxu1 %vm3452_vm1, %v3453_v1  ;;  %2772 = vmatprep.mubr.msk.f32.mxu0 %vm3452_vm1, %v3453_v1 }
 0x32c   :  { %3027 = vmatpush3.bf16.msra.mxu1 %v3637_v50  ;;  %3021 = vmatpush3.bf16.msra.mxu0 %v3635_v49 }
 0x32d   :  { %3028 = vmatprep.subr.bf16.mxu0 %v3451_v0  ;;  %3034 = vmatprep.subr.bf16.mxu1 %v3451_v0 }
 0x3fa   :  { %v529_v7 = vpop.f32.mrb[8].mxu0  ;;  %v630_v8 = vpop.f32.mrb[4].mxu1 }
 0x3fb   :  { %v530_v10 = vadd.f32 %v529_v7, %v454_v62  ;;  %v634_v11 = vadd.f32 %v630_v8, %v218_v5  ;;  %v2752_v12 = vpop.f32.mrb[9].mxu0  ;;  %v2763_v13 = vpop.f32.mrb[5].mxu1 }
 0x3fd   :  { %v533_v15 = vadd.f32 %v3691_v6, %v530_v10  ;;  %3159 = vtanh.f32 %v634_v11  ;;  %v2534_v20 = vmul.f32 -1.442695, %v634_v11 }
 0x3ff   :  { %3161 = vtanh.f32 %v533_v15  ;;  %v2532_v21 = vmul.f32 -1.442695, %v533_v15 }
 0x400   :  { %3163 = vpow2.f32 %v2534_v20 }
 0x401   :  { %3165 = vpow2.f32 %v2532_v21 }
 0x407   :  { %v3160_v16 = vpop.eup %3159 }
 0x408   :  { %644 = vrot.lane.b32.xlu0 %v3160_v16, %s3454_s27 }
 0x409   :  { %v3162_v19 = vpop.eup %3161 }
 0x40a   :  { %547 = vrot.lane.b32.xlu1 %v3162_v19, %s3454_s27  ;;  %v3164_v22 = vpop.eup %3163 }
 0x40b   :  { %v3166_v23 = vpop.eup %3165  ;;  %v638_v24 = vadd.f32 1.0, %v3164_v22 }
 0x40c   :  { %v537_v25 = vadd.f32 1.0, %v3166_v23 }
 0x40d   :  { %3167 = vrcp.f32 %v638_v24 }
 0x40e   :  { %542 = vrot.lane.b32.xlu1 %v281_v18, %s3454_s27  ;;  %3169 = vrcp.f32 %v537_v25 }
 0x417   :  { %v3168_v26 = vpop.eup %3167 }
 0x418   :  { %v3170_v29 = vpop.eup %3169  ;;  %v642_v33 = vmul.f32 %v3168_v26, %v3624_v35 }
 0x47a   :  { %v645_v27 = vpop.permute.xlu0 %644 }
 0x47b   :  { %v647_v28 = vmul.f32 %v3168_v26, %v645_v27 }
 0x47c   :  { %v548_v30 = vpop.permute.xlu1 %547 }
 0x47d   :  { %v550_v31 = vmul.f32 %v3170_v29, %v548_v30  ;;  %649 = vrot.lane.b32.xlu1 %v647_v28, %s3454_s27 }
 0x47f   :  { %552 = vrot.lane.b32.xlu0 %v550_v31, %s3454_s27 }
 0x480   :  { %v543_v32 = vpop.permute.xlu1 %542 }
 0x481   :  { %v545_v36 = vmul.f32 %v3170_v29, %v543_v32 }
 0x4ef   :  { %v650_v34 = vpop.permute.xlu1 %649 }
 0x4f0   :  { %v3700_v37 = vadd.f32 %v650_v34, %v642_v33 }
 0x4f1   :  { %v553_v38 = vpop.permute.xlu0 %552 }
 0x4f2   :  { %3171 = vtanh.f32 %v3700_v37  ;;  %v3703_v40 = vadd.f32 %v553_v38, %v545_v36 }
 0x4f4   :  { %3173 = vtanh.f32 %v3703_v40 }
 0x4fc   :  { %v3172_v41 = vpop.eup %3171 }
 0x4fd   :  { %655 = vrot.lane.b32.xlu1 %v3172_v41, %s3454_s27  ;;  %v228_v41 = vadd.f32 %v3660_v58, %v3616_v17 }
 0x4fe   :  { %v3174_v42 = vpop.eup %3173 }
 0x4ff   :  { %558 = vrot.lane.b32.xlu0 %v3174_v42, %s3454_s27 }
 0x56f   :  { %v656_v44 = vpop.permute.xlu1 %655 }
 0x570   :  { %v658_v45 = vmul.f32 %v3168_v26, %v656_v44 }
 0x571   :  { %v559_v35 = vpop.permute.xlu0 %558 }
 0x572   :  { %v561_v46 = vmul.f32 %v3170_v29, %v559_v35  ;;  %735 = vrot.lane.b32.xlu1 %v658_v45, %s3455_s17 }
 0x574   :  { %660 = vrot.lane.b32.xlu0 %v561_v46, %s3455_s17 }
 0x5e4   :  { %v736_v47 = vpop.permute.xlu1 %735 }
 0x5e5   :  { %2784 = vmatmul.mubr.msk.f32.vlgmr.msra.gmra.mrb[6].mxu1 %vm99_vm0, %v736_v47 }
 0x5e6   :  { %v661_v48 = vpop.permute.xlu0 %660  ;;  %3036 = vmatpush3.bf16.msra.mxu1 %v3629_v43  ;;  %2805 = vmatprep.mubr.msk.f32.mxu1 %vm3452_vm1, %v3453_v1 }
 0x5e7   :  { %2773 = vmatmul.mubr.msk.f32.vlgmr.msra.gmra.mrb[10].mxu0 %vm99_vm0, %v661_v48  ;;  %3037 = vmatprep.subr.bf16.mxu1 %v3451_v0 }
 0x5e8   :  { %3030 = vmatpush3.bf16.msra.mxu0 %v3599_v9  ;;  %2794 = vmatprep.mubr.msk.f32.mxu0 %vm3452_vm1, %v3453_v1 }
 0x5e9   :  { %3031 = vmatprep.subr.bf16.mxu0 %v3451_v0 }
 0x5ea   :  { %3039 = vmatpush3.bf16.msra.mxu1 %v3635_v49 }
 0x5eb   :  { %3046 = vmatprep.subr.bf16.mxu1 %v3451_v0 }
 0x5ec   :  { %3033 = vmatpush3.bf16.msra.mxu0 %v3603_v14 }
 0x5ed   :  { %3040 = vmatprep.subr.bf16.mxu0 %v3451_v0 }
 0x5ef   :  { %2795 = vmatmul.mubr.msk.f32.vlgmr.msra.gmra.mrb[12].mxu0 %vm99_vm0, %v736_v47 }
 0x5f0   :  { %3042 = vmatpush3.bf16.msra.mxu0 %v3627_v39  ;;  %2816 = vmatprep.mubr.msk.f32.mxu0 %vm3452_vm1, %v3453_v1 }
 0x5f1   :  { %3043 = vmatprep.subr.bf16.mxu0 %v3451_v0 }
 0x5f4   :  { %3045 = vmatpush3.bf16.msra.mxu0 %v3637_v50 }
 0x5f5   :  { %3052 = vmatprep.subr.bf16.mxu0 %v3451_v0 }
 0x6b8   :  { %v805_v51 = vpop.f32.mrb[6].mxu1 }
 0x6b9   :  { %v2785_v52 = vpop.f32.mrb[7].mxu1 }
 0x6ba   :  { %v730_v53 = vpop.f32.mrb[10].mxu0 }
 0x6bb   :  { %v806_v54 = vadd.f32 %v805_v51, %v730_v53  ;;  %v2774_v55 = vpop.f32.mrb[11].mxu0 }
 0x6bd   :  { %v809_v56 = vadd.f32 %v3691_v6, %v806_v54 }
 0x6bf   :  { %3175 = vtanh.f32 %v809_v56  ;;  %v2537_v8 = vmul.f32 -1.442695, %v809_v56 }
 0x6c2   :  { %v902_v62 = vpop.f32.mrb[12].mxu0 }
 0x6c3   :  { %v906_v2 = vadd.f32 %v902_v62, %v223_v57  ;;  %v2796_v4 = vpop.f32.mrb[13].mxu0 }
 0x6c5   :  { %3177 = vtanh.f32 %v906_v2  ;;  %v2539_v10 = vmul.f32 -1.442695, %v906_v2 }
 0x6c6   :  { %3179 = vpow2.f32 %v2537_v8 }
 0x6c7   :  { %3181 = vpow2.f32 %v2539_v10 }
 0x6c9   :  { %v3176_v5 = vpop.eup %3175 }
 0x6ca   :  { %819 = vrot.lane.b32.xlu0 %v3176_v5, %s3454_s27 }
 0x6cf   :  { %v3178_v7 = vpop.eup %3177 }
 0x6d0   :  { %916 = vrot.lane.b32.xlu1 %v3178_v7, %s3454_s27  ;;  %v3180_v11 = vpop.eup %3179 }
 0x6d1   :  { %v813_v12 = vadd.f32 1.0, %v3180_v11  ;;  %v3182_v13 = vpop.eup %3181 }
 0x6d2   :  { %v910_v15 = vadd.f32 1.0, %v3182_v13 }
 0x6d3   :  { %3183 = vrcp.f32 %v813_v12 }
 0x6d4   :  { %3185 = vrcp.f32 %v910_v15 }
 0x6dd   :  { %v3184_v59 = vpop.eup %3183 }
 0x6de   :  { %v3186_v18 = vpop.eup %3185  ;;  %v817_v22 = vmul.f32 %v3184_v59, %v3703_v40 }
 0x6df   :  { %v914_v25 = vmul.f32 %v3186_v18, %v3700_v37 }
 0x73c   :  { %v820_v16 = vpop.permute.xlu0 %819 }
 0x73d   :  { %v822_v19 = vmul.f32 %v3184_v59, %v820_v16 }
 0x73f   :  { %824 = vrot.lane.b32.xlu0 %v822_v19, %s3454_s27 }
 0x742   :  { %v917_v20 = vpop.permute.xlu1 %916 }
 0x743   :  { %v919_v21 = vmul.f32 %v3186_v18, %v917_v20 }
 0x745   :  { %921 = vrot.lane.b32.xlu1 %v919_v21, %s3454_s27 }
 0x7b1   :  { %v825_v23 = vpop.permute.xlu0 %824 }
 0x7b2   :  { %v3739_v24 = vadd.f32 %v825_v23, %v817_v22 }
 0x7b4   :  { %3187 = vtanh.f32 %v3739_v24 }
 0x7b7   :  { %v922_v26 = vpop.permute.xlu1 %921 }
 0x7b8   :  { %v3743_v27 = vadd.f32 %v922_v26, %v914_v25 }
 0x7ba   :  { %3189 = vtanh.f32 %v3743_v27 }
 0x7be   :  { %v3188_v28 = vpop.eup %3187 }
 0x7bf   :  { %830 = vrot.lane.b32.xlu0 %v3188_v28, %s3454_s27 }
 0x7c4   :  { %v3190_v29 = vpop.eup %3189 }
 0x7c5   :  { %927 = vrot.lane.b32.xlu1 %v3190_v29, %s3454_s27 }
 0x831   :  { %v831_v30 = vpop.permute.xlu0 %830 }
 0x832   :  { %v833_v31 = vmul.f32 %v3184_v59, %v831_v30  ;;  %v233_v30 = vadd.f32 %v3616_v17, %v3666_v61 }
 0x834   :  { %932 = vrot.lane.b32.xlu0 %v833_v31, %s3455_s17 }
 0x837   :  { %v928_v32 = vpop.permute.xlu1 %927 }
 0x838   :  { %v930_v33 = vmul.f32 %v3186_v18, %v928_v32 }
 0x83a   :  { %1007 = vrot.lane.b32.xlu1 %v930_v33, %s3455_s17 }
 0x8a6   :  { %v933_v34 = vpop.permute.xlu0 %932 }
 0x8a7   :  { %2806 = vmatmul.mubr.msk.f32.vlgmr.msra.gmra.mrb[8].mxu1 %vm99_vm0, %v933_v34 }
 0x8a8   :  { %3048 = vmatpush3.bf16.msra.mxu1 %v3599_v9  ;;  %2827 = vmatprep.mubr.msk.f32.mxu1 %vm3452_vm1, %v3453_v1 }
 0x8a9   :  { %3049 = vmatprep.subr.bf16.mxu1 %v3451_v0 }
 0x8ac   :  { %v1008_v36 = vpop.permute.xlu1 %1007  ;;  %3051 = vmatpush3.bf16.msra.mxu1 %v3603_v14 }
 0x8ad   :  { %2817 = vmatmul.mubr.msk.f32.vlgmr.msra.gmra.mrb[14].mxu0 %vm99_vm0, %v1008_v36  ;;  %3058 = vmatprep.subr.bf16.mxu1 %v3451_v0 }
 0x8ae   :  { %3054 = vmatpush3.bf16.msra.mxu0 %v3629_v43  ;;  %2838 = vmatprep.mubr.msk.f32.mxu0 %vm3452_vm1, %v3453_v1 }
 0x8af   :  { %2828 = vmatmul.mubr.msk.f32.vlgmr.msra.gmra.mrb[10].mxu1 %vm99_vm0, %v1008_v36  ;;  %3055 = vmatprep.subr.bf16.mxu0 %v3451_v0 }
 0x8b0   :  { %3060 = vmatpush3.bf16.msra.mxu1 %v3627_v39  ;;  %2849 = vmatprep.mubr.msk.f32.mxu1 %vm3452_vm1, %v3453_v1 }
 0x8b1   :  { %3061 = vmatprep.subr.bf16.mxu1 %v3451_v0 }
 0x8b2   :  { %3057 = vmatpush3.bf16.msra.mxu0 %v3635_v49 }
 0x8b3   :  { %3064 = vmatprep.subr.bf16.mxu0 %v3451_v0 }
 0x8b4   :  { %3063 = vmatpush3.bf16.msra.mxu1 %v3637_v50 }
 0x8b5   :  { %3070 = vmatprep.subr.bf16.mxu1 %v3451_v0 }
 0x97a   :  { %v1002_v37 = vpop.f32.mrb[8].mxu1 }
 0x97b   :  { %v2807_v38 = vpop.f32.mrb[9].mxu1 }
 0x980   :  { %v1077_v40 = vpop.f32.mrb[14].mxu0 }
 0x981   :  { %v1078_v42 = vadd.f32 %v1077_v40, %v1002_v37  ;;  %v2818_v44 = vpop.f32.mrb[15].mxu0 }
 0x982   :  { %v1174_v45 = vpop.f32.mrb[10].mxu1 }
 0x983   :  { %v1081_v35 = vadd.f32 %v3691_v6, %v1078_v42  ;;  %v1178_v46 = vadd.f32 %v1174_v45, %v228_v41  ;;  %v2829_v47 = vpop.f32.mrb[11].mxu1 }
 0x985   :  { %3191 = vtanh.f32 %v1081_v35  ;;  %v2542_v52 = vmul.f32 -1.442695, %v1081_v35  ;;  %v2544_v53 = vmul.f32 -1.442695, %v1178_v46 }
 0x986   :  { %3193 = vtanh.f32 %v1178_v46 }
 0x987   :  { %3195 = vpow2.f32 %v2542_v52 }
 0x988   :  { %3197 = vpow2.f32 %v2544_v53 }
 0x98f   :  { %v3192_v48 = vpop.eup %3191 }
 0x990   :  { %v3194_v51 = vpop.eup %3193  ;;  %1091 = vrot.lane.b32.xlu0 %v3192_v48, %s3454_s27 }
 0x991   :  { %1188 = vrot.lane.b32.xlu1 %v3194_v51, %s3454_s27  ;;  %v3196_v58 = vpop.eup %3195 }
 0x992   :  { %v3198_v54 = vpop.eup %3197  ;;  %v1085_v55 = vadd.f32 1.0, %v3196_v58 }
 0x993   :  { %v1182_v56 = vadd.f32 1.0, %v3198_v54 }
 0x994   :  { %3199 = vrcp.f32 %v1085_v55 }
 0x995   :  { %3201 = vrcp.f32 %v1182_v56 }
 0x99e   :  { %v3200_v57 = vpop.eup %3199 }
 0x99f   :  { %v3202_v2 = vpop.eup %3201  ;;  %v1089_v8 = vmul.f32 %v3200_v57, %v3739_v24 }
 0x9a0   :  { %v1186_v11 = vmul.f32 %v3202_v2, %v3743_v27 }
 0xa02   :  { %v1092_v62 = vpop.permute.xlu0 %1091 }
 0xa03   :  { %v1094_v4 = vmul.f32 %v3200_v57, %v1092_v62  ;;  %v1189_v5 = vpop.permute.xlu1 %1188 }
 0xa04   :  { %v1191_v7 = vmul.f32 %v3202_v2, %v1189_v5 }
 0xa05   :  { %1096 = vrot.lane.b32.xlu0 %v1094_v4, %s3454_s27 }
 0xa06   :  { %1193 = vrot.lane.b32.xlu1 %v1191_v7, %s3454_s27 }
 0xa77   :  { %v1097_v10 = vpop.permute.xlu0 %1096 }
 0xa78   :  { %v3780_v12 = vadd.f32 %v1097_v10, %v1089_v8  ;;  %v1194_v13 = vpop.permute.xlu1 %1193 }
 0xa79   :  { %v3782_v15 = vadd.f32 %v1194_v13, %v1186_v11 }
 0xa7a   :  { %3203 = vtanh.f32 %v3780_v12 }
 0xa7b   :  { %3205 = vtanh.f32 %v3782_v15 }
 0xa84   :  { %v3204_v59 = vpop.eup %3203 }
 0xa85   :  { %v3206_v16 = vpop.eup %3205  ;;  %1102 = vrot.lane.b32.xlu0 %v3204_v59, %s3454_s27  ;;  %v238_v59 = vadd.f32 %v3664_v60, %v3616_v17 }
 0xa86   :  { %1199 = vrot.lane.b32.xlu1 %v3206_v16, %s3454_s27 }
 0xaf7   :  { %v1103_v19 = vpop.permute.xlu0 %1102 }
 0xaf8   :  { %v1105_v18 = vmul.f32 %v3200_v57, %v1103_v19  ;;  %v1200_v20 = vpop.permute.xlu1 %1199 }
 0xaf9   :  { %v1202_v21 = vmul.f32 %v3202_v2, %v1200_v20 }
 0xafa   :  { %1204 = vrot.lane.b32.xlu0 %v1105_v18, %s3455_s17 }
 0xafb   :  { %1279 = vrot.lane.b32.xlu1 %v1202_v21, %s3455_s17 }
 0xb6c   :  { %v1205_v22 = vpop.permute.xlu0 %1204 }
 0xb6d   :  { %v1280_v23 = vpop.permute.xlu1 %1279  ;;  %2839 = vmatmul.mubr.msk.f32.vlgmr.msra.gmra.mrb[16].mxu0 %vm99_vm0, %v1205_v22 }
 0xb6e   :  { %2850 = vmatmul.mubr.msk.f32.vlgmr.msra.gmra.mrb[12].mxu1 %vm99_vm0, %v1280_v23  ;;  %3066 = vmatpush3.bf16.msra.mxu0 %v3599_v9 }
 0xb6f   :  { %3067 = vmatprep.subr.bf16.mxu0 %v3451_v0  ;;  %2860 = vmatprep.mubr.msk.f32.mxu0 %vm3452_vm1, %v3453_v1 }
 0xb70   :  { %3072 = vmatpush3.bf16.msra.mxu1 %v3629_v43  ;;  %2871 = vmatprep.mubr.msk.f32.mxu1 %vm3452_vm1, %v3453_v1 }
 0xb71   :  { %3073 = vmatprep.subr.bf16.mxu1 %v3451_v0 }
 0xb72   :  { %3069 = vmatpush3.bf16.msra.mxu0 %v3603_v14 }
 0xb73   :  { %3076 = vmatprep.subr.bf16.mxu0 %v3451_v0 }
 0xb74   :  { %3075 = vmatpush3.bf16.msra.mxu1 %v3635_v49 }
 0xb75   :  { %2861 = vmatmul.mubr.msk.f32.vlgmr.msra.gmra.mrb[18].mxu0 %vm99_vm0, %v1280_v23  ;;  %3082 = vmatprep.subr.bf16.mxu1 %v3451_v0 }
 0xb76   :  { %3078 = vmatpush3.bf16.msra.mxu0 %v3627_v39  ;;  %2882 = vmatprep.mubr.msk.f32.mxu0 %vm3452_vm1, %v3453_v1 }
 0xb77   :  { %3079 = vmatprep.subr.bf16.mxu0 %v3451_v0 }
 0xb7a   :  { %3081 = vmatpush3.bf16.msra.mxu0 %v3637_v50 }
 0xb7b   :  { %3088 = vmatprep.subr.bf16.mxu0 %v3451_v0 }
 0xc40   :  { %v1274_v24 = vpop.f32.mrb[16].mxu0 }
 0xc41   :  { %v1349_v25 = vpop.f32.mrb[12].mxu1  ;;  %v2840_v26 = vpop.f32.mrb[17].mxu0 }
 0xc42   :  { %v1350_v27 = vadd.f32 %v1349_v25, %v1274_v24  ;;  %v2851_v28 = vpop.f32.mrb[13].mxu1 }
 0xc44   :  { %v1353_v29 = vadd.f32 %v3691_v6, %v1350_v27 }
 0xc46   :  { %3207 = vtanh.f32 %v1353_v29  ;;  %v2547_v37 = vmul.f32 -1.442695, %v1353_v29 }
 0xc48   :  { %v1446_v31 = vpop.f32.mrb[18].mxu0 }
 0xc49   :  { %v1450_v32 = vadd.f32 %v1446_v31, %v233_v30  ;;  %v2862_v33 = vpop.f32.mrb[19].mxu0 }
 0xc4b   :  { %3209 = vtanh.f32 %v1450_v32  ;;  %v2549_v38 = vmul.f32 -1.442695, %v1450_v32 }
 0xc4c   :  { %3211 = vpow2.f32 %v2547_v37 }
 0xc4d   :  { %3213 = vpow2.f32 %v2549_v38 }
 0xc50   :  { %v3208_v34 = vpop.eup %3207 }
 0xc51   :  { %1363 = vrot.lane.b32.xlu0 %v3208_v34, %s3454_s27 }
 0xc55   :  { %v3210_v36 = vpop.eup %3209 }
 0xc56   :  { %1460 = vrot.lane.b32.xlu1 %v3210_v36, %s3454_s27  ;;  %v3212_v40 = vpop.eup %3211 }
 0xc57   :  { %v1357_v41 = vadd.f32 1.0, %v3212_v40  ;;  %v3214_v42 = vpop.eup %3213 }
 0xc58   :  { %v1454_v44 = vadd.f32 1.0, %v3214_v42 }
 0xc59   :  { %3215 = vrcp.f32 %v1357_v41 }
 0xc5a   :  { %3217 = vrcp.f32 %v1454_v44 }
 0xc63   :  { %v3216_v61 = vpop.eup %3215 }
 0xc64   :  { %v3218_v46 = vpop.eup %3217  ;;  %v1361_v51 = vmul.f32 %v3216_v61, %v3780_v12 }
 0xc65   :  { %v1458_v58 = vmul.f32 %v3218_v46, %v3782_v15 }
 0xcc3   :  { %v1364_v45 = vpop.permute.xlu0 %1363 }
 0xcc4   :  { %v1366_v35 = vmul.f32 %v3216_v61, %v1364_v45 }
 0xcc6   :  { %1368 = vrot.lane.b32.xlu0 %v1366_v35, %s3454_s27 }
 0xcc8   :  { %v1461_v47 = vpop.permute.xlu1 %1460 }
 0xcc9   :  { %v1463_v48 = vmul.f32 %v3218_v46, %v1461_v47 }
 0xccb   :  { %1465 = vrot.lane.b32.xlu1 %v1463_v48, %s3454_s27 }
 0xd38   :  { %v1369_v52 = vpop.permute.xlu0 %1368 }
 0xd39   :  { %v3819_v53 = vadd.f32 %v1369_v52, %v1361_v51 }
 0xd3b   :  { %3219 = vtanh.f32 %v3819_v53 }
 0xd3d   :  { %v1466_v54 = vpop.permute.xlu1 %1465 }
 0xd3e   :  { %v3823_v55 = vadd.f32 %v1466_v54, %v1458_v58 }
 0xd40   :  { %3221 = vtanh.f32 %v3823_v55 }
 0xd45   :  { %v3220_v56 = vpop.eup %3219 }
 0xd46   :  { %1374 = vrot.lane.b32.xlu0 %v3220_v56, %s3454_s27  ;;  %v243_v56 = vadd.f32 %v3616_v17, %v3670_v3 }
 0xd4a   :  { %v3222_v57 = vpop.eup %3221 }
 0xd4b   :  { %1471 = vrot.lane.b32.xlu1 %v3222_v57, %s3454_s27 }
 0xdb8   :  { %v1375_v62 = vpop.permute.xlu0 %1374 }
 0xdb9   :  { %v1377_v2 = vmul.f32 %v3216_v61, %v1375_v62 }
 0xdbb   :  { %1476 = vrot.lane.b32.xlu0 %v1377_v2, %s3455_s17 }
 0xdbd   :  { %v1472_v4 = vpop.permute.xlu1 %1471 }
 0xdbe   :  { %v1474_v5 = vmul.f32 %v3218_v46, %v1472_v4 }
 0xdc0   :  { %1551 = vrot.lane.b32.xlu1 %v1474_v5, %s3455_s17 }
 0xe2d   :  { %v1477_v7 = vpop.permute.xlu0 %1476 }
 0xe2e   :  { %2872 = vmatmul.mubr.msk.f32.vlgmr.msra.gmra.mrb[14].mxu1 %vm99_vm0, %v1477_v7 }
 0xe2f   :  { %3084 = vmatpush3.bf16.msra.mxu1 %v3599_v9  ;;  %2893 = vmatprep.mubr.msk.f32.mxu1 %vm3452_vm1, %v3453_v1 }
 0xe30   :  { %3085 = vmatprep.subr.bf16.mxu1 %v3451_v0 }
 0xe32   :  { %v1552_v8 = vpop.permute.xlu1 %1551 }
 0xe33   :  { %3087 = vmatpush3.bf16.msra.mxu1 %v3603_v14  ;;  %2883 = vmatmul.mubr.msk.f32.vlgmr.msra.gmra.mrb[20].mxu0 %vm99_vm0, %v1552_v8 }
 0xe34   :  { %3090 = vmatpush3.bf16.msra.mxu0 %v3629_v43  ;;  %3094 = vmatprep.subr.bf16.mxu1 %v3451_v0 }
 0xe35   :  { %3091 = vmatprep.subr.bf16.mxu0 %v3451_v0  ;;  %2904 = vmatprep.mubr.msk.f32.mxu0 %vm3452_vm1, %v3453_v1 }
 0xe36   :  { %2894 = vmatmul.mubr.msk.f32.vlgmr.msra.gmra.mrb[16].mxu1 %vm99_vm0, %v1552_v8 }
 0xe37   :  { %3096 = vmatpush3.bf16.msra.mxu1 %v3627_v39  ;;  %2915 = vmatprep.mubr.msk.f32.mxu1 %vm3452_vm1, %v3453_v1 }
 0xe38   :  { %3093 = vmatpush3.bf16.msra.mxu0 %v3635_v49  ;;  %3097 = vmatprep.subr.bf16.mxu1 %v3451_v0 }
 0xe39   :  { %3100 = vmatprep.subr.bf16.mxu0 %v3451_v0 }
 0xe3b   :  { %3099 = vmatpush3.bf16.msra.mxu1 %v3637_v50 }
 0xe3c   :  { %3106 = vmatprep.subr.bf16.mxu1 %v3451_v0 }
 0xf01   :  { %v1546_v10 = vpop.f32.mrb[14].mxu1 }
 0xf02   :  { %v2873_v11 = vpop.f32.mrb[15].mxu1 }
 0xf06   :  { %v1621_v12 = vpop.f32.mrb[20].mxu0 }
 0xf07   :  { %v1622_v13 = vadd.f32 %v1621_v12, %v1546_v10  ;;  %v2884_v15 = vpop.f32.mrb[21].mxu0 }
 0xf09   :  { %v1625_v16 = vadd.f32 %v3691_v6, %v1622_v13  ;;  %v1718_v19 = vpop.f32.mrb[16].mxu1 }
 0xf0a   :  { %v1722_v18 = vadd.f32 %v1718_v19, %v238_v59  ;;  %v2895_v20 = vpop.f32.mrb[17].mxu1 }
 0xf0b   :  { %3223 = vtanh.f32 %v1625_v16  ;;  %v2552_v23 = vmul.f32 -1.442695, %v1625_v16 }
 0xf0c   :  { %3225 = vtanh.f32 %v1722_v18  ;;  %v2554_v24 = vmul.f32 -1.442695, %v1722_v18 }
 0xf0d   :  { %3227 = vpow2.f32 %v2552_v23 }
 0xf0e   :  { %3229 = vpow2.f32 %v2554_v24 }
 0xf15   :  { %v3224_v21 = vpop.eup %3223 }
 0xf16   :  { %v3226_v22 = vpop.eup %3225  ;;  %1635 = vrot.lane.b32.xlu0 %v3224_v21, %s3454_s27 }
 0xf17   :  { %1732 = vrot.lane.b32.xlu1 %v3226_v22, %s3454_s27  ;;  %v3228_v25 = vpop.eup %3227 }
 0xf18   :  { %v3230_v26 = vpop.eup %3229  ;;  %v1629_v60 = vadd.f32 1.0, %v3228_v25 }
 0xf19   :  { %v1726_v27 = vadd.f32 1.0, %v3230_v26 }
 0xf1a   :  { %3231 = vrcp.f32 %v1629_v60 }
 0xf1b   :  { %3233 = vrcp.f32 %v1726_v27 }
 0xf24   :  { %v3232_v28 = vpop.eup %3231 }
 0xf25   :  { %v3234_v30 = vpop.eup %3233  ;;  %v1633_v34 = vmul.f32 %v3232_v28, %v3819_v53 }
 0xf26   :  { %v1730_v37 = vmul.f32 %v3234_v30, %v3823_v55 }
 0xf88   :  { %v1636_v29 = vpop.permute.xlu0 %1635 }
 0xf89   :  { %v1638_v31 = vmul.f32 %v3232_v28, %v1636_v29  ;;  %v1733_v32 = vpop.permute.xlu1 %1732 }
 0xf8a   :  { %v1735_v33 = vmul.f32 %v3234_v30, %v1733_v32 }
 0xf8b   :  { %1640 = vrot.lane.b32.xlu0 %v1638_v31, %s3454_s27 }
 0xf8c   :  { %1737 = vrot.lane.b32.xlu1 %v1735_v33, %s3454_s27 }
 0xffd   :  { %v1641_v36 = vpop.permute.xlu0 %1640 }
 0xffe   :  { %v3860_v38 = vadd.f32 %v1641_v36, %v1633_v34  ;;  %v1738_v40 = vpop.permute.xlu1 %1737  ;;  %v3279_v34 = vld [vmem:[%s3990_s5] ss:$0 sm:$0xff]  ;;  %s3456_s5 = smov 96  }
 0xfff   :  { %v3862_v41 = vadd.f32 %v1738_v40, %v1730_v37 }
0x1000   :  { %3235 = vtanh.f32 %v3860_v38 }
0x1001   :  { %3237 = vtanh.f32 %v3862_v41 }
0x100a   :  { %v3236_v42 = vpop.eup %3235 }
0x100b   :  { %v3238_v44 = vpop.eup %3237  ;;  %1646 = vrot.lane.b32.xlu0 %v3236_v42, %s3454_s27 }
0x100c   :  { %1743 = vrot.lane.b32.xlu1 %v3238_v44, %s3454_s27 }
0x107d   :  { %v1647_v61 = vpop.permute.xlu0 %1646 }
0x107e   :  { %v1649_v45 = vmul.f32 %v3232_v28, %v1647_v61  ;;  %v1744_v35 = vpop.permute.xlu1 %1743 }
0x107f   :  { %v1746_v46 = vmul.f32 %v3234_v30, %v1744_v35 }
0x1080   :  { %1748 = vrot.lane.b32.xlu0 %v1649_v45, %s3455_s17 }
0x1081   :  { %1823 = vrot.lane.b32.xlu1 %v1746_v46, %s3455_s17 }
0x10f2   :  { %v1749_v47 = vpop.permute.xlu0 %1748 }
0x10f3   :  { %v1824_v48 = vpop.permute.xlu1 %1823  ;;  %2905 = vmatmul.mubr.msk.f32.vlgmr.msra.gmra.mrb[22].mxu0 %vm99_vm0, %v1749_v47 }
0x10f4   :  { %2916 = vmatmul.mubr.msk.f32.vlgmr.msra.gmra.mrb[18].mxu1 %vm99_vm0, %v1824_v48  ;;  %3102 = vmatpush3.bf16.msra.mxu0 %v3599_v9 }
0x10f5   :  { %3103 = vmatprep.subr.bf16.mxu0 %v3451_v0  ;;  %2926 = vmatprep.mubr.msk.f32.mxu0 %vm3452_vm1, %v3453_v1 }
0x10f6   :  { %3108 = vmatpush3.bf16.msra.mxu1 %v3629_v43  ;;  %2937 = vmatprep.mubr.msk.f32.mxu1 %vm3452_vm1, %v3453_v1 }
0x10f7   :  { %3109 = vmatprep.subr.bf16.mxu1 %v3451_v0 }
0x10f8   :  { %3105 = vmatpush3.bf16.msra.mxu0 %v3603_v14 }
0x10f9   :  { %3112 = vmatprep.subr.bf16.mxu0 %v3451_v0 }
0x10fa   :  { %3111 = vmatpush3.bf16.msra.mxu1 %v3635_v49 }
0x10fb   :  { %2927 = vmatmul.mubr.msk.f32.vlgmr.msra.gmra.mrb[24].mxu0 %vm99_vm0, %v1824_v48  ;;  %3118 = vmatprep.subr.bf16.mxu1 %v3451_v0 }
0x10fc   :  { %3114 = vmatpush3.bf16.msra.mxu0 %v3627_v39  ;;  %2948 = vmatprep.mubr.msk.f32.mxu0 %vm3452_vm1, %v3453_v1 }
0x10fd   :  { %3115 = vmatprep.subr.bf16.mxu0 %v3451_v0 }
0x1100   :  { %3117 = vmatpush3.bf16.msra.mxu0 %v3637_v50 }
0x1101   :  { %3124 = vmatprep.subr.bf16.mxu0 %v3451_v0 }
0x11c6   :  { %v1818_v51 = vpop.f32.mrb[22].mxu0 }
0x11c7   :  { %v1893_v52 = vpop.f32.mrb[18].mxu1  ;;  %v2906_v53 = vpop.f32.mrb[23].mxu0 }
0x11c8   :  { %v1894_v58 = vadd.f32 %v1893_v52, %v1818_v51  ;;  %v2917_v54 = vpop.f32.mrb[19].mxu1 }
0x11ca   :  { %v1897_v55 = vadd.f32 %v3691_v6, %v1894_v58 }
0x11cc   :  { %3239 = vtanh.f32 %v1897_v55  ;;  %v2557_v7 = vmul.f32 -1.442695, %v1897_v55 }
0x11ce   :  { %v1990_v57 = vpop.f32.mrb[24].mxu0 }
0x11cf   :  { %v1994_v62 = vadd.f32 %v1990_v57, %v243_v56  ;;  %v2928_v2 = vpop.f32.mrb[25].mxu0 }
0x11d1   :  { %3241 = vtanh.f32 %v1994_v62  ;;  %v2559_v8 = vmul.f32 -1.442695, %v1994_v62 }
0x11d2   :  { %3243 = vpow2.f32 %v2557_v7 }
0x11d3   :  { %3245 = vpow2.f32 %v2559_v8 }
0x11d6   :  { %v3240_v4 = vpop.eup %3239 }
0x11d7   :  { %1907 = vrot.lane.b32.xlu0 %v3240_v4, %s3454_s27 }
0x11db   :  { %v3242_v5 = vpop.eup %3241 }
0x11dc   :  { %2004 = vrot.lane.b32.xlu1 %v3242_v5, %s3454_s27  ;;  %v3244_v10 = vpop.eup %3243 }
0x11dd   :  { %v1901_v11 = vadd.f32 1.0, %v3244_v10  ;;  %v3246_v12 = vpop.eup %3245 }
0x11de   :  { %v1998_v13 = vadd.f32 1.0, %v3246_v12 }
0x11df   :  { %3247 = vrcp.f32 %v1901_v11 }
0x11e0   :  { %3249 = vrcp.f32 %v1998_v13 }
0x11e9   :  { %v3248_v17 = vpop.eup %3247 }
0x11ea   :  { %v3250_v59 = vpop.eup %3249  ;;  %v1905_v18 = vmul.f32 %v3248_v17, %v3860_v38 }
0x11eb   :  { %v2002_v22 = vmul.f32 %v3250_v59, %v3862_v41 }
0x1249   :  { %v1908_v3 = vpop.permute.xlu0 %1907 }
0x124a   :  { %v1910_v15 = vmul.f32 %v3248_v17, %v1908_v3 }
0x124c   :  { %1912 = vrot.lane.b32.xlu0 %v1910_v15, %s3454_s27 }
0x124e   :  { %v2005_v16 = vpop.permute.xlu1 %2004 }
0x124f   :  { %v2007_v19 = vmul.f32 %v3250_v59, %v2005_v16 }
0x1251   :  { %2009 = vrot.lane.b32.xlu1 %v2007_v19, %s3454_s27 }
0x12be   :  { %v1913_v20 = vpop.permute.xlu0 %1912 }
0x12bf   :  { %v3899_v21 = vadd.f32 %v1913_v20, %v1905_v18 }
0x12c1   :  { %3251 = vtanh.f32 %v3899_v21 }
0x12c3   :  { %v2010_v23 = vpop.permute.xlu1 %2009 }
0x12c4   :  { %v3903_v24 = vadd.f32 %v2010_v23, %v2002_v22 }
0x12c6   :  { %3253 = vtanh.f32 %v3903_v24 }
0x12cb   :  { %v3252_v25 = vpop.eup %3251 }
0x12cc   :  { %1918 = vrot.lane.b32.xlu0 %v3252_v25, %s3454_s27 }
0x12d0   :  { %v3254_v26 = vpop.eup %3253 }
0x12d1   :  { %2015 = vrot.lane.b32.xlu1 %v3254_v26, %s3454_s27 }
0x133e   :  { %v1919_v60 = vpop.permute.xlu0 %1918 }
0x133f   :  { %v1921_v27 = vmul.f32 %v3248_v17, %v1919_v60 }
0x1341   :  { %2020 = vrot.lane.b32.xlu0 %v1921_v27, %s3455_s17 }
0x1343   :  { %v2016_v28 = vpop.permute.xlu1 %2015 }
0x1344   :  { %v2018_v29 = vmul.f32 %v3250_v59, %v2016_v28 }
0x1346   :  { %2095 = vrot.lane.b32.xlu1 %v2018_v29, %s3455_s17 }
0x13b3   :  { %v2021_v30 = vpop.permute.xlu0 %2020 }
0x13b4   :  { %2938 = vmatmul.mubr.msk.f32.vlgmr.msra.gmra.mrb[20].mxu1 %vm99_vm0, %v2021_v30 }
0x13b5   :  { %3120 = vmatpush3.bf16.msra.mxu1 %v3599_v9  ;;  %2959 = vmatprep.mubr.msk.f32.mxu1 %vm3452_vm1, %v3453_v1 }
0x13b6   :  { %3121 = vmatprep.subr.bf16.mxu1 %v3451_v0 }
0x13b8   :  { %v2096_v31 = vpop.permute.xlu1 %2095 }
0x13b9   :  { %3123 = vmatpush3.bf16.msra.mxu1 %v3603_v14  ;;  %2949 = vmatmul.mubr.msk.f32.vlgmr.msra.gmra.mrb[26].mxu0 %vm99_vm0, %v2096_v31 }
0x13ba   :  { %3130 = vmatprep.subr.bf16.mxu1 %v3451_v0  ;;  %3126 = vmatpush3.bf16.msra.mxu0 %v3629_v43 }
0x13bb   :  { %3127 = vmatprep.subr.bf16.mxu0 %v3451_v0  ;;  %2970 = vmatprep.mubr.msk.f32.mxu0 %vm3452_vm1, %v3453_v1 }
0x13bc   :  { %2960 = vmatmul.mubr.msk.f32.vlgmr.msra.gmra.mrb[22].mxu1 %vm99_vm0, %v2096_v31 }
0x13bd   :  { %3132 = vmatpush3.bf16.msra.mxu1 %v3627_v39  ;;  %2981 = vmatprep.mubr.msk.f32.mxu1 %vm3452_vm1, %v3453_v1  ;;  %v248_v39 = vadd.f32 %v3279_v34, %v3668_v63 }
0x13be   :  { %3133 = vmatprep.subr.bf16.mxu1 %v3451_v0  ;;  %3129 = vmatpush3.bf16.msra.mxu0 %v3635_v49 }
0x13c1   :  { %3135 = vmatpush3.bf16.msra.mxu1 %v3637_v50 }
0x1487   :  { %v2090_v9 = vpop.f32.mrb[20].mxu1 }
0x1488   :  { %v2939_v14 = vpop.f32.mrb[21].mxu1 }
0x148c   :  { %v2165_v43 = vpop.f32.mrb[26].mxu0 }
0x148d   :  { %v2166_v32 = vadd.f32 %v2165_v43, %v2090_v9  ;;  %v2950_v33 = vpop.f32.mrb[27].mxu0 }
0x148f   :  { %v2169_v36 = vadd.f32 %v3691_v6, %v2166_v32  ;;  %v2262_v1 = vpop.f32.mrb[22].mxu1 }
0x1490   :  { %v2266_v37 = vadd.f32 %v2262_v1, %v248_v39  ;;  %v2961_v0 = vpop.f32.mrb[23].mxu1 }
0x1491   :  { %3255 = vtanh.f32 %v2169_v36  ;;  %v2562_v38 = vmul.f32 -1.442695, %v2169_v36 }
0x1492   :  { %3257 = vtanh.f32 %v2266_v37  ;;  %v2564_v40 = vmul.f32 -1.442695, %v2266_v37 }
0x1493   :  { %3259 = vpow2.f32 %v2562_v38 }
0x1494   :  { %3261 = vpow2.f32 %v2564_v40 }
0x149b   :  { %v3256_v49 = vpop.eup %3255 }
0x149c   :  { %v3258_v50 = vpop.eup %3257  ;;  %2179 = vrot.lane.b32.xlu0 %v3256_v49, %s3454_s27 }
0x149d   :  { %2276 = vrot.lane.b32.xlu1 %v3258_v50, %s3454_s27  ;;  %v3260_v41 = vpop.eup %3259 }
0x149e   :  { %v3262_v42 = vpop.eup %3261  ;;  %v2173_v63 = vadd.f32 1.0, %v3260_v41 }
0x149f   :  { %v2270_v44 = vadd.f32 1.0, %v3262_v42 }
0x14a0   :  { %3263 = vrcp.f32 %v2173_v63 }
0x14a1   :  { %3265 = vrcp.f32 %v2270_v44 }
0x14aa   :  { %v3264_v61 = vpop.eup %3263 }
0x14ab   :  { %v3266_v35 = vpop.eup %3265  ;;  %v2177_v51 = vmul.f32 %v3264_v61, %v3899_v21 }
0x14ac   :  { %v2274_v53 = vmul.f32 %v3266_v35, %v3903_v24 }
0x150e   :  { %v2180_v45 = vpop.permute.xlu0 %2179 }
0x150f   :  { %v2182_v46 = vmul.f32 %v3264_v61, %v2180_v45  ;;  %v2277_v47 = vpop.permute.xlu1 %2276 }
0x1510   :  { %v2279_v48 = vmul.f32 %v3266_v35, %v2277_v47 }
0x1511   :  { %2184 = vrot.lane.b32.xlu0 %v2182_v46, %s3454_s27 }
0x1512   :  { %2281 = vrot.lane.b32.xlu1 %v2279_v48, %s3454_s27 }
0x1583   :  { %v2185_v52 = vpop.permute.xlu0 %2184 }
0x1584   :  { %v2187_v58 = vadd.f32 %v2185_v52, %v2177_v51  ;;  %v2282_v54 = vpop.permute.xlu1 %2281 }
0x1585   :  { %v2284_v55 = vadd.f32 %v2282_v54, %v2274_v53 }
0x1586   :  { %3267 = vtanh.f32 %v2187_v58 }
0x1587   :  { %3269 = vtanh.f32 %v2284_v55 }
0x1590   :  { %v3268_v56 = vpop.eup %3267 }
0x1591   :  { %v3270_v57 = vpop.eup %3269  ;;  %2190 = vrot.lane.b32.xlu0 %v3268_v56, %s3454_s27 }
0x1592   :  { %2287 = vrot.lane.b32.xlu1 %v3270_v57, %s3454_s27 }
0x1603   :  { %v2191_v62 = vpop.permute.xlu0 %2190 }
0x1604   :  { %v2193_v2 = vmul.f32 %v3264_v61, %v2191_v62  ;;  %v2288_v4 = vpop.permute.xlu1 %2287 }
0x1605   :  { %v2290_v5 = vmul.f32 %v3266_v35, %v2288_v4 }
0x1606   :  { %2292 = vrot.lane.b32.xlu0 %v2193_v2, %s3455_s17 }
0x1607   :  { %2367 = vrot.lane.b32.xlu1 %v2290_v5, %s3455_s17 }
0x1678   :  { %v2293_v7 = vpop.permute.xlu0 %2292 }
0x1679   :  { %v2368_v8 = vpop.permute.xlu1 %2367  ;;  %2971 = vmatmul.mubr.msk.f32.vlgmr.msra.gmra.mrb[28].mxu0 %vm99_vm0, %v2293_v7 }
0x167a   :  { %2467 = vst.msk [vmem:[#allocation12] sm:$0xff] %vm99_vm0, %v2368_v8  ;;  %2982 = vmatmul.mubr.msk.f32.vlgmr.msra.gmra.mrb[24].mxu1 %vm99_vm0, %v2368_v8 }
0x174c   :  { %v2362_v10 = vpop.f32.mrb[28].mxu0 }
0x174d   :  { %v2437_v11 = vpop.f32.mrb[24].mxu1  ;;  %v2972_v12 = vpop.f32.mrb[29].mxu0 }
0x174e   :  { %v2438_v13 = vadd.f32 %v2437_v11, %v2362_v10  ;;  %v2983_v17 = vpop.f32.mrb[25].mxu1 }
0x1750   :  { %v2441_v3 = vadd.f32 %v3691_v6, %v2438_v13 }
0x1752   :  { %3271 = vtanh.f32 %v2441_v3  ;;  %v2567_v59 = vmul.f32 -1.442695, %v2441_v3 }
0x1754   :  { %3273 = vpow2.f32 %v2567_v59 }
0x175c   :  { %v3272_v15 = vpop.eup %3271 }
0x175d   :  { %2451 = vrot.lane.b32.xlu0 %v3272_v15, %s3454_s27 }
0x175e   :  { %v3274_v16 = vpop.eup %3273 }
0x175f   :  { %v2445_v19 = vadd.f32 1.0, %v3274_v16 }
0x1761   :  { %3275 = vrcp.f32 %v2445_v19 }
0x176b   :  { %v3276_v18 = vpop.eup %3275 }
0x176c   :  { %v2449_v22 = vmul.f32 %v3276_v18, %v2187_v58 }
0x17cf   :  { %v2452_v20 = vpop.permute.xlu0 %2451 }
0x17d0   :  { %v2454_v21 = vmul.f32 %v3276_v18, %v2452_v20 }
0x17d2   :  { %2456 = vrot.lane.b32.xlu1 %v2454_v21, %s3454_s27 }
0x17d6   :  { %2469 = vrot.lane.b32.xlu1 %v2284_v55, %s3456_s5 }
0x1844   :  { %v2457_v23 = vpop.permute.xlu1 %2456 }
0x1845   :  { %v2459_v24 = vadd.f32 %v2457_v23, %v2449_v22 }
0x1847   :  { %3277 = vtanh.f32 %v2459_v24  ;;  %2479 = vrot.lane.b32.xlu1 %v2459_v24, %s3456_s5 }
0x1848   :  { %v2470_v6 = vpop.permute.xlu1 %2469 }
0x1849   :  { %2472 = vst.msk [vmem:[#allocation13] sm:$0xff] %vm99_vm0, %v2470_v6 }
0x1851   :  { %v3278_v25 = vpop.eup %3277 }
0x1852   :  { %2462 = vrot.lane.b32.xlu0 %v3278_v25, %s3454_s27 }
0x18b9   :  { %v2480_v26 = vpop.permute.xlu1 %2479 }
0x18ba   :  { %2482 = vst.msk [vmem:[#allocation13 + $0x8] sm:$0xff] %vm99_vm0, %v2480_v26 }
0x18bb   :  { %3401 = shalt.err (!%p3398_p2)
}
0x18bc   :  { %s3402_s25 = scalar_lea.hbm %s3992_s7, 256 }
0x18bd   :  { %p3403_p3 = scmp.ne.s32.totalorder %s3992_s7, %s3402_s25  ;;  %p3406_p4 = scmp.lt.u32.totalorder %s3402_s25, %s3992_s7 }
0x18bf   :  { %p3408_p5 = pnand %p3406_p4, %p3403_p3 }
0x18c1   :  { %3411 = shalt.err (!%p3408_p5)
}
0x18c2   :  { %2506 = dma.vmem_to_hbm [thread:$0]  %s2501_s23, 256, %s3992_s7, [#allocation14], %s3446_s13, %s3446_s13, %s3447_s14  }
0x18c3   :  { %s3458_s11 = smov [#allocation12]  }
0x18c4   :  { %v2463_v60 = vpop.permute.xlu0 %2462  ;;  %s2488_s12 = sshll.u32 %s3458_s11, 4  ;;  %s2489_s12 = int_to_ptr.vmem [resolvable:$true] %s2488_s12 }
0x18c5   :  { %v2465_v27 = vmul.f32 %v3276_v18, %v2463_v60  ;;  %s3412_s15 = scalar_lea.vmem %s2489_s12, 256  ;;  %p3417_p7 = scmp.lt.s32.totalorder %s2489_s12, %s2489_s12 }
0x18c6   :  { %p3413_p6 = scmp.ne.s32.totalorder %s2489_s12, %s3412_s15  ;;  %p3418_p8 = scmp.lt.s32.totalorder %s3412_s15, %s3412_s15 }
0x18c7   :  { %2474 = vrot.lane.b32.xlu0 %v2465_v27, %s3455_s17 }
0x18c8   :  { %p3419_p9 = por %p3418_p8, %p3417_p7 }
0x18ca   :  { %p3420_p10 = pnand %p3419_p9, %p3413_p6 }
0x1939   :  { %v2475_v28 = vpop.permute.xlu0 %2474 }
0x193a   :  { %2477 = vst.msk [vmem:[#allocation12 + $0x8] sm:$0xff] %vm99_vm0, %v2475_v28 }
0x193b   :  { %3423 = shalt.err (!%p3420_p10)
}
0x193c   :  { %s3424_s7 = scalar_lea.hbm %s3991_s6, 256 }
0x193d   :  { %p3425_p11 = scmp.ne.s32.totalorder %s3991_s6, %s3424_s7  ;;  %p3428_p12 = scmp.lt.u32.totalorder %s3424_s7, %s3991_s6 }
0x193f   :  { %p3430_p13 = pnand %p3428_p12, %p3425_p11 }
0x1941   :  { %3433 = shalt.err (!%p3430_p13)
}
0x1942   :  { %2494 = dma.vmem_to_hbm [thread:$0]  %s2489_s12, 256, %s3991_s6, [#allocation5], %s3446_s13, %s3446_s13, %s3447_s14  }
0x1943   :  { %3440 = dma.done.wait [#allocation5], 256  }
0x1944   :  { %3441 = vsyncadd [#allocation5], 4294967040 }
0x1945   :  { %3442 = dma.done.wait [#allocation14], 256  }
0x1946   :  { %3443 = vsyncadd [#allocation14], 4294967040 }
0x1947   :  { %2513 = vsyncpa [#allocation4], 1 }
0x1948   :  { %2514 = vsyncpa [#allocation7], 1 }
0x1949   :  { %2515 = vsyncpa [#allocation10], 1 }
0x194a   :  { %2516 = vsyncpa [#allocation5], 1 }
0x194b   :  { %2517 = vsyncpa [#allocation14], 1 }

// kernel: tpu_custom_call.1
= control target key start
LH: loop header
LB: loop body
LE: loop exit
PB: predicated region body
PF: predicated region fallthrough
CT: control target
= control target key end

     0   :  { %13 = vsyncpa [#allocation4], 0  ;;  %s3985_s0 = inlined_call_operand.hbm [shape: f32[8,8,32], index: 0, kind: input, shape index: {}]   ;;  %s3986_s1 = inlined_call_operand.hbm [shape: f32[32,128], index: 1, kind: input, shape index: {}]   ;;  %s3987_s2 = inlined_call_operand.hbm [shape: f32[32,128], index: 2, kind: input, shape index: {}]   ;;  %s3988_s3 = inlined_call_operand.hbm [shape: f32[1,32,128], index: 3, kind: input, shape index: {}]   ;;  %s3989_s4 = inlined_call_operand.hbm [shape: f32[1,32,128], index: 4, kind: input, shape index: {}]   ;;  %s3990_s5 = inlined_call_operand.vmem [shape: f32[2,128], index: 5, kind: input, shape index: {}]   ;;  %s3991_s6 = inlined_call_operand.hbm [shape: f32[2,8,32], index: 6, kind: output, shape index: {0}]   ;;  %s3992_s7 = inlined_call_operand.hbm [shape: f32[2,8,32], index: 7, kind: output, shape index: {1}]  }
   0x1   :  { %14 = vsyncpa [#allocation7], 0 }
   0x2   :  { %15 = vsyncpa [#allocation10], 0 }
   0x3   :  { %16 = vsyncpa [#allocation5], 0 }
   0x4   :  { %17 = vsyncpa [#allocation14], 0  ;;  %s3444_s24 = smov [#allocation6]   ;;  %s3445_s26 = smov [#allocation9]  }
   0x5   :  { %s35_s25 = sshll.u32 %s3444_s24, 4  ;;  %s59_s27 = sshll.u32 %s3445_s26, 4  ;;  %s36_s25 = int_to_ptr.vmem [resolvable:$true] %s35_s25  ;;  %s3499_s27 = int_to_ptr.vmem [resolvable:$true] %s59_s27 }
   0x6   :  { %s3280_s30 = scalar_lea.hbm %s3986_s1, 512 }
   0x7   :  { %p3281_p0 = scmp.ne.s32.totalorder %s3986_s1, %s3280_s30  ;;  %p3284_p1 = scmp.lt.u32.totalorder %s3280_s30, %s3986_s1 }
   0x9   :  { %p3286_p2 = pnand %p3284_p1, %p3281_p0 }
   0xb   :  { %3289 = shalt.err (!%p3286_p2)
}
   0xc   :  { %s3290_s12 = scalar_lea.vmem %s36_s25, 512  ;;  %p3295_p4 = scmp.lt.s32.totalorder %s36_s25, %s36_s25 }
   0xd   :  { %p3291_p3 = scmp.ne.s32.totalorder %s36_s25, %s3290_s12  ;;  %p3296_p5 = scmp.lt.s32.totalorder %s3290_s12, %s3290_s12 }
   0xf   :  { %p3297_p6 = por %p3296_p5, %p3295_p4 }
  0x11   :  { %p3298_p7 = pnand %p3297_p6, %p3291_p3 }
  0x13   :  { %3301 = shalt.err (!%p3298_p7)
}
  0x14   :  { %s3446_s13 = smov 128   ;;  %s3447_s14 = smov 8  }
  0x15   :  { %41 = dma.hbm_to_vmem [thread:$0]  %s3986_s1, 512, %s36_s25, [#allocation7], %s3446_s13, %s3446_s13, %s3447_s14  }
  0x16   :  { %s3302_s19 = scalar_lea.hbm %s3988_s3, 512 }
  0x17   :  { %p3303_p8 = scmp.ne.s32.totalorder %s3988_s3, %s3302_s19  ;;  %p3306_p9 = scmp.lt.u32.totalorder %s3302_s19, %s3988_s3 }
  0x19   :  { %p3308_p10 = pnand %p3306_p9, %p3303_p8 }
  0x1b   :  { %3311 = shalt.err (!%p3308_p10)
}
  0x1c   :  { %s3312_s24 = scalar_lea.vmem %s3499_s27, 512  ;;  %p3317_p12 = scmp.lt.s32.totalorder %s3499_s27, %s3499_s27 }
  0x1d   :  { %p3313_p11 = scmp.ne.s32.totalorder %s3499_s27, %s3312_s24  ;;  %p3318_p13 = scmp.lt.s32.totalorder %s3312_s24, %s3312_s24 }
  0x1f   :  { %p3319_p0 = por %p3318_p13, %p3317_p12 }
  0x21   :  { %p3320_p1 = pnand %p3319_p0, %p3313_p11 }
  0x23   :  { %3323 = shalt.err (!%p3320_p1)
}
  0x24   :  { %65 = dma.hbm_to_vmem [thread:$0]  %s3988_s3, 512, %s3499_s27, [#allocation10], %s3446_s13, %s3446_s13, %s3447_s14  }
  0x25   :  { %s3448_s26 = smov [#allocation3]   ;;  %s3449_s29 = smov [#allocation8]  }
  0x26   :  { %s23_s28 = sshll.u32 %s3448_s26, 4  ;;  %s47_s30 = sshll.u32 %s3449_s29, 4  ;;  %s24_s28 = int_to_ptr.vmem [resolvable:$true] %s23_s28  ;;  %s3536_s30 = int_to_ptr.vmem [resolvable:$true] %s47_s30 }
  0x27   :  { %s3324_s10 = scalar_lea.hbm %s3985_s0, 1024 }
  0x28   :  { %p3325_p2 = scmp.ne.s32.totalorder %s3985_s0, %s3324_s10  ;;  %p3328_p3 = scmp.lt.u32.totalorder %s3324_s10, %s3985_s0 }
  0x2a   :  { %p3330_p4 = pnand %p3328_p3, %p3325_p2 }
  0x2c   :  { %3333 = shalt.err (!%p3330_p4)
}
  0x2d   :  { %s3334_s3 = scalar_lea.vmem %s24_s28, 1024  ;;  %p3339_p6 = scmp.lt.s32.totalorder %s24_s28, %s24_s28 }
  0x2e   :  { %p3335_p5 = scmp.ne.s32.totalorder %s24_s28, %s3334_s3  ;;  %p3340_p7 = scmp.lt.s32.totalorder %s3334_s3, %s3334_s3 }
  0x30   :  { %p3341_p8 = por %p3340_p7, %p3339_p6 }
  0x32   :  { %p3342_p9 = pnand %p3341_p8, %p3335_p5 }
  0x34   :  { %3345 = shalt.err (!%p3342_p9)
}
  0x35   :  { %29 = dma.hbm_to_vmem [thread:$0]  %s3985_s0, 1024, %s24_s28, [#allocation4], %s3446_s13, %s3446_s13, %s3447_s14  }
  0x36   :  { %s3346_s20 = scalar_lea.hbm %s3987_s2, 512 }
  0x37   :  { %p3347_p10 = scmp.ne.s32.totalorder %s3987_s2, %s3346_s20  ;;  %p3350_p11 = scmp.lt.u32.totalorder %s3346_s20, %s3987_s2 }
  0x39   :  { %p3352_p12 = pnand %p3350_p11, %p3347_p10 }
  0x3b   :  { %3355 = shalt.err (!%p3352_p12)
}
  0x3c   :  { %s3356_s1 = scalar_lea.vmem %s3536_s30, 512  ;;  %p3361_p0 = scmp.lt.s32.totalorder %s3536_s30, %s3536_s30 }
  0x3d   :  { %p3357_p13 = scmp.ne.s32.totalorder %s3536_s30, %s3356_s1  ;;  %p3362_p1 = scmp.lt.s32.totalorder %s3356_s1, %s3356_s1 }
  0x3f   :  { %p3363_p2 = por %p3362_p1, %p3361_p0 }
  0x41   :  { %p3364_p3 = pnand %p3363_p2, %p3357_p13 }
  0x43   :  { %3367 = shalt.err (!%p3364_p3)
}
  0x44   :  { %53 = dma.hbm_to_vmem [thread:$0]  %s3987_s2, 512, %s3536_s30, [#allocation7], %s3446_s13, %s3446_s13, %s3447_s14  }
  0x45   :  { %s3450_s26 = smov [#allocation11]   ;;  %s3368_s9 = scalar_lea.hbm %s3989_s4, 512 }
  0x46   :  { %s71_s28 = sshll.u32 %s3450_s26, 4  ;;  %p3369_p4 = scmp.ne.s32.totalorder %s3989_s4, %s3368_s9  ;;  %s72_s28 = int_to_ptr.vmem [resolvable:$true] %s71_s28 }
  0x47   :  { %p3372_p5 = scmp.lt.u32.totalorder %s3368_s9, %s3989_s4 }
  0x49   :  { %p3374_p6 = pnand %p3372_p5, %p3369_p4 }
  0x4b   :  { %3377 = shalt.err (!%p3374_p6)
}
  0x4c   :  { %s3378_s16 = scalar_lea.vmem %s72_s28, 512  ;;  %p3383_p8 = scmp.lt.s32.totalorder %s72_s28, %s72_s28 }
  0x4d   :  { %p3379_p7 = scmp.ne.s32.totalorder %s72_s28, %s3378_s16  ;;  %p3384_p9 = scmp.lt.s32.totalorder %s3378_s16, %s3378_s16 }
  0x4f   :  { %p3385_p10 = por %p3384_p9, %p3383_p8 }
  0x51   :  { %p3386_p11 = pnand %p3385_p10, %p3379_p7 }
  0x53   :  { %3389 = shalt.err (!%p3386_p11)
}
  0x54   :  { %77 = dma.hbm_to_vmem [thread:$0]  %s3989_s4, 512, %s72_s28, [#allocation10], %s3446_s13, %s3446_s13, %s3447_s14  }
  0x55   :  { %3434 = dma.done.wait [#allocation4], 1024  }
  0x56   :  { %3435 = vsyncadd [#allocation4], 4294966272 }
  0x57   :  { %3436 = dma.done.wait [#allocation7], 1024  }
  0x58   :  { %3437 = vsyncadd [#allocation7], 4294966272 }
  0x59   :  { %3438 = dma.done.wait [#allocation10], 1024  }
  0x5a   :  { %3439 = vsyncadd [#allocation10], 4294966272  ;;  %vm99_vm0 = vcmask 261120   ;;  %v3451_v0 = vmov 0.0|0.0   ;;  %vm3452_vm1 = vmmov 0   ;;  %v3453_v1 = vmov 0.0  }
  0x5b   :  { %2992 = vmatprep.subr.bf16.mxu1 %v3451_v0  ;;  %2728 = vmatprep.mubr.msk.f32.mxu1 %vm3452_vm1, %v3453_v1  ;;  %100 = vst.msk [vmem:[#allocation12] sm:$0xff] %vm99_vm0, %v3453_v1  ;;  %101 = vst.msk [vmem:[#allocation12 + $0x8] sm:$0xff] %vm99_vm0, %v3453_v1  ;;  %v112_v2 = vld [vmem:[#allocation6] sm:$0xff]  ;;  %v113_v3 = vld [vmem:[#allocation6 + $0x8] sm:$0xff]  ;;  %s3454_s27 = smov 32   ;;  %s3455_s17 = smov 64  }
  0x5c   :  { %102 = vst.msk [vmem:[#allocation13] sm:$0xff] %vm99_vm0, %v3453_v1  ;;  %103 = vst.msk [vmem:[#allocation13 + $0x8] sm:$0xff] %vm99_vm0, %v3453_v1  ;;  %v259_v4 = vld [vmem:[#allocation8] sm:$0xff]  ;;  %v2984_v5 = vpack.c.bf16 %v113_v3, %v112_v2  ;;  %v260_v6 = vld [vmem:[#allocation8 + $0x8] sm:$0xff]  ;;  %s3457_s22 = smov [#allocation13]  }
  0x5d   :  { %v114_v7 = vld [vmem:[#allocation6 + $0x10] sm:$0xff]  ;;  %v115_v8 = vld [vmem:[#allocation6 + $0x18] sm:$0xff]  ;;  %v3599_v9 = vpack.c.bf16 %v260_v6, %v259_v4  ;;  %v104_v11 = vld [vmem:[#allocation3] sm:$0xff]  ;;  %s2500_s23 = sshll.u32 %s3457_s22, 4  ;;  %s2501_s23 = int_to_ptr.vmem [resolvable:$true] %s2500_s23 }
  0x5e   :  { %v2988_v10 = vpack.c.bf16 %v115_v8, %v114_v7  ;;  %v261_v12 = vld [vmem:[#allocation8 + $0x10] sm:$0xff]  ;;  %v262_v13 = vld [vmem:[#allocation8 + $0x18] sm:$0xff]  ;;  %2985 = vmatprep.subr.bf16.mxu0 %v2984_v5  ;;  %2708 = vmatprep.mubr.msk.f32.mxu0 %vm99_vm0, %v104_v11  ;;  %v105_v15 = vld [vmem:[#allocation3 + $0x8] sm:$0xff]  ;;  %s3390_s24 = scalar_lea.vmem %s2501_s23, 256  ;;  %p3395_p13 = scmp.lt.s32.totalorder %s2501_s23, %s2501_s23 }
  0x5f   :  { %2987 = vmatpush3.bf16.msra.mxu0 %v2984_v5  ;;  %2994 = vmatpush3.bf16.msra.mxu1 %v3599_v9  ;;  %v3603_v14 = vpack.c.bf16 %v262_v13, %v261_v12  ;;  %v3616_v17 = vld [vmem:[%s3990_s5] ss:$0 sm:$0xff]  ;;  %v264_v37 = vld [vmem:[#allocation9 + $0x8] sm:$0xff]  ;;  %v106_v41 = vld [vmem:[#allocation3 + $0x10] sm:$0xff]  ;;  %p3391_p12 = scmp.ne.s32.totalorder %s2501_s23, %s3390_s24  ;;  %p3396_p0 = scmp.lt.s32.totalorder %s3390_s24, %s3390_s24 }
  0x60   :  { %2989 = vmatprep.subr.bf16.mxu0 %v2988_v10  ;;  %2995 = vmatprep.subr.bf16.mxu1 %v3451_v0  ;;  %v263_v36 = vld [vmem:[#allocation9] sm:$0xff]  ;;  %v268_v40 = vld [vmem:[#allocation11 + $0x8] sm:$0xff]  ;;  %v107_v42 = vld [vmem:[#allocation3 + $0x18] sm:$0xff] }
  0x61   :  { %v267_v38 = vld [vmem:[#allocation11] sm:$0xff]  ;;  %v3627_v39 = vpack.c.bf16 %v264_v37, %v263_v36  ;;  %v269_v44 = vld [vmem:[#allocation11 + $0x10] sm:$0xff]  ;;  %v270_v45 = vld [vmem:[#allocation11 + $0x18] sm:$0xff]  ;;  %p3397_p1 = por %p3396_p0, %p3395_p13 }
  0x62   :  { %v276_v16 = vld [vmem:[#allocation12] sm:$0xff]  ;;  %v3629_v43 = vpack.c.bf16 %v268_v40, %v267_v38  ;;  %v265_v47 = vld [vmem:[#allocation9 + $0x10] sm:$0xff]  ;;  %v266_v48 = vld [vmem:[#allocation9 + $0x18] sm:$0xff]  ;;  %v3635_v49 = vpack.c.bf16 %v270_v45, %v269_v44 }
  0x63   :  { %2991 = vmatpush3.bf16.msra.mxu0 %v2988_v10  ;;  %2997 = vmatpush3.bf16.msra.mxu1 %v3603_v14  ;;  %v279_v25 = vld [vmem:[#allocation13] sm:$0xff]  ;;  %v108_v46 = vld [vmem:[#allocation3 + $0x20] sm:$0xff]  ;;  %v3637_v50 = vpack.c.bf16 %v266_v48, %v265_v47  ;;  %v109_v51 = vld [vmem:[#allocation3 + $0x28] sm:$0xff]  ;;  %p3398_p2 = pnand %p3397_p1, %p3391_p12 }
  0x64   :  { %3004 = vmatprep.subr.bf16.mxu0 %v3451_v0  ;;  %2998 = vmatprep.subr.bf16.mxu1 %v3451_v0  ;;  %v110_v52 = vld [vmem:[#allocation3 + $0x30] sm:$0xff]  ;;  %v278_v53 = vld [vmem:[#allocation12 + $0x8] sm:$0xff]  ;;  %v111_v54 = vld [vmem:[#allocation3 + $0x38] sm:$0xff] }
  0x65   :  { %v3691_v6 = vld [vmem:[%s3990_s5 + $0x1] ss:$0 sm:$0xff] }
  0x66   :  { %2709 = vmatmul.mubr.msk.f32.vlgmr.msra.gmra.mrb[0].mxu0 %vm99_vm0, %v105_v15  ;;  %2729 = vmatmul.mubr.msk.f32.vlgmr.msra.gmra.mrb[0].mxu1 %vm99_vm0, %v276_v16 }
  0x67   :  { %2739 = vmatprep.mubr.msk.f32.mxu1 %vm3452_vm1, %v3453_v1  ;;  %2711 = vmatprep.mubr.msk.f32.mxu0 %vm99_vm0, %v106_v41 }
  0x68   :  { %3006 = vmatpush3.bf16.msra.mxu0 %v3627_v39  ;;  %3000 = vmatpush3.bf16.msra.mxu1 %v3629_v43 }
  0x69   :  { %3001 = vmatprep.subr.bf16.mxu1 %v3451_v0  ;;  %3007 = vmatprep.subr.bf16.mxu0 %v3451_v0 }
  0x6a   :  { %2712 = vmatmul.mubr.msk.f32.gmra.mrb[2].mxu0 %vm99_vm0, %v107_v42 }
  0x6b   :  { %2714 = vmatprep.mubr.msk.f32.mxu0 %vm99_vm0, %v108_v46 }
  0x6c   :  { %3009 = vmatpush3.bf16.msra.mxu0 %v3637_v50  ;;  %3003 = vmatpush3.bf16.msra.mxu1 %v3635_v49 }
  0x6d   :  { %3010 = vmatprep.subr.bf16.mxu1 %v3451_v0  ;;  %3016 = vmatprep.subr.bf16.mxu0 %v3451_v0 }
  0x6e   :  { %2715 = vmatmul.mubr.msk.f32.gmra.mrb[4].mxu0 %vm99_vm0, %v109_v51 }
  0x6f   :  { %2717 = vmatprep.mubr.msk.f32.mxu0 %vm99_vm0, %v110_v52  ;;  %2740 = vmatmul.mubr.msk.f32.vlgmr.msra.gmra.mrb[2].mxu1 %vm99_vm0, %v278_v53 }
  0x70   :  { %3012 = vmatpush3.bf16.msra.mxu1 %v3599_v9  ;;  %2761 = vmatprep.mubr.msk.f32.mxu1 %vm3452_vm1, %v3453_v1 }
  0x71   :  { %3013 = vmatprep.subr.bf16.mxu1 %v3451_v0 }
  0x72   :  { %2718 = vmatmul.mubr.msk.f32.gmra.mrb[6].mxu0 %vm99_vm0, %v111_v54 }
  0x73   :  { %2750 = vmatprep.mubr.msk.f32.mxu0 %vm3452_vm1, %v3453_v1 }
  0x74   :  { %3015 = vmatpush3.bf16.msra.mxu1 %v3603_v14 }
  0x75   :  { %3022 = vmatprep.subr.bf16.mxu1 %v3451_v0 }
 0x139   :  { %v3618_v18 = vpop.f32.mrb[0].mxu0  ;;  %v352_v19 = vpop.f32.mrb[0].mxu1 }
 0x13a   :  { %v212_v20 = vpop.f32.mrb[1].mxu0  ;;  %v2730_v21 = vpop.f32.mrb[1].mxu1  ;;  %v218_v5 = vadd.f32 %v3618_v18, %v3616_v17  ;;  %v281_v18 = vld [vmem:[#allocation13 + $0x8] sm:$0xff] }
 0x13b   :  { %v213_v22 = vadd.f32 %v3616_v17, %v212_v20 }
 0x13d   :  { %v356_v23 = vadd.f32 %v352_v19, %v213_v22  ;;  %v3660_v58 = vpop.f32.mrb[2].mxu0 }
 0x13e   :  { %v3662_v59 = vpop.f32.mrb[3].mxu0 }
 0x13f   :  { %3151 = vtanh.f32 %v356_v23  ;;  %v2529_v26 = vmul.f32 -1.442695, %v356_v23 }
 0x141   :  { %3153 = vpow2.f32 %v2529_v26  ;;  %v3664_v60 = vpop.f32.mrb[4].mxu0 }
 0x142   :  { %v3666_v61 = vpop.f32.mrb[5].mxu0  ;;  %v454_v62 = vpop.f32.mrb[2].mxu1 }
 0x143   :  { %v2741_v2 = vpop.f32.mrb[3].mxu1 }
 0x145   :  { %v3668_v63 = vpop.f32.mrb[6].mxu0 }
 0x146   :  { %v3670_v3 = vpop.f32.mrb[7].mxu0 }
 0x149   :  { %v3152_v24 = vpop.eup %3151 }
 0x14a   :  { %370 = vrot.lane.b32.xlu0 %v3152_v24, %s3454_s27 }
 0x14b   :  { %v3154_v27 = vpop.eup %3153 }
 0x14c   :  { %v360_v28 = vadd.f32 1.0, %v3154_v27 }
 0x14e   :  { %365 = vrot.lane.b32.xlu0 %v279_v25, %s3454_s27  ;;  %3155 = vrcp.f32 %v360_v28 }
 0x158   :  { %v3156_v29 = vpop.eup %3155 }
 0x1bc   :  { %v371_v30 = vpop.permute.xlu0 %370 }
 0x1bd   :  { %v373_v31 = vmul.f32 %v3156_v29, %v371_v30 }
 0x1bf   :  { %375 = vrot.lane.b32.xlu1 %v373_v31, %s3454_s27 }
 0x1c0   :  { %v366_v32 = vpop.permute.xlu0 %365 }
 0x1c1   :  { %v368_v33 = vmul.f32 %v3156_v29, %v366_v32 }
 0x231   :  { %v376_v34 = vpop.permute.xlu1 %375 }
 0x232   :  { %v3624_v35 = vadd.f32 %v376_v34, %v368_v33 }
 0x234   :  { %3157 = vtanh.f32 %v3624_v35 }
 0x23e   :  { %v3158_v55 = vpop.eup %3157 }
 0x23f   :  { %381 = vrot.lane.b32.xlu1 %v3158_v55, %s3454_s27 }
 0x2b1   :  { %v382_v56 = vpop.permute.xlu1 %381 }
 0x2b2   :  { %v384_v57 = vmul.f32 %v3156_v29, %v382_v56 }
 0x2b4   :  { %459 = vrot.lane.b32.xlu0 %v384_v57, %s3455_s17  ;;  %v223_v57 = vadd.f32 %v3616_v17, %v3662_v59 }
 0x326   :  { %v460_v4 = vpop.permute.xlu0 %459 }
 0x327   :  { %2751 = vmatmul.mubr.msk.f32.vlgmr.msra.gmra.mrb[8].mxu0 %vm99_vm0, %v460_v4  ;;  %2762 = vmatmul.mubr.msk.f32.vlgmr.msra.gmra.mrb[4].mxu1 %vm99_vm0, %v460_v4 }
 0x328   :  { %3024 = vmatpush3.bf16.msra.mxu1 %v3627_v39  ;;  %3018 = vmatpush3.bf16.msra.mxu0 %v3629_v43 }
 0x329   :  { %3025 = vmatprep.subr.bf16.mxu1 %v3451_v0  ;;  %3019 = vmatprep.subr.bf16.mxu0 %v3451_v0 }
 0x32a   :  { %2783 = vmatprep.mubr.msk.f32.mxu1 %vm3452_vm1, %v3453_v1  ;;  %2772 = vmatprep.mubr.msk.f32.mxu0 %vm3452_vm1, %v3453_v1 }
 0x32c   :  { %3027 = vmatpush3.bf16.msra.mxu1 %v3637_v50  ;;  %3021 = vmatpush3.bf16.msra.mxu0 %v3635_v49 }
 0x32d   :  { %3028 = vmatprep.subr.bf16.mxu0 %v3451_v0  ;;  %3034 = vmatprep.subr.bf16.mxu1 %v3451_v0 }
 0x3fa   :  { %v529_v7 = vpop.f32.mrb[8].mxu0  ;;  %v630_v8 = vpop.f32.mrb[4].mxu1 }
 0x3fb   :  { %v530_v10 = vadd.f32 %v529_v7, %v454_v62  ;;  %v634_v11 = vadd.f32 %v630_v8, %v218_v5  ;;  %v2752_v12 = vpop.f32.mrb[9].mxu0  ;;  %v2763_v13 = vpop.f32.mrb[5].mxu1 }
 0x3fd   :  { %v533_v15 = vadd.f32 %v3691_v6, %v530_v10  ;;  %3159 = vtanh.f32 %v634_v11  ;;  %v2534_v20 = vmul.f32 -1.442695, %v634_v11 }
 0x3ff   :  { %3161 = vtanh.f32 %v533_v15  ;;  %v2532_v21 = vmul.f32 -1.442695, %v533_v15 }
 0x400   :  { %3163 = vpow2.f32 %v2534_v20 }
 0x401   :  { %3165 = vpow2.f32 %v2532_v21 }
 0x407   :  { %v3160_v16 = vpop.eup %3159 }
 0x408   :  { %644 = vrot.lane.b32.xlu0 %v3160_v16, %s3454_s27 }
 0x409   :  { %v3162_v19 = vpop.eup %3161 }
 0x40a   :  { %547 = vrot.lane.b32.xlu1 %v3162_v19, %s3454_s27  ;;  %v3164_v22 = vpop.eup %3163 }
 0x40b   :  { %v3166_v23 = vpop.eup %3165  ;;  %v638_v24 = vadd.f32 1.0, %v3164_v22 }
 0x40c   :  { %v537_v25 = vadd.f32 1.0, %v3166_v23 }
 0x40d   :  { %3167 = vrcp.f32 %v638_v24 }
 0x40e   :  { %542 = vrot.lane.b32.xlu1 %v281_v18, %s3454_s27  ;;  %3169 = vrcp.f32 %v537_v25 }
 0x417   :  { %v3168_v26 = vpop.eup %3167 }
 0x418   :  { %v3170_v29 = vpop.eup %3169  ;;  %v642_v33 = vmul.f32 %v3168_v26, %v3624_v35 }
 0x47a   :  { %v645_v27 = vpop.permute.xlu0 %644 }
 0x47b   :  { %v647_v28 = vmul.f32 %v3168_v26, %v645_v27 }
 0x47c   :  { %v548_v30 = vpop.permute.xlu1 %547 }
 0x47d   :  { %v550_v31 = vmul.f32 %v3170_v29, %v548_v30  ;;  %649 = vrot.lane.b32.xlu1 %v647_v28, %s3454_s27 }
 0x47f   :  { %552 = vrot.lane.b32.xlu0 %v550_v31, %s3454_s27 }
 0x480   :  { %v543_v32 = vpop.permute.xlu1 %542 }
 0x481   :  { %v545_v36 = vmul.f32 %v3170_v29, %v543_v32 }
 0x4ef   :  { %v650_v34 = vpop.permute.xlu1 %649 }
 0x4f0   :  { %v3700_v37 = vadd.f32 %v650_v34, %v642_v33 }
 0x4f1   :  { %v553_v38 = vpop.permute.xlu0 %552 }
 0x4f2   :  { %3171 = vtanh.f32 %v3700_v37  ;;  %v3703_v40 = vadd.f32 %v553_v38, %v545_v36 }
 0x4f4   :  { %3173 = vtanh.f32 %v3703_v40 }
 0x4fc   :  { %v3172_v41 = vpop.eup %3171 }
 0x4fd   :  { %655 = vrot.lane.b32.xlu1 %v3172_v41, %s3454_s27  ;;  %v228_v41 = vadd.f32 %v3660_v58, %v3616_v17 }
 0x4fe   :  { %v3174_v42 = vpop.eup %3173 }
 0x4ff   :  { %558 = vrot.lane.b32.xlu0 %v3174_v42, %s3454_s27 }
 0x56f   :  { %v656_v44 = vpop.permute.xlu1 %655 }
 0x570   :  { %v658_v45 = vmul.f32 %v3168_v26, %v656_v44 }
 0x571   :  { %v559_v35 = vpop.permute.xlu0 %558 }
 0x572   :  { %v561_v46 = vmul.f32 %v3170_v29, %v559_v35  ;;  %735 = vrot.lane.b32.xlu1 %v658_v45, %s3455_s17 }
 0x574   :  { %660 = vrot.lane.b32.xlu0 %v561_v46, %s3455_s17 }
 0x5e4   :  { %v736_v47 = vpop.permute.xlu1 %735 }
 0x5e5   :  { %2784 = vmatmul.mubr.msk.f32.vlgmr.msra.gmra.mrb[6].mxu1 %vm99_vm0, %v736_v47 }
 0x5e6   :  { %v661_v48 = vpop.permute.xlu0 %660  ;;  %3036 = vmatpush3.bf16.msra.mxu1 %v3629_v43  ;;  %2805 = vmatprep.mubr.msk.f32.mxu1 %vm3452_vm1, %v3453_v1 }
 0x5e7   :  { %2773 = vmatmul.mubr.msk.f32.vlgmr.msra.gmra.mrb[10].mxu0 %vm99_vm0, %v661_v48  ;;  %3037 = vmatprep.subr.bf16.mxu1 %v3451_v0 }
 0x5e8   :  { %3030 = vmatpush3.bf16.msra.mxu0 %v3599_v9  ;;  %2794 = vmatprep.mubr.msk.f32.mxu0 %vm3452_vm1, %v3453_v1 }
 0x5e9   :  { %3031 = vmatprep.subr.bf16.mxu0 %v3451_v0 }
 0x5ea   :  { %3039 = vmatpush3.bf16.msra.mxu1 %v3635_v49 }
 0x5eb   :  { %3046 = vmatprep.subr.bf16.mxu1 %v3451_v0 }
 0x5ec   :  { %3033 = vmatpush3.bf16.msra.mxu0 %v3603_v14 }
 0x5ed   :  { %3040 = vmatprep.subr.bf16.mxu0 %v3451_v0 }
 0x5ef   :  { %2795 = vmatmul.mubr.msk.f32.vlgmr.msra.gmra.mrb[12].mxu0 %vm99_vm0, %v736_v47 }
 0x5f0   :  { %3042 = vmatpush3.bf16.msra.mxu0 %v3627_v39  ;;  %2816 = vmatprep.mubr.msk.f32.mxu0 %vm3452_vm1, %v3453_v1 }
 0x5f1   :  { %3043 = vmatprep.subr.bf16.mxu0 %v3451_v0 }
 0x5f4   :  { %3045 = vmatpush3.bf16.msra.mxu0 %v3637_v50 }
 0x5f5   :  { %3052 = vmatprep.subr.bf16.mxu0 %v3451_v0 }
 0x6b8   :  { %v805_v51 = vpop.f32.mrb[6].mxu1 }
 0x6b9   :  { %v2785_v52 = vpop.f32.mrb[7].mxu1 }
 0x6ba   :  { %v730_v53 = vpop.f32.mrb[10].mxu0 }
 0x6bb   :  { %v806_v54 = vadd.f32 %v805_v51, %v730_v53  ;;  %v2774_v55 = vpop.f32.mrb[11].mxu0 }
 0x6bd   :  { %v809_v56 = vadd.f32 %v3691_v6, %v806_v54 }
 0x6bf   :  { %3175 = vtanh.f32 %v809_v56  ;;  %v2537_v8 = vmul.f32 -1.442695, %v809_v56 }
 0x6c2   :  { %v902_v62 = vpop.f32.mrb[12].mxu0 }
 0x6c3   :  { %v906_v2 = vadd.f32 %v902_v62, %v223_v57  ;;  %v2796_v4 = vpop.f32.mrb[13].mxu0 }
 0x6c5   :  { %3177 = vtanh.f32 %v906_v2  ;;  %v2539_v10 = vmul.f32 -1.442695, %v906_v2 }
 0x6c6   :  { %3179 = vpow2.f32 %v2537_v8 }
 0x6c7   :  { %3181 = vpow2.f32 %v2539_v10 }
 0x6c9   :  { %v3176_v5 = vpop.eup %3175 }
 0x6ca   :  { %819 = vrot.lane.b32.xlu0 %v3176_v5, %s3454_s27 }
 0x6cf   :  { %v3178_v7 = vpop.eup %3177 }
 0x6d0   :  { %916 = vrot.lane.b32.xlu1 %v3178_v7, %s3454_s27  ;;  %v3180_v11 = vpop.eup %3179 }
 0x6d1   :  { %v813_v12 = vadd.f32 1.0, %v3180_v11  ;;  %v3182_v13 = vpop.eup %3181 }
 0x6d2   :  { %v910_v15 = vadd.f32 1.0, %v3182_v13 }
 0x6d3   :  { %3183 = vrcp.f32 %v813_v12 }
 0x6d4   :  { %3185 = vrcp.f32 %v910_v15 }
 0x6dd   :  { %v3184_v59 = vpop.eup %3183 }
 0x6de   :  { %v3186_v18 = vpop.eup %3185  ;;  %v817_v22 = vmul.f32 %v3184_v59, %v3703_v40 }
 0x6df   :  { %v914_v25 = vmul.f32 %v3186_v18, %v3700_v37 }
 0x73c   :  { %v820_v16 = vpop.permute.xlu0 %819 }
 0x73d   :  { %v822_v19 = vmul.f32 %v3184_v59, %v820_v16 }
 0x73f   :  { %824 = vrot.lane.b32.xlu0 %v822_v19, %s3454_s27 }
 0x742   :  { %v917_v20 = vpop.permute.xlu1 %916 }
 0x743   :  { %v919_v21 = vmul.f32 %v3186_v18, %v917_v20 }
 0x745   :  { %921 = vrot.lane.b32.xlu1 %v919_v21, %s3454_s27 }
 0x7b1   :  { %v825_v23 = vpop.permute.xlu0 %824 }
 0x7b2   :  { %v3739_v24 = vadd.f32 %v825_v23, %v817_v22 }
 0x7b4   :  { %3187 = vtanh.f32 %v3739_v24 }
 0x7b7   :  { %v922_v26 = vpop.permute.xlu1 %921 }
 0x7b8   :  { %v3743_v27 = vadd.f32 %v922_v26, %v914_v25 }
 0x7ba   :  { %3189 = vtanh.f32 %v3743_v27 }
 0x7be   :  { %v3188_v28 = vpop.eup %3187 }
 0x7bf   :  { %830 = vrot.lane.b32.xlu0 %v3188_v28, %s3454_s27 }
 0x7c4   :  { %v3190_v29 = vpop.eup %3189 }
 0x7c5   :  { %927 = vrot.lane.b32.xlu1 %v3190_v29, %s3454_s27 }
 0x831   :  { %v831_v30 = vpop.permute.xlu0 %830 }
 0x832   :  { %v833_v31 = vmul.f32 %v3184_v59, %v831_v30  ;;  %v233_v30 = vadd.f32 %v3616_v17, %v3666_v61 }
 0x834   :  { %932 = vrot.lane.b32.xlu0 %v833_v31, %s3455_s17 }
 0x837   :  { %v928_v32 = vpop.permute.xlu1 %927 }
 0x838   :  { %v930_v33 = vmul.f32 %v3186_v18, %v928_v32 }
 0x83a   :  { %1007 = vrot.lane.b32.xlu1 %v930_v33, %s3455_s17 }
 0x8a6   :  { %v933_v34 = vpop.permute.xlu0 %932 }
 0x8a7   :  { %2806 = vmatmul.mubr.msk.f32.vlgmr.msra.gmra.mrb[8].mxu1 %vm99_vm0, %v933_v34 }
 0x8a8   :  { %3048 = vmatpush3.bf16.msra.mxu1 %v3599_v9  ;;  %2827 = vmatprep.mubr.msk.f32.mxu1 %vm3452_vm1, %v3453_v1 }
 0x8a9   :  { %3049 = vmatprep.subr.bf16.mxu1 %v3451_v0 }
 0x8ac   :  { %v1008_v36 = vpop.permute.xlu1 %1007  ;;  %3051 = vmatpush3.bf16.msra.mxu1 %v3603_v14 }
 0x8ad   :  { %2817 = vmatmul.mubr.msk.f32.vlgmr.msra.gmra.mrb[14].mxu0 %vm99_vm0, %v1008_v36  ;;  %3058 = vmatprep.subr.bf16.mxu1 %v3451_v0 }
 0x8ae   :  { %3054 = vmatpush3.bf16.msra.mxu0 %v3629_v43  ;;  %2838 = vmatprep.mubr.msk.f32.mxu0 %vm3452_vm1, %v3453_v1 }
 0x8af   :  { %2828 = vmatmul.mubr.msk.f32.vlgmr.msra.gmra.mrb[10].mxu1 %vm99_vm0, %v1008_v36  ;;  %3055 = vmatprep.subr.bf16.mxu0 %v3451_v0 }
 0x8b0   :  { %3060 = vmatpush3.bf16.msra.mxu1 %v3627_v39  ;;  %2849 = vmatprep.mubr.msk.f32.mxu1 %vm3452_vm1, %v3453_v1 }
 0x8b1   :  { %3061 = vmatprep.subr.bf16.mxu1 %v3451_v0 }
 0x8b2   :  { %3057 = vmatpush3.bf16.msra.mxu0 %v3635_v49 }
 0x8b3   :  { %3064 = vmatprep.subr.bf16.mxu0 %v3451_v0 }
 0x8b4   :  { %3063 = vmatpush3.bf16.msra.mxu1 %v3637_v50 }
 0x8b5   :  { %3070 = vmatprep.subr.bf16.mxu1 %v3451_v0 }
 0x97a   :  { %v1002_v37 = vpop.f32.mrb[8].mxu1 }
 0x97b   :  { %v2807_v38 = vpop.f32.mrb[9].mxu1 }
 0x980   :  { %v1077_v40 = vpop.f32.mrb[14].mxu0 }
 0x981   :  { %v1078_v42 = vadd.f32 %v1077_v40, %v1002_v37  ;;  %v2818_v44 = vpop.f32.mrb[15].mxu0 }
 0x982   :  { %v1174_v45 = vpop.f32.mrb[10].mxu1 }
 0x983   :  { %v1081_v35 = vadd.f32 %v3691_v6, %v1078_v42  ;;  %v1178_v46 = vadd.f32 %v1174_v45, %v228_v41  ;;  %v2829_v47 = vpop.f32.mrb[11].mxu1 }
 0x985   :  { %3191 = vtanh.f32 %v1081_v35  ;;  %v2542_v52 = vmul.f32 -1.442695, %v1081_v35  ;;  %v2544_v53 = vmul.f32 -1.442695, %v1178_v46 }
 0x986   :  { %3193 = vtanh.f32 %v1178_v46 }
 0x987   :  { %3195 = vpow2.f32 %v2542_v52 }
 0x988   :  { %3197 = vpow2.f32 %v2544_v53 }
 0x98f   :  { %v3192_v48 = vpop.eup %3191 }
 0x990   :  { %v3194_v51 = vpop.eup %3193  ;;  %1091 = vrot.lane.b32.xlu0 %v3192_v48, %s3454_s27 }
 0x991   :  { %1188 = vrot.lane.b32.xlu1 %v3194_v51, %s3454_s27  ;;  %v3196_v58 = vpop.eup %3195 }
 0x992   :  { %v3198_v54 = vpop.eup %3197  ;;  %v1085_v55 = vadd.f32 1.0, %v3196_v58 }
 0x993   :  { %v1182_v56 = vadd.f32 1.0, %v3198_v54 }
 0x994   :  { %3199 = vrcp.f32 %v1085_v55 }
 0x995   :  { %3201 = vrcp.f32 %v1182_v56 }
 0x99e   :  { %v3200_v57 = vpop.eup %3199 }
 0x99f   :  { %v3202_v2 = vpop.eup %3201  ;;  %v1089_v8 = vmul.f32 %v3200_v57, %v3739_v24 }
 0x9a0   :  { %v1186_v11 = vmul.f32 %v3202_v2, %v3743_v27 }
 0xa02   :  { %v1092_v62 = vpop.permute.xlu0 %1091 }
 0xa03   :  { %v1094_v4 = vmul.f32 %v3200_v57, %v1092_v62  ;;  %v1189_v5 = vpop.permute.xlu1 %1188 }
 0xa04   :  { %v1191_v7 = vmul.f32 %v3202_v2, %v1189_v5 }
 0xa05   :  { %1096 = vrot.lane.b32.xlu0 %v1094_v4, %s3454_s27 }
 0xa06   :  { %1193 = vrot.lane.b32.xlu1 %v1191_v7, %s3454_s27 }
 0xa77   :  { %v1097_v10 = vpop.permute.xlu0 %1096 }
 0xa78   :  { %v3780_v12 = vadd.f32 %v1097_v10, %v1089_v8  ;;  %v1194_v13 = vpop.permute.xlu1 %1193 }
 0xa79   :  { %v3782_v15 = vadd.f32 %v1194_v13, %v1186_v11 }
 0xa7a   :  { %3203 = vtanh.f32 %v3780_v12 }
 0xa7b   :  { %3205 = vtanh.f32 %v3782_v15 }
 0xa84   :  { %v3204_v59 = vpop.eup %3203 }
 0xa85   :  { %v3206_v16 = vpop.eup %3205  ;;  %1102 = vrot.lane.b32.xlu0 %v3204_v59, %s3454_s27  ;;  %v238_v59 = vadd.f32 %v3664_v60, %v3616_v17 }
 0xa86   :  { %1199 = vrot.lane.b32.xlu1 %v3206_v16, %s3454_s27 }
 0xaf7   :  { %v1103_v19 = vpop.permute.xlu0 %1102 }
 0xaf8   :  { %v1105_v18 = vmul.f32 %v3200_v57, %v1103_v19  ;;  %v1200_v20 = vpop.permute.xlu1 %1199 }
 0xaf9   :  { %v1202_v21 = vmul.f32 %v3202_v2, %v1200_v20 }
 0xafa   :  { %1204 = vrot.lane.b32.xlu0 %v1105_v18, %s3455_s17 }
 0xafb   :  { %1279 = vrot.lane.b32.xlu1 %v1202_v21, %s3455_s17 }
 0xb6c   :  { %v1205_v22 = vpop.permute.xlu0 %1204 }
 0xb6d   :  { %v1280_v23 = vpop.permute.xlu1 %1279  ;;  %2839 = vmatmul.mubr.msk.f32.vlgmr.msra.gmra.mrb[16].mxu0 %vm99_vm0, %v1205_v22 }
 0xb6e   :  { %2850 = vmatmul.mubr.msk.f32.vlgmr.msra.gmra.mrb[12].mxu1 %vm99_vm0, %v1280_v23  ;;  %3066 = vmatpush3.bf16.msra.mxu0 %v3599_v9 }
 0xb6f   :  { %3067 = vmatprep.subr.bf16.mxu0 %v3451_v0  ;;  %2860 = vmatprep.mubr.msk.f32.mxu0 %vm3452_vm1, %v3453_v1 }
 0xb70   :  { %3072 = vmatpush3.bf16.msra.mxu1 %v3629_v43  ;;  %2871 = vmatprep.mubr.msk.f32.mxu1 %vm3452_vm1, %v3453_v1 }
 0xb71   :  { %3073 = vmatprep.subr.bf16.mxu1 %v3451_v0 }
 0xb72   :  { %3069 = vmatpush3.bf16.msra.mxu0 %v3603_v14 }
 0xb73   :  { %3076 = vmatprep.subr.bf16.mxu0 %v3451_v0 }
 0xb74   :  { %3075 = vmatpush3.bf16.msra.mxu1 %v3635_v49 }
 0xb75   :  { %2861 = vmatmul.mubr.msk.f32.vlgmr.msra.gmra.mrb[18].mxu0 %vm99_vm0, %v1280_v23  ;;  %3082 = vmatprep.subr.bf16.mxu1 %v3451_v0 }
 0xb76   :  { %3078 = vmatpush3.bf16.msra.mxu0 %v3627_v39  ;;  %2882 = vmatprep.mubr.msk.f32.mxu0 %vm3452_vm1, %v3453_v1 }
 0xb77   :  { %3079 = vmatprep.subr.bf16.mxu0 %v3451_v0 }
 0xb7a   :  { %3081 = vmatpush3.bf16.msra.mxu0 %v3637_v50 }
 0xb7b   :  { %3088 = vmatprep.subr.bf16.mxu0 %v3451_v0 }
 0xc40   :  { %v1274_v24 = vpop.f32.mrb[16].mxu0 }
 0xc41   :  { %v1349_v25 = vpop.f32.mrb[12].mxu1  ;;  %v2840_v26 = vpop.f32.mrb[17].mxu0 }
 0xc42   :  { %v1350_v27 = vadd.f32 %v1349_v25, %v1274_v24  ;;  %v2851_v28 = vpop.f32.mrb[13].mxu1 }
 0xc44   :  { %v1353_v29 = vadd.f32 %v3691_v6, %v1350_v27 }
 0xc46   :  { %3207 = vtanh.f32 %v1353_v29  ;;  %v2547_v37 = vmul.f32 -1.442695, %v1353_v29 }
 0xc48   :  { %v1446_v31 = vpop.f32.mrb[18].mxu0 }
 0xc49   :  { %v1450_v32 = vadd.f32 %v1446_v31, %v233_v30  ;;  %v2862_v33 = vpop.f32.mrb[19].mxu0 }
 0xc4b   :  { %3209 = vtanh.f32 %v1450_v32  ;;  %v2549_v38 = vmul.f32 -1.442695, %v1450_v32 }
 0xc4c   :  { %3211 = vpow2.f32 %v2547_v37 }
 0xc4d   :  { %3213 = vpow2.f32 %v2549_v38 }
 0xc50   :  { %v3208_v34 = vpop.eup %3207 }
 0xc51   :  { %1363 = vrot.lane.b32.xlu0 %v3208_v34, %s3454_s27 }
 0xc55   :  { %v3210_v36 = vpop.eup %3209 }
 0xc56   :  { %1460 = vrot.lane.b32.xlu1 %v3210_v36, %s3454_s27  ;;  %v3212_v40 = vpop.eup %3211 }
 0xc57   :  { %v1357_v41 = vadd.f32 1.0, %v3212_v40  ;;  %v3214_v42 = vpop.eup %3213 }
 0xc58   :  { %v1454_v44 = vadd.f32 1.0, %v3214_v42 }
 0xc59   :  { %3215 = vrcp.f32 %v1357_v41 }
 0xc5a   :  { %3217 = vrcp.f32 %v1454_v44 }
 0xc63   :  { %v3216_v61 = vpop.eup %3215 }
 0xc64   :  { %v3218_v46 = vpop.eup %3217  ;;  %v1361_v51 = vmul.f32 %v3216_v61, %v3780_v12 }
 0xc65   :  { %v1458_v58 = vmul.f32 %v3218_v46, %v3782_v15 }
 0xcc3   :  { %v1364_v45 = vpop.permute.xlu0 %1363 }
 0xcc4   :  { %v1366_v35 = vmul.f32 %v3216_v61, %v1364_v45 }
 0xcc6   :  { %1368 = vrot.lane.b32.xlu0 %v1366_v35, %s3454_s27 }
 0xcc8   :  { %v1461_v47 = vpop.permute.xlu1 %1460 }
 0xcc9   :  { %v1463_v48 = vmul.f32 %v3218_v46, %v1461_v47 }
 0xccb   :  { %1465 = vrot.lane.b32.xlu1 %v1463_v48, %s3454_s27 }
 0xd38   :  { %v1369_v52 = vpop.permute.xlu0 %1368 }
 0xd39   :  { %v3819_v53 = vadd.f32 %v1369_v52, %v1361_v51 }
 0xd3b   :  { %3219 = vtanh.f32 %v3819_v53 }
 0xd3d   :  { %v1466_v54 = vpop.permute.xlu1 %1465 }
 0xd3e   :  { %v3823_v55 = vadd.f32 %v1466_v54, %v1458_v58 }
 0xd40   :  { %3221 = vtanh.f32 %v3823_v55 }
 0xd45   :  { %v3220_v56 = vpop.eup %3219 }
 0xd46   :  { %1374 = vrot.lane.b32.xlu0 %v3220_v56, %s3454_s27  ;;  %v243_v56 = vadd.f32 %v3616_v17, %v3670_v3 }
 0xd4a   :  { %v3222_v57 = vpop.eup %3221 }
 0xd4b   :  { %1471 = vrot.lane.b32.xlu1 %v3222_v57, %s3454_s27 }
 0xdb8   :  { %v1375_v62 = vpop.permute.xlu0 %1374 }
 0xdb9   :  { %v1377_v2 = vmul.f32 %v3216_v61, %v1375_v62 }
 0xdbb   :  { %1476 = vrot.lane.b32.xlu0 %v1377_v2, %s3455_s17 }
 0xdbd   :  { %v1472_v4 = vpop.permute.xlu1 %1471 }
 0xdbe   :  { %v1474_v5 = vmul.f32 %v3218_v46, %v1472_v4 }
 0xdc0   :  { %1551 = vrot.lane.b32.xlu1 %v1474_v5, %s3455_s17 }
 0xe2d   :  { %v1477_v7 = vpop.permute.xlu0 %1476 }
 0xe2e   :  { %2872 = vmatmul.mubr.msk.f32.vlgmr.msra.gmra.mrb[14].mxu1 %vm99_vm0, %v1477_v7 }
 0xe2f   :  { %3084 = vmatpush3.bf16.msra.mxu1 %v3599_v9  ;;  %2893 = vmatprep.mubr.msk.f32.mxu1 %vm3452_vm1, %v3453_v1 }
 0xe30   :  { %3085 = vmatprep.subr.bf16.mxu1 %v3451_v0 }
 0xe32   :  { %v1552_v8 = vpop.permute.xlu1 %1551 }
 0xe33   :  { %3087 = vmatpush3.bf16.msra.mxu1 %v3603_v14  ;;  %2883 = vmatmul.mubr.msk.f32.vlgmr.msra.gmra.mrb[20].mxu0 %vm99_vm0, %v1552_v8 }
 0xe34   :  { %3090 = vmatpush3.bf16.msra.mxu0 %v3629_v43  ;;  %3094 = vmatprep.subr.bf16.mxu1 %v3451_v0 }
 0xe35   :  { %3091 = vmatprep.subr.bf16.mxu0 %v3451_v0  ;;  %2904 = vmatprep.mubr.msk.f32.mxu0 %vm3452_vm1, %v3453_v1 }
 0xe36   :  { %2894 = vmatmul.mubr.msk.f32.vlgmr.msra.gmra.mrb[16].mxu1 %vm99_vm0, %v1552_v8 }
 0xe37   :  { %3096 = vmatpush3.bf16.msra.mxu1 %v3627_v39  ;;  %2915 = vmatprep.mubr.msk.f32.mxu1 %vm3452_vm1, %v3453_v1 }
 0xe38   :  { %3093 = vmatpush3.bf16.msra.mxu0 %v3635_v49  ;;  %3097 = vmatprep.subr.bf16.mxu1 %v3451_v0 }
 0xe39   :  { %3100 = vmatprep.subr.bf16.mxu0 %v3451_v0 }
 0xe3b   :  { %3099 = vmatpush3.bf16.msra.mxu1 %v3637_v50 }
 0xe3c   :  { %3106 = vmatprep.subr.bf16.mxu1 %v3451_v0 }
 0xf01   :  { %v1546_v10 = vpop.f32.mrb[14].mxu1 }
 0xf02   :  { %v2873_v11 = vpop.f32.mrb[15].mxu1 }
 0xf06   :  { %v1621_v12 = vpop.f32.mrb[20].mxu0 }
 0xf07   :  { %v1622_v13 = vadd.f32 %v1621_v12, %v1546_v10  ;;  %v2884_v15 = vpop.f32.mrb[21].mxu0 }
 0xf09   :  { %v1625_v16 = vadd.f32 %v3691_v6, %v1622_v13  ;;  %v1718_v19 = vpop.f32.mrb[16].mxu1 }
 0xf0a   :  { %v1722_v18 = vadd.f32 %v1718_v19, %v238_v59  ;;  %v2895_v20 = vpop.f32.mrb[17].mxu1 }
 0xf0b   :  { %3223 = vtanh.f32 %v1625_v16  ;;  %v2552_v23 = vmul.f32 -1.442695, %v1625_v16 }
 0xf0c   :  { %3225 = vtanh.f32 %v1722_v18  ;;  %v2554_v24 = vmul.f32 -1.442695, %v1722_v18 }
 0xf0d   :  { %3227 = vpow2.f32 %v2552_v23 }
 0xf0e   :  { %3229 = vpow2.f32 %v2554_v24 }
 0xf15   :  { %v3224_v21 = vpop.eup %3223 }
 0xf16   :  { %v3226_v22 = vpop.eup %3225  ;;  %1635 = vrot.lane.b32.xlu0 %v3224_v21, %s3454_s27 }
 0xf17   :  { %1732 = vrot.lane.b32.xlu1 %v3226_v22, %s3454_s27  ;;  %v3228_v25 = vpop.eup %3227 }
 0xf18   :  { %v3230_v26 = vpop.eup %3229  ;;  %v1629_v60 = vadd.f32 1.0, %v3228_v25 }
 0xf19   :  { %v1726_v27 = vadd.f32 1.0, %v3230_v26 }
 0xf1a   :  { %3231 = vrcp.f32 %v1629_v60 }
 0xf1b   :  { %3233 = vrcp.f32 %v1726_v27 }
 0xf24   :  { %v3232_v28 = vpop.eup %3231 }
 0xf25   :  { %v3234_v30 = vpop.eup %3233  ;;  %v1633_v34 = vmul.f32 %v3232_v28, %v3819_v53 }
 0xf26   :  { %v1730_v37 = vmul.f32 %v3234_v30, %v3823_v55 }
 0xf88   :  { %v1636_v29 = vpop.permute.xlu0 %1635 }
 0xf89   :  { %v1638_v31 = vmul.f32 %v3232_v28, %v1636_v29  ;;  %v1733_v32 = vpop.permute.xlu1 %1732 }
 0xf8a   :  { %v1735_v33 = vmul.f32 %v3234_v30, %v1733_v32 }
 0xf8b   :  { %1640 = vrot.lane.b32.xlu0 %v1638_v31, %s3454_s27 }
 0xf8c   :  { %1737 = vrot.lane.b32.xlu1 %v1735_v33, %s3454_s27 }
 0xffd   :  { %v1641_v36 = vpop.permute.xlu0 %1640 }
 0xffe   :  { %v3860_v38 = vadd.f32 %v1641_v36, %v1633_v34  ;;  %v1738_v40 = vpop.permute.xlu1 %1737  ;;  %v3279_v34 = vld [vmem:[%s3990_s5] ss:$0 sm:$0xff]  ;;  %s3456_s5 = smov 96  }
 0xfff   :  { %v3862_v41 = vadd.f32 %v1738_v40, %v1730_v37 }
0x1000   :  { %3235 = vtanh.f32 %v3860_v38 }
0x1001   :  { %3237 = vtanh.f32 %v3862_v41 }
0x100a   :  { %v3236_v42 = vpop.eup %3235 }
0x100b   :  { %v3238_v44 = vpop.eup %3237  ;;  %1646 = vrot.lane.b32.xlu0 %v3236_v42, %s3454_s27 }
0x100c   :  { %1743 = vrot.lane.b32.xlu1 %v3238_v44, %s3454_s27 }
0x107d   :  { %v1647_v61 = vpop.permute.xlu0 %1646 }
0x107e   :  { %v1649_v45 = vmul.f32 %v3232_v28, %v1647_v61  ;;  %v1744_v35 = vpop.permute.xlu1 %1743 }
0x107f   :  { %v1746_v46 = vmul.f32 %v3234_v30, %v1744_v35 }
0x1080   :  { %1748 = vrot.lane.b32.xlu0 %v1649_v45, %s3455_s17 }
0x1081   :  { %1823 = vrot.lane.b32.xlu1 %v1746_v46, %s3455_s17 }
0x10f2   :  { %v1749_v47 = vpop.permute.xlu0 %1748 }
0x10f3   :  { %v1824_v48 = vpop.permute.xlu1 %1823  ;;  %2905 = vmatmul.mubr.msk.f32.vlgmr.msra.gmra.mrb[22].mxu0 %vm99_vm0, %v1749_v47 }
0x10f4   :  { %2916 = vmatmul.mubr.msk.f32.vlgmr.msra.gmra.mrb[18].mxu1 %vm99_vm0, %v1824_v48  ;;  %3102 = vmatpush3.bf16.msra.mxu0 %v3599_v9 }
0x10f5   :  { %3103 = vmatprep.subr.bf16.mxu0 %v3451_v0  ;;  %2926 = vmatprep.mubr.msk.f32.mxu0 %vm3452_vm1, %v3453_v1 }
0x10f6   :  { %3108 = vmatpush3.bf16.msra.mxu1 %v3629_v43  ;;  %2937 = vmatprep.mubr.msk.f32.mxu1 %vm3452_vm1, %v3453_v1 }
0x10f7   :  { %3109 = vmatprep.subr.bf16.mxu1 %v3451_v0 }
0x10f8   :  { %3105 = vmatpush3.bf16.msra.mxu0 %v3603_v14 }
0x10f9   :  { %3112 = vmatprep.subr.bf16.mxu0 %v3451_v0 }
0x10fa   :  { %3111 = vmatpush3.bf16.msra.mxu1 %v3635_v49 }
0x10fb   :  { %2927 = vmatmul.mubr.msk.f32.vlgmr.msra.gmra.mrb[24].mxu0 %vm99_vm0, %v1824_v48  ;;  %3118 = vmatprep.subr.bf16.mxu1 %v3451_v0 }
0x10fc   :  { %3114 = vmatpush3.bf16.msra.mxu0 %v3627_v39  ;;  %2948 = vmatprep.mubr.msk.f32.mxu0 %vm3452_vm1, %v3453_v1 }
0x10fd   :  { %3115 = vmatprep.subr.bf16.mxu0 %v3451_v0 }
0x1100   :  { %3117 = vmatpush3.bf16.msra.mxu0 %v3637_v50 }
0x1101   :  { %3124 = vmatprep.subr.bf16.mxu0 %v3451_v0 }
0x11c6   :  { %v1818_v51 = vpop.f32.mrb[22].mxu0 }
0x11c7   :  { %v1893_v52 = vpop.f32.mrb[18].mxu1  ;;  %v2906_v53 = vpop.f32.mrb[23].mxu0 }
0x11c8   :  { %v1894_v58 = vadd.f32 %v1893_v52, %v1818_v51  ;;  %v2917_v54 = vpop.f32.mrb[19].mxu1 }
0x11ca   :  { %v1897_v55 = vadd.f32 %v3691_v6, %v1894_v58 }
0x11cc   :  { %3239 = vtanh.f32 %v1897_v55  ;;  %v2557_v7 = vmul.f32 -1.442695, %v1897_v55 }
0x11ce   :  { %v1990_v57 = vpop.f32.mrb[24].mxu0 }
0x11cf   :  { %v1994_v62 = vadd.f32 %v1990_v57, %v243_v56  ;;  %v2928_v2 = vpop.f32.mrb[25].mxu0 }
0x11d1   :  { %3241 = vtanh.f32 %v1994_v62  ;;  %v2559_v8 = vmul.f32 -1.442695, %v1994_v62 }
0x11d2   :  { %3243 = vpow2.f32 %v2557_v7 }
0x11d3   :  { %3245 = vpow2.f32 %v2559_v8 }
0x11d6   :  { %v3240_v4 = vpop.eup %3239 }
0x11d7   :  { %1907 = vrot.lane.b32.xlu0 %v3240_v4, %s3454_s27 }
0x11db   :  { %v3242_v5 = vpop.eup %3241 }
0x11dc   :  { %2004 = vrot.lane.b32.xlu1 %v3242_v5, %s3454_s27  ;;  %v3244_v10 = vpop.eup %3243 }
0x11dd   :  { %v1901_v11 = vadd.f32 1.0, %v3244_v10  ;;  %v3246_v12 = vpop.eup %3245 }
0x11de   :  { %v1998_v13 = vadd.f32 1.0, %v3246_v12 }
0x11df   :  { %3247 = vrcp.f32 %v1901_v11 }
0x11e0   :  { %3249 = vrcp.f32 %v1998_v13 }
0x11e9   :  { %v3248_v17 = vpop.eup %3247 }
0x11ea   :  { %v3250_v59 = vpop.eup %3249  ;;  %v1905_v18 = vmul.f32 %v3248_v17, %v3860_v38 }
0x11eb   :  { %v2002_v22 = vmul.f32 %v3250_v59, %v3862_v41 }
0x1249   :  { %v1908_v3 = vpop.permute.xlu0 %1907 }
0x124a   :  { %v1910_v15 = vmul.f32 %v3248_v17, %v1908_v3 }
0x124c   :  { %1912 = vrot.lane.b32.xlu0 %v1910_v15, %s3454_s27 }
0x124e   :  { %v2005_v16 = vpop.permute.xlu1 %2004 }
0x124f   :  { %v2007_v19 = vmul.f32 %v3250_v59, %v2005_v16 }
0x1251   :  { %2009 = vrot.lane.b32.xlu1 %v2007_v19, %s3454_s27 }
0x12be   :  { %v1913_v20 = vpop.permute.xlu0 %1912 }
0x12bf   :  { %v3899_v21 = vadd.f32 %v1913_v20, %v1905_v18 }
0x12c1   :  { %3251 = vtanh.f32 %v3899_v21 }
0x12c3   :  { %v2010_v23 = vpop.permute.xlu1 %2009 }
0x12c4   :  { %v3903_v24 = vadd.f32 %v2010_v23, %v2002_v22 }
0x12c6   :  { %3253 = vtanh.f32 %v3903_v24 }
0x12cb   :  { %v3252_v25 = vpop.eup %3251 }
0x12cc   :  { %1918 = vrot.lane.b32.xlu0 %v3252_v25, %s3454_s27 }
0x12d0   :  { %v3254_v26 = vpop.eup %3253 }
0x12d1   :  { %2015 = vrot.lane.b32.xlu1 %v3254_v26, %s3454_s27 }
0x133e   :  { %v1919_v60 = vpop.permute.xlu0 %1918 }
0x133f   :  { %v1921_v27 = vmul.f32 %v3248_v17, %v1919_v60 }
0x1341   :  { %2020 = vrot.lane.b32.xlu0 %v1921_v27, %s3455_s17 }
0x1343   :  { %v2016_v28 = vpop.permute.xlu1 %2015 }
0x1344   :  { %v2018_v29 = vmul.f32 %v3250_v59, %v2016_v28 }
0x1346   :  { %2095 = vrot.lane.b32.xlu1 %v2018_v29, %s3455_s17 }
0x13b3   :  { %v2021_v30 = vpop.permute.xlu0 %2020 }
0x13b4   :  { %2938 = vmatmul.mubr.msk.f32.vlgmr.msra.gmra.mrb[20].mxu1 %vm99_vm0, %v2021_v30 }
0x13b5   :  { %3120 = vmatpush3.bf16.msra.mxu1 %v3599_v9  ;;  %2959 = vmatprep.mubr.msk.f32.mxu1 %vm3452_vm1, %v3453_v1 }
0x13b6   :  { %3121 = vmatprep.subr.bf16.mxu1 %v3451_v0 }
0x13b8   :  { %v2096_v31 = vpop.permute.xlu1 %2095 }
0x13b9   :  { %3123 = vmatpush3.bf16.msra.mxu1 %v3603_v14  ;;  %2949 = vmatmul.mubr.msk.f32.vlgmr.msra.gmra.mrb[26].mxu0 %vm99_vm0, %v2096_v31 }
0x13ba   :  { %3130 = vmatprep.subr.bf16.mxu1 %v3451_v0  ;;  %3126 = vmatpush3.bf16.msra.mxu0 %v3629_v43 }
0x13bb   :  { %3127 = vmatprep.subr.bf16.mxu0 %v3451_v0  ;;  %2970 = vmatprep.mubr.msk.f32.mxu0 %vm3452_vm1, %v3453_v1 }
0x13bc   :  { %2960 = vmatmul.mubr.msk.f32.vlgmr.msra.gmra.mrb[22].mxu1 %vm99_vm0, %v2096_v31 }
0x13bd   :  { %3132 = vmatpush3.bf16.msra.mxu1 %v3627_v39  ;;  %2981 = vmatprep.mubr.msk.f32.mxu1 %vm3452_vm1, %v3453_v1  ;;  %v248_v39 = vadd.f32 %v3279_v34, %v3668_v63 }
0x13be   :  { %3133 = vmatprep.subr.bf16.mxu1 %v3451_v0  ;;  %3129 = vmatpush3.bf16.msra.mxu0 %v3635_v49 }
0x13c1   :  { %3135 = vmatpush3.bf16.msra.mxu1 %v3637_v50 }
0x1487   :  { %v2090_v9 = vpop.f32.mrb[20].mxu1 }
0x1488   :  { %v2939_v14 = vpop.f32.mrb[21].mxu1 }
0x148c   :  { %v2165_v43 = vpop.f32.mrb[26].mxu0 }
0x148d   :  { %v2166_v32 = vadd.f32 %v2165_v43, %v2090_v9  ;;  %v2950_v33 = vpop.f32.mrb[27].mxu0 }
0x148f   :  { %v2169_v36 = vadd.f32 %v3691_v6, %v2166_v32  ;;  %v2262_v1 = vpop.f32.mrb[22].mxu1 }
0x1490   :  { %v2266_v37 = vadd.f32 %v2262_v1, %v248_v39  ;;  %v2961_v0 = vpop.f32.mrb[23].mxu1 }
0x1491   :  { %3255 = vtanh.f32 %v2169_v36  ;;  %v2562_v38 = vmul.f32 -1.442695, %v2169_v36 }
0x1492   :  { %3257 = vtanh.f32 %v2266_v37  ;;  %v2564_v40 = vmul.f32 -1.442695, %v2266_v37 }
0x1493   :  { %3259 = vpow2.f32 %v2562_v38 }
0x1494   :  { %3261 = vpow2.f32 %v2564_v40 }
0x149b   :  { %v3256_v49 = vpop.eup %3255 }
0x149c   :  { %v3258_v50 = vpop.eup %3257  ;;  %2179 = vrot.lane.b32.xlu0 %v3256_v49, %s3454_s27 }
0x149d   :  { %2276 = vrot.lane.b32.xlu1 %v3258_v50, %s3454_s27  ;;  %v3260_v41 = vpop.eup %3259 }
0x149e   :  { %v3262_v42 = vpop.eup %3261  ;;  %v2173_v63 = vadd.f32 1.0, %v3260_v41 }
0x149f   :  { %v2270_v44 = vadd.f32 1.0, %v3262_v42 }
0x14a0   :  { %3263 = vrcp.f32 %v2173_v63 }
0x14a1   :  { %3265 = vrcp.f32 %v2270_v44 }
0x14aa   :  { %v3264_v61 = vpop.eup %3263 }
0x14ab   :  { %v3266_v35 = vpop.eup %3265  ;;  %v2177_v51 = vmul.f32 %v3264_v61, %v3899_v21 }
0x14ac   :  { %v2274_v53 = vmul.f32 %v3266_v35, %v3903_v24 }
0x150e   :  { %v2180_v45 = vpop.permute.xlu0 %2179 }
0x150f   :  { %v2182_v46 = vmul.f32 %v3264_v61, %v2180_v45  ;;  %v2277_v47 = vpop.permute.xlu1 %2276 }
0x1510   :  { %v2279_v48 = vmul.f32 %v3266_v35, %v2277_v47 }
0x1511   :  { %2184 = vrot.lane.b32.xlu0 %v2182_v46, %s3454_s27 }
0x1512   :  { %2281 = vrot.lane.b32.xlu1 %v2279_v48, %s3454_s27 }
0x1583   :  { %v2185_v52 = vpop.permute.xlu0 %2184 }
0x1584   :  { %v2187_v58 = vadd.f32 %v2185_v52, %v2177_v51  ;;  %v2282_v54 = vpop.permute.xlu1 %2281 }
0x1585   :  { %v2284_v55 = vadd.f32 %v2282_v54, %v2274_v53 }
0x1586   :  { %3267 = vtanh.f32 %v2187_v58 }
0x1587   :  { %3269 = vtanh.f32 %v2284_v55 }
0x1590   :  { %v3268_v56 = vpop.eup %3267 }
0x1591   :  { %v3270_v57 = vpop.eup %3269  ;;  %2190 = vrot.lane.b32.xlu0 %v3268_v56, %s3454_s27 }
0x1592   :  { %2287 = vrot.lane.b32.xlu1 %v3270_v57, %s3454_s27 }
0x1603   :  { %v2191_v62 = vpop.permute.xlu0 %2190 }
0x1604   :  { %v2193_v2 = vmul.f32 %v3264_v61, %v2191_v62  ;;  %v2288_v4 = vpop.permute.xlu1 %2287 }
0x1605   :  { %v2290_v5 = vmul.f32 %v3266_v35, %v2288_v4 }
0x1606   :  { %2292 = vrot.lane.b32.xlu0 %v2193_v2, %s3455_s17 }
0x1607   :  { %2367 = vrot.lane.b32.xlu1 %v2290_v5, %s3455_s17 }
0x1678   :  { %v2293_v7 = vpop.permute.xlu0 %2292 }
0x1679   :  { %v2368_v8 = vpop.permute.xlu1 %2367  ;;  %2971 = vmatmul.mubr.msk.f32.vlgmr.msra.gmra.mrb[28].mxu0 %vm99_vm0, %v2293_v7 }
0x167a   :  { %2467 = vst.msk [vmem:[#allocation12] sm:$0xff] %vm99_vm0, %v2368_v8  ;;  %2982 = vmatmul.mubr.msk.f32.vlgmr.msra.gmra.mrb[24].mxu1 %vm99_vm0, %v2368_v8 }
0x174c   :  { %v2362_v10 = vpop.f32.mrb[28].mxu0 }
0x174d   :  { %v2437_v11 = vpop.f32.mrb[24].mxu1  ;;  %v2972_v12 = vpop.f32.mrb[29].mxu0 }
0x174e   :  { %v2438_v13 = vadd.f32 %v2437_v11, %v2362_v10  ;;  %v2983_v17 = vpop.f32.mrb[25].mxu1 }
0x1750   :  { %v2441_v3 = vadd.f32 %v3691_v6, %v2438_v13 }
0x1752   :  { %3271 = vtanh.f32 %v2441_v3  ;;  %v2567_v59 = vmul.f32 -1.442695, %v2441_v3 }
0x1754   :  { %3273 = vpow2.f32 %v2567_v59 }
0x175c   :  { %v3272_v15 = vpop.eup %3271 }
0x175d   :  { %2451 = vrot.lane.b32.xlu0 %v3272_v15, %s3454_s27 }
0x175e   :  { %v3274_v16 = vpop.eup %3273 }
0x175f   :  { %v2445_v19 = vadd.f32 1.0, %v3274_v16 }
0x1761   :  { %3275 = vrcp.f32 %v2445_v19 }
0x176b   :  { %v3276_v18 = vpop.eup %3275 }
0x176c   :  { %v2449_v22 = vmul.f32 %v3276_v18, %v2187_v58 }
0x17cf   :  { %v2452_v20 = vpop.permute.xlu0 %2451 }
0x17d0   :  { %v2454_v21 = vmul.f32 %v3276_v18, %v2452_v20 }
0x17d2   :  { %2456 = vrot.lane.b32.xlu1 %v2454_v21, %s3454_s27 }
0x17d6   :  { %2469 = vrot.lane.b32.xlu1 %v2284_v55, %s3456_s5 }
0x1844   :  { %v2457_v23 = vpop.permute.xlu1 %2456 }
0x1845   :  { %v2459_v24 = vadd.f32 %v2457_v23, %v2449_v22 }
0x1847   :  { %3277 = vtanh.f32 %v2459_v24  ;;  %2479 = vrot.lane.b32.xlu1 %v2459_v24, %s3456_s5 }
0x1848   :  { %v2470_v6 = vpop.permute.xlu1 %2469 }
0x1849   :  { %2472 = vst.msk [vmem:[#allocation13] sm:$0xff] %vm99_vm0, %v2470_v6 }
0x1851   :  { %v3278_v25 = vpop.eup %3277 }
0x1852   :  { %2462 = vrot.lane.b32.xlu0 %v3278_v25, %s3454_s27 }
0x18b9   :  { %v2480_v26 = vpop.permute.xlu1 %2479 }
0x18ba   :  { %2482 = vst.msk [vmem:[#allocation13 + $0x8] sm:$0xff] %vm99_vm0, %v2480_v26 }
0x18bb   :  { %3401 = shalt.err (!%p3398_p2)
}
0x18bc   :  { %s3402_s25 = scalar_lea.hbm %s3992_s7, 256 }
0x18bd   :  { %p3403_p3 = scmp.ne.s32.totalorder %s3992_s7, %s3402_s25  ;;  %p3406_p4 = scmp.lt.u32.totalorder %s3402_s25, %s3992_s7 }
0x18bf   :  { %p3408_p5 = pnand %p3406_p4, %p3403_p3 }
0x18c1   :  { %3411 = shalt.err (!%p3408_p5)
}
0x18c2   :  { %2506 = dma.vmem_to_hbm [thread:$0]  %s2501_s23, 256, %s3992_s7, [#allocation14], %s3446_s13, %s3446_s13, %s3447_s14  }
0x18c3   :  { %s3458_s11 = smov [#allocation12]  }
0x18c4   :  { %v2463_v60 = vpop.permute.xlu0 %2462  ;;  %s2488_s12 = sshll.u32 %s3458_s11, 4  ;;  %s2489_s12 = int_to_ptr.vmem [resolvable:$true] %s2488_s12 }
0x18c5   :  { %v2465_v27 = vmul.f32 %v3276_v18, %v2463_v60  ;;  %s3412_s15 = scalar_lea.vmem %s2489_s12, 256  ;;  %p3417_p7 = scmp.lt.s32.totalorder %s2489_s12, %s2489_s12 }
0x18c6   :  { %p3413_p6 = scmp.ne.s32.totalorder %s2489_s12, %s3412_s15  ;;  %p3418_p8 = scmp.lt.s32.totalorder %s3412_s15, %s3412_s15 }
0x18c7   :  { %2474 = vrot.lane.b32.xlu0 %v2465_v27, %s3455_s17 }
0x18c8   :  { %p3419_p9 = por %p3418_p8, %p3417_p7 }
0x18ca   :  { %p3420_p10 = pnand %p3419_p9, %p3413_p6 }
0x1939   :  { %v2475_v28 = vpop.permute.xlu0 %2474 }
0x193a   :  { %2477 = vst.msk [vmem:[#allocation12 + $0x8] sm:$0xff] %vm99_vm0, %v2475_v28 }
0x193b   :  { %3423 = shalt.err (!%p3420_p10)
}
0x193c   :  { %s3424_s7 = scalar_lea.hbm %s3991_s6, 256 }
0x193d   :  { %p3425_p11 = scmp.ne.s32.totalorder %s3991_s6, %s3424_s7  ;;  %p3428_p12 = scmp.lt.u32.totalorder %s3424_s7, %s3991_s6 }
0x193f   :  { %p3430_p13 = pnand %p3428_p12, %p3425_p11 }
0x1941   :  { %3433 = shalt.err (!%p3430_p13)
}
0x1942   :  { %2494 = dma.vmem_to_hbm [thread:$0]  %s2489_s12, 256, %s3991_s6, [#allocation5], %s3446_s13, %s3446_s13, %s3447_s14  }
0x1943   :  { %3440 = dma.done.wait [#allocation5], 256  }
0x1944   :  { %3441 = vsyncadd [#allocation5], 4294967040 }
0x1945   :  { %3442 = dma.done.wait [#allocation14], 256  }
0x1946   :  { %3443 = vsyncadd [#allocation14], 4294967040 }
0x1947   :  { %2513 = vsyncpa [#allocation4], 1 }
0x1948   :  { %2514 = vsyncpa [#allocation7], 1 }
0x1949   :  { %2515 = vsyncpa [#allocation10], 1 }
0x194a   :  { %2516 = vsyncpa [#allocation5], 1 }
0x194b   :  { %2517 = vsyncpa [#allocation14], 1 }

</bundles_post_ra>
